<compile_context>
chip_gen: v5e
topology: v5e:2x2
jax: 0.10.0
libtpu: 0.0.40
codegen_flags: <defaults>
</compile_context>

<pallas_src>
import jax
import jax.numpy as jnp
from jax import lax
from jax.experimental import pallas as pl
from jax.experimental.pallas import tpu as pltpu

LANES = 128
SUBLANES = 8
CHUNK_ROWS = 512                       # in-kernel chunk (already in VMEM)
MIN_BLOCK_ROWS = 512                   # past the pipelining knee
TARGET_STEP_INPUT_BYTES = 8 * 1024 * 1024   # combined (pred+true) bytes / step
VMEM_LIMIT_BYTES = 32 * 1024 * 1024    # raises v5e default; safe on v6e/v7x
SMALL_INPUT_BYTES = 2 * 1024 * 1024    # combined bytes below which we skip Pallas


def _cdiv(a, b):
    return (a + b - 1) // b


def _round_up(a, b):
    return _cdiv(a, b) * b


def _round_down(a, b):
    return (a // b) * b


def _make_partial_kernel(block_rows, rows_in_last, needs_mask):
    """Kernel computing one per-block (8, 128) partial sum of (true - pred)^2."""
    num_chunks = block_rows // CHUNK_ROWS
    groups = CHUNK_ROWS // SUBLANES

    def kernel(pred_ref, true_ref, out_ref):
        def make_body(mask_bound):
            def body(c, acc):
                r0 = pl.multiple_of(c * CHUNK_ROWS, CHUNK_ROWS)
                p = pred_ref[pl.ds(r0, CHUNK_ROWS), :].astype(jnp.float32)
                t = true_ref[pl.ds(r0, CHUNK_ROWS), :].astype(jnp.float32)
                d = t - p
                sq = d * d
                if mask_bound is not None:
                    # Rows past the end of the array hold garbage from the
                    # padded DMA of the last block; select (not multiply) so
                    # NaN/Inf garbage cannot propagate into the reduction.
                    row_ids = r0 + lax.broadcasted_iota(jnp.int32, sq.shape, 0)
                    sq = jnp.where(row_ids < mask_bound, sq, 0.0)
                # (CHUNK_ROWS,128) -> (groups,8,128) -> (8,128): pure VPU adds,
                # no cross-lane XLU work; the (8,128) store is lane-dense.
                return acc + jnp.sum(sq.reshape(groups, SUBLANES, LANES), axis=0)
            return body

        zero = jnp.zeros((SUBLANES, LANES), jnp.float32)

        if needs_mask:
            last = pl.num_programs(0) - 1

            @pl.when(pl.program_id(0) < last)
            def _():
                out_ref[0] = lax.fori_loop(
                    0, num_chunks, make_body(None), zero, unroll=True)

            @pl.when(pl.program_id(0) == last)
            def _():
                out_ref[0] = lax.fori_loop(
                    0, num_chunks, make_body(rows_in_last), zero, unroll=True)
        else:
            out_ref[0] = lax.fori_loop(
                0, num_chunks, make_body(None), zero, unroll=True)

    return kernel


def mse_loss(y_pred, y_true):
    """Mean squared error over all elements. Returns a float32 scalar."""
    assert y_pred.shape == y_true.shape
    n_elems = y_pred.size
    if n_elems == 0:
        return jnp.float32(jnp.nan)  # matches torch.mean on an empty tensor

    rows_total = n_elems // LANES
    in_bytes = n_elems * (y_pred.dtype.itemsize + y_true.dtype.itemsize)

    # Small-tensor fast path: plain XLA fusion beats the Pallas launch cost.
    if in_bytes < SMALL_INPUT_BYTES or rows_total < 2 * MIN_BLOCK_ROWS:
        d = y_true.astype(jnp.float32) - y_pred.astype(jnp.float32)
        return jnp.mean(d * d)

    flat_pred = jnp.ravel(y_pred)  # native dtype; cast happens in-kernel
    flat_true = jnp.ravel(y_true)

    # Lane-aligned prefix goes through the kernel; the (<128 element) tail, if
    # any, is handled in plain JAX.  Avoids full-array jnp.pad copies.
    n_aligned = rows_total * LANES

    total = jnp.float32(0.0)
    if n_aligned < n_elems:
        tp = flat_pred[n_aligned:].astype(jnp.float32)
        tt = flat_true[n_aligned:].astype(jnp.float32)
        td = tt - tp
        total = total + jnp.sum(td * td)

    rows = rows_total
    pred2d = flat_pred[:n_aligned].reshape(rows, LANES)
    true2d = flat_true[:n_aligned].reshape(rows, LANES)

    # Per-dtype block-size budget (~8 MiB combined input per step), clamped so
    # there are always >= 2 blocks (v7x megacore).  Multiple of CHUNK_ROWS.
    bytes_per_row = LANES * (pred2d.dtype.itemsize + true2d.dtype.itemsize)
    cap = max(CHUNK_ROWS,
              _round_down(TARGET_STEP_INPUT_BYTES // bytes_per_row, CHUNK_ROWS))
    block_rows = min(cap, _round_up(_cdiv(rows, 2), CHUNK_ROWS))

    num_blocks = _cdiv(rows, block_rows)
    needs_mask = (num_blocks * block_rows) != rows
    rows_in_last = rows - (num_blocks - 1) * block_rows

    kernel = _make_partial_kernel(block_rows, rows_in_last, needs_mask)

    bytes_in = (pred2d.size * pred2d.dtype.itemsize
                + true2d.size * true2d.dtype.itemsize)
    bytes_out = num_blocks * SUBLANES * LANES * 4

    partials = pl.pallas_call(
        kernel,
        out_shape=jax.ShapeDtypeStruct((num_blocks, SUBLANES, LANES), jnp.float32),
        grid_spec=pltpu.PrefetchScalarGridSpec(
            num_scalar_prefetch=0,
            grid=(num_blocks,),
            in_specs=[
                pl.BlockSpec((block_rows, LANES), lambda i: (i, 0)),
                pl.BlockSpec((block_rows, LANES), lambda i: (i, 0)),
            ],
            out_specs=pl.BlockSpec((1, SUBLANES, LANES), lambda i: (i, 0, 0)),
        ),
        compiler_params=pltpu.CompilerParams(
            dimension_semantics=("parallel",),
            vmem_limit_bytes=VMEM_LIMIT_BYTES,
        ),
        cost_estimate=pl.CostEstimate(
            flops=3 * n_aligned,
            transcendentals=0,
            bytes_accessed=bytes_in + bytes_out,
        ),
    )(pred2d, true2d)

    total = total + jnp.sum(partials)
    return total / jnp.float32(n_elems)


if __name__ == "__main__":
    key = jax.random.PRNGKey(0)
    k1, k2, k3, k4, k5, k6 = jax.random.split(key, 6)

    # Primary check: small NCHW-like shape consistent with an image/registration
    # loss.  Exercises the small-tensor fast path.
    shape = (2, 4, 16, 16)
    y_pred = jax.random.normal(k1, shape, dtype=jnp.float32)
    y_true = jax.random.normal(k2, shape, dtype=jnp.float32)
    out = jax.block_until_ready(mse_loss(y_pred, y_true))
    ref = jnp.mean((y_true - y_pred) ** 2)
    assert jnp.allclose(out, ref, rtol=1e-6, atol=1e-6), (out, ref)

    # Kernel path: multi-block grid + masked (partial) last block + the
    # non-lane-aligned JAX tail.
    shape2 = (2, 2, 301, 300)   # 361200 elems -> rows=2821 -> 2 blocks + tail
    y_pred2 = jax.random.normal(k3, shape2, dtype=jnp.float32)
    y_true2 = jax.random.normal(k4, shape2, dtype=jnp.float32)
    out2 = jax.block_until_ready(mse_loss(y_pred2, y_true2))
    ref2 = jnp.mean((y_true2 - y_pred2) ** 2)
    assert jnp.allclose(out2, ref2, rtol=1e-4, atol=1e-6), (out2, ref2)

    # Kernel path with a sub-32-bit input dtype (in-kernel cast to f32).
    shape3 = (4, 64, 64, 40)    # 655360 elems bf16 -> rows=5120, 2 blocks
    y_pred3 = jax.random.normal(k5, shape3, dtype=jnp.float32).astype(jnp.bfloat16)
    y_true3 = jax.random.normal(k6, shape3, dtype=jnp.float32).astype(jnp.bfloat16)
    out3 = jax.block_until_ready(mse_loss(y_pred3, y_true3))
    d3 = y_true3.astype(jnp.float32) - y_pred3.astype(jnp.float32)
    ref3 = jnp.mean(d3 * d3)
    assert jnp.allclose(out3, ref3, rtol=1e-4, atol=1e-6), (out3, ref3)

    print("KERNEL_OK")
</pallas_src>

<mosaic_0001>
module attributes {stable_mosaic.version = 11 : i64} {
  func.func @kernel(%arg0: i32, %arg1: memref<1536x128xf32, #tpu.memory_space<vmem>>, %arg2: memref<1536x128xf32, #tpu.memory_space<vmem>>, %arg3: memref<1x8x128xf32, #tpu.memory_space<vmem>>) attributes {dimension_semantics = [#tpu.dimension_semantics<parallel>], iteration_bounds = array<i64: 2>, scalar_prefetch = 0 : i64, scratch_operands = 0 : i64, tpu.core_type = #tpu.core_type<tc>, window_params = [{transform_indices = @transform_0, window_bounds = array<i64: 1536, 128>}, {transform_indices = @transform_1, window_bounds = array<i64: 1536, 128>}, {transform_indices = @transform_2, window_bounds = array<i64: 1, 8, 128>}]} {
    %cst = arith.constant 0.000000e+00 : f32
    %0 = vector.broadcast %cst : f32 to vector<8x128xf32>
    %c1_i32 = arith.constant 1 : i32
    %1 = arith.cmpi slt, %arg0, %c1_i32 : i32
    %2 = arith.extui %1 : i1 to i32
    %c0_i32 = arith.constant 0 : i32
    %3 = arith.cmpi ne, %2, %c0_i32 : i32
    scf.if %3 {
      %c0_i32_2 = arith.constant 0 : i32
      %c512_i32 = arith.constant 512 : i32
      %7 = arith.muli %c0_i32_2, %c512_i32 : i32
      %8 = tpu.assume_multiple %7, 512 : i32
      %9 = arith.index_cast %8 : i32 to index
      %c0 = arith.constant 0 : index
      %10 = vector.load %arg1[%9, %c0] : memref<1536x128xf32, #tpu.memory_space<vmem>>, vector<512x128xf32>
      %11 = arith.index_cast %8 : i32 to index
      %c0_3 = arith.constant 0 : index
      %12 = vector.load %arg2[%11, %c0_3] : memref<1536x128xf32, #tpu.memory_space<vmem>>, vector<512x128xf32>
      %13 = arith.subf %12, %10 : vector<512x128xf32>
      %14 = arith.mulf %13, %13 : vector<512x128xf32>
      %15 = vector.shape_cast %14 : vector<512x128xf32> to vector<64x8x128xf32>
      %cst_4 = arith.constant dense<0.000000e+00> : vector<8x128xf32>
      %16 = vector.multi_reduction <add>, %15, %cst_4 [0] : vector<64x8x128xf32> to vector<8x128xf32>
      %17 = arith.addf %0, %16 : vector<8x128xf32>
      %c1_i32_5 = arith.constant 1 : i32
      %c512_i32_6 = arith.constant 512 : i32
      %18 = arith.muli %c1_i32_5, %c512_i32_6 : i32
      %19 = tpu.assume_multiple %18, 512 : i32
      %20 = arith.index_cast %19 : i32 to index
      %c0_7 = arith.constant 0 : index
      %21 = vector.load %arg1[%20, %c0_7] : memref<1536x128xf32, #tpu.memory_space<vmem>>, vector<512x128xf32>
      %22 = arith.index_cast %19 : i32 to index
      %c0_8 = arith.constant 0 : index
      %23 = vector.load %arg2[%22, %c0_8] : memref<1536x128xf32, #tpu.memory_space<vmem>>, vector<512x128xf32>
      %24 = arith.subf %23, %21 : vector<512x128xf32>
      %25 = arith.mulf %24, %24 : vector<512x128xf32>
      %26 = vector.shape_cast %25 : vector<512x128xf32> to vector<64x8x128xf32>
      %cst_9 = arith.constant dense<0.000000e+00> : vector<8x128xf32>
      %27 = vector.multi_reduction <add>, %26, %cst_9 [0] : vector<64x8x128xf32> to vector<8x128xf32>
      %28 = arith.addf %17, %27 : vector<8x128xf32>
      %c2_i32 = arith.constant 2 : i32
      %c512_i32_10 = arith.constant 512 : i32
      %29 = arith.muli %c2_i32, %c512_i32_10 : i32
      %30 = tpu.assume_multiple %29, 512 : i32
      %31 = arith.index_cast %30 : i32 to index
      %c0_11 = arith.constant 0 : index
      %32 = vector.load %arg1[%31, %c0_11] : memref<1536x128xf32, #tpu.memory_space<vmem>>, vector<512x128xf32>
      %33 = arith.index_cast %30 : i32 to index
      %c0_12 = arith.constant 0 : index
      %34 = vector.load %arg2[%33, %c0_12] : memref<1536x128xf32, #tpu.memory_space<vmem>>, vector<512x128xf32>
      %35 = arith.subf %34, %32 : vector<512x128xf32>
      %36 = arith.mulf %35, %35 : vector<512x128xf32>
      %37 = vector.shape_cast %36 : vector<512x128xf32> to vector<64x8x128xf32>
      %cst_13 = arith.constant dense<0.000000e+00> : vector<8x128xf32>
      %38 = vector.multi_reduction <add>, %37, %cst_13 [0] : vector<64x8x128xf32> to vector<8x128xf32>
      %39 = arith.addf %28, %38 : vector<8x128xf32>
      %c3_i32 = arith.constant 3 : i32
      %c0_14 = arith.constant 0 : index
      %c0_15 = arith.constant 0 : index
      %c0_16 = arith.constant 0 : index
      %40 = vector.load %arg3[%c0_14, %c0_15, %c0_16] : memref<1x8x128xf32, #tpu.memory_space<vmem>>, vector<1x8x128xf32>
      %41 = vector.shape_cast %40 : vector<1x8x128xf32> to vector<8x128xf32>
      %42 = vector.shape_cast %39 : vector<8x128xf32> to vector<1x8x128xf32>
      tpu.vector_store %arg3[%c0_14, %c0_15, %c0_16], %42 {strides = array<i32>} : memref<1x8x128xf32, #tpu.memory_space<vmem>>, vector<1x8x128xf32>,
    } else {
    }
    %c1_i32_0 = arith.constant 1 : i32
    %4 = arith.cmpi eq, %arg0, %c1_i32_0 : i32
    %5 = arith.extui %4 : i1 to i32
    %c0_i32_1 = arith.constant 0 : i32
    %6 = arith.cmpi ne, %5, %c0_i32_1 : i32
    scf.if %6 {
      %c0_i32_2 = arith.constant 0 : i32
      %c512_i32 = arith.constant 512 : i32
      %7 = arith.muli %c0_i32_2, %c512_i32 : i32
      %8 = tpu.assume_multiple %7, 512 : i32
      %9 = arith.index_cast %8 : i32 to index
      %c0 = arith.constant 0 : index
      %10 = vector.load %arg1[%9, %c0] : memref<1536x128xf32, #tpu.memory_space<vmem>>, vector<512x128xf32>
      %11 = arith.index_cast %8 : i32 to index
      %c0_3 = arith.constant 0 : index
      %12 = vector.load %arg2[%11, %c0_3] : memref<1536x128xf32, #tpu.memory_space<vmem>>, vector<512x128xf32>
      %13 = arith.subf %12, %10 : vector<512x128xf32>
      %14 = arith.mulf %13, %13 : vector<512x128xf32>
      %15 = tpu.iota {dimensions = array<i32: 0>} : vector<512x128xi32>
      %16 = vector.broadcast %8 : i32 to vector<512x128xi32>
      %17 = arith.addi %16, %15 : vector<512x128xi32>
      %c1285_i32 = arith.constant 1285 : i32
      %18 = vector.broadcast %c1285_i32 : i32 to vector<512x128xi32>
      %19 = arith.cmpi slt, %17, %18 : vector<512x128xi32>
      %cst_4 = arith.constant 0.000000e+00 : f32
      %20 = vector.broadcast %cst_4 : f32 to vector<512x128xf32>
      %21 = arith.select %19, %14, %20 : vector<512x128xi1>, vector<512x128xf32>
      %22 = vector.shape_cast %21 : vector<512x128xf32> to vector<64x8x128xf32>
      %cst_5 = arith.constant dense<0.000000e+00> : vector<8x128xf32>
      %23 = vector.multi_reduction <add>, %22, %cst_5 [0] : vector<64x8x128xf32> to vector<8x128xf32>
      %24 = arith.addf %0, %23 : vector<8x128xf32>
      %c1_i32_6 = arith.constant 1 : i32
      %c512_i32_7 = arith.constant 512 : i32
      %25 = arith.muli %c1_i32_6, %c512_i32_7 : i32
      %26 = tpu.assume_multiple %25, 512 : i32
      %27 = arith.index_cast %26 : i32 to index
      %c0_8 = arith.constant 0 : index
      %28 = vector.load %arg1[%27, %c0_8] : memref<1536x128xf32, #tpu.memory_space<vmem>>, vector<512x128xf32>
      %29 = arith.index_cast %26 : i32 to index
      %c0_9 = arith.constant 0 : index
      %30 = vector.load %arg2[%29, %c0_9] : memref<1536x128xf32, #tpu.memory_space<vmem>>, vector<512x128xf32>
      %31 = arith.subf %30, %28 : vector<512x128xf32>
      %32 = arith.mulf %31, %31 : vector<512x128xf32>
      %33 = tpu.iota {dimensions = array<i32: 0>} : vector<512x128xi32>
      %34 = vector.broadcast %26 : i32 to vector<512x128xi32>
      %35 = arith.addi %34, %33 : vector<512x128xi32>
      %c1285_i32_10 = arith.constant 1285 : i32
      %36 = vector.broadcast %c1285_i32_10 : i32 to vector<512x128xi32>
      %37 = arith.cmpi slt, %35, %36 : vector<512x128xi32>
      %cst_11 = arith.constant 0.000000e+00 : f32
      %38 = vector.broadcast %cst_11 : f32 to vector<512x128xf32>
      %39 = arith.select %37, %32, %38 : vector<512x128xi1>, vector<512x128xf32>
      %40 = vector.shape_cast %39 : vector<512x128xf32> to vector<64x8x128xf32>
      %cst_12 = arith.constant dense<0.000000e+00> : vector<8x128xf32>
      %41 = vector.multi_reduction <add>, %40, %cst_12 [0] : vector<64x8x128xf32> to vector<8x128xf32>
      %42 = arith.addf %24, %41 : vector<8x128xf32>
      %c2_i32 = arith.constant 2 : i32
      %c512_i32_13 = arith.constant 512 : i32
      %43 = arith.muli %c2_i32, %c512_i32_13 : i32
      %44 = tpu.assume_multiple %43, 512 : i32
      %45 = arith.index_cast %44 : i32 to index
      %c0_14 = arith.constant 0 : index
      %46 = vector.load %arg1[%45, %c0_14] : memref<1536x128xf32, #tpu.memory_space<vmem>>, vector<512x128xf32>
      %47 = arith.index_cast %44 : i32 to index
      %c0_15 = arith.constant 0 : index
      %48 = vector.load %arg2[%47, %c0_15] : memref<1536x128xf32, #tpu.memory_space<vmem>>, vector<512x128xf32>
      %49 = arith.subf %48, %46 : vector<512x128xf32>
      %50 = arith.mulf %49, %49 : vector<512x128xf32>
      %51 = tpu.iota {dimensions = array<i32: 0>} : vector<512x128xi32>
      %52 = vector.broadcast %44 : i32 to vector<512x128xi32>
      %53 = arith.addi %52, %51 : vector<512x128xi32>
      %c1285_i32_16 = arith.constant 1285 : i32
      %54 = vector.broadcast %c1285_i32_16 : i32 to vector<512x128xi32>
      %55 = arith.cmpi slt, %53, %54 : vector<512x128xi32>
      %cst_17 = arith.constant 0.000000e+00 : f32
      %56 = vector.broadcast %cst_17 : f32 to vector<512x128xf32>
      %57 = arith.select %55, %50, %56 : vector<512x128xi1>, vector<512x128xf32>
      %58 = vector.shape_cast %57 : vector<512x128xf32> to vector<64x8x128xf32>
      %cst_18 = arith.constant dense<0.000000e+00> : vector<8x128xf32>
      %59 = vector.multi_reduction <add>, %58, %cst_18 [0] : vector<64x8x128xf32> to vector<8x128xf32>
      %60 = arith.addf %42, %59 : vector<8x128xf32>
      %c3_i32 = arith.constant 3 : i32
      %c0_19 = arith.constant 0 : index
      %c0_20 = arith.constant 0 : index
      %c0_21 = arith.constant 0 : index
      %61 = vector.load %arg3[%c0_19, %c0_20, %c0_21] : memref<1x8x128xf32, #tpu.memory_space<vmem>>, vector<1x8x128xf32>
      %62 = vector.shape_cast %61 : vector<1x8x128xf32> to vector<8x128xf32>
      %63 = vector.shape_cast %60 : vector<8x128xf32> to vector<1x8x128xf32>
      tpu.vector_store %arg3[%c0_19, %c0_20, %c0_21], %63 {strides = array<i32>} : memref<1x8x128xf32, #tpu.memory_space<vmem>>, vector<1x8x128xf32>,
    } else {
    }
    return
  }
  func.func @transform_0(%arg0: i32) -> (i32, i32) {
    %c0_i32 = arith.constant 0 : i32
    %c0_i32_0 = arith.constant 0 : i32
    return %arg0, %c0_i32 : i32, i32
  }
  func.func @transform_1(%arg0: i32) -> (i32, i32) {
    %c0_i32 = arith.constant 0 : i32
    %c0_i32_0 = arith.constant 0 : i32
    return %arg0, %c0_i32 : i32, i32
  }
  func.func @transform_2(%arg0: i32) -> (i32, i32, i32) {
    %c0_i32 = arith.constant 0 : i32
    %c0_i32_0 = arith.constant 0 : i32
    %c0_i32_1 = arith.constant 0 : i32
    return %arg0, %c0_i32, %c0_i32_0 : i32, i32, i32
  }
}

</mosaic_0001>

<bundles_post_ra>
// kernel: tpu_custom_call.1
= control target key start
LH: loop header
LB: loop body
LE: loop exit
PB: predicated region body
PF: predicated region fallthrough
CT: control target
= control target key end

     0   :  { %7 = vsyncpa [#allocation3], 0  ;;  %s4791_s0 = inlined_call_operand.hbm [shape: f32[2821,128], index: 0, kind: input, shape index: {}]   ;;  %s4792_s1 = inlined_call_operand.hbm [shape: f32[2821,128], index: 1, kind: input, shape index: {}]   ;;  %s4793_s2 = inlined_call_operand.hbm [shape: f32[2,8,128], index: 2, kind: output, shape index: {}]  }
   0x1   :  { %9 = vsyncpa [#allocation3 + $0x1], 0 }
   0x2   :  { %10 = vsyncpa [#allocation6], 0 }
   0x3   :  { %12 = vsyncpa [#allocation6 + $0x1], 0 }
   0x4   :  { %13 = vsyncpa [#allocation4], 0 }
   0x5   :  { %15 = vsyncpa [#allocation4 + $0x1], 0  ;;  %s3675_s9 = smov 0   ;;  %s3677_s10 = smov 0  }
   0x6   :  { %s3679_s11 = smov 0   ;;  %s3681_s12 = smov 0  }
   0x7 LB: > { %s3696_s13 = sadd.s32 4294967295, %s3652_s12   ;;  %s2921_s14 = sadd.s32 4294967294, %s3652_s12   ;;  %s3652_s12 = sphi %s3681_s12, %s4806_s12   ;;  %s3648_s11 = sphi %s3679_s11, %s4805_s11   ;;  %s3644_s10 = sphi %s3677_s10, %s4804_s10   ;;  %s3640_s9 = sphi %s3675_s9, %s4803_s9  }
   0x8   : > { %s3700_s15 = sadd.s32 1, %s3652_s12   ;;  %s28_s16 = sadd.s32 1, %s3648_s11 }
   0x9   : > { %s25_s17 = ssub.s32 %s3652_s12, %s3700_s15  ;;  %p35_p0 = scmp.ne.s32.totalorder %s3648_s11, %s3644_s10 }
   0xa   : > { %p26_p1 = scmp.eq.s32.totalorder %s25_s17, 0  ;;  %p36_p2 = scmp.eq.s32.totalorder %s3652_s12, 0 }
   0xb   : > { %p41_p3 = scmp.ne.s32.totalorder %s3644_s10, %s3640_s9  ;;  %p42_p4 = scmp.eq.s32.totalorder %s3696_s13, 0 }
   0xc   : > { %s3712_s18 = scalar_select %p26_p1, %s3648_s11, %s28_s16  }
   0xd   : > { %p3714_p5 = por %p36_p2, %p35_p0  ;;  %p3718_p6 = por %p42_p4, %p41_p3 }
   0xe   : > { %p91_p7 = scmp.eq.s32.totalorder %s3696_s13, 1  ;;  %p97_p8 = scmp.eq.s32.totalorder %s2921_s14, 1 }
   0xf   : > { %p4794_p11 = scmp.ge.s32.totalorder %s3652_s12, 2 }
  0x10   : > { %p3723_p9 = por %p91_p7, %p35_p0  ;;  %p3727_p10 = por %p97_p8, %p41_p3 }
  0x11   : > { %113 = sbr.rel (%p4794_p11) target bundleno = 98 (0x62), region = 16 }
  0x12   : > { %s4798_s22 = scalar_select %p3727_p10, 1, 0 }
  0x16   : > { %116 = sbr.rel (!%p3714_p5) target bundleno = 60 (0x3c), region = 20  ;;  %s117_s23 = sand.u32 (%p3714_p5), 1, %s3648_s11  }
  0x17   : > { %s122_s24 = smul.u32 (%p3714_p5), 192, %s3652_s12  ;;  %s3741_s30 = scalar_lea.sflag (%p3714_p5), [#allocation3], %s117_s23 }
  0x18   : > { %s3456_s25 = smul.u32 (%p3714_p5), 1536, %s117_s23 }
  0x19   : > { %s123_s26 = ssub.s32 (%p3714_p5), 353, %s122_s24 }
  0x1a   : > { %p124_p12 = scmp.lt.s32.totalorder (%p3714_p5), %s123_s26, 192  ;;  %s121_s3 = scalar_lea.vmem (%p3714_p5), [#allocation2], %s3456_s25 }
  0x1c   : > { %s4808_s26 = smov (!%p124_p12, %s123_s26), 192 }
  0x1d   : > { %s2924_s27 = sshll.u32 %s4808_s26, 3 }
  0x1e   : > { %s127_s28 = ssub.s32 1536, %s2924_s27 }
  0x1f   : > { %s128_s29 = sshll.u32 %s127_s28, 4 }
  0x20   : > { %129 = vsyncadd %s3741_s30, %s128_s29  ;;  %p3744_p13 = scmp.ne.s32.totalorder %s2924_s27, 0  ;;  %s3454_s5 = smul.u32 1536, %s3652_s12 }
  0x21   : > { %s3749_s6 = sshll.u32 %s121_s3, 4  ;;  %s2928_s7 = sshll.u32 %s4808_s26, 7  ;;  %s137_s6 = int_to_ptr.vmem [resolvable:$true] %s3749_s6 }
  0x22   : > { %s132_s16 = scalar_lea.hbm %s4791_s0, %s3454_s5  ;;  %s3506_s24 = sshrl.u32 %s2928_s7, 4 }
  0x23   : > { %s134_s17 = sshll.u32 %s132_s16, 4  ;;  %s3515_s29 = scalar_lea.hbm %s4791_s0, 2824  ;;  %s3756_s17 = int_to_ptr.hbm [resolvable:$true] %s134_s17 }
  0x24   : > { %s3504_s23 = sshra.s32 %s3756_s17, 4  ;;  %s3505_s23 = int_to_ptr.hbm [resolvable:$true] %s3504_s23 }
  0x25   : > { %s3511_s25 = scalar_lea.hbm %s3505_s23, %s3506_s24  ;;  %p3516_p3 = scmp.lt.s32.totalorder %s3505_s23, %s4791_s0 }
  0x26   : > { %p3512_p0 = scmp.ne.s32.totalorder %s3505_s23, %s3511_s25  ;;  %p3517_p4 = scmp.lt.s32.totalorder %s3515_s29, %s3511_s25 }
  0x28   : > { %p3513_p1 = pnand %p3512_p0, %p3744_p13  ;;  %p3518_p7 = por %p3517_p4, %p3516_p3 }
  0x2a   : > { %p3514_p2 = pneg %p3513_p1 }
  0x2c   : > { %p3519_p8 = pnand %p3518_p7, %p3514_p2 }
  0x2e   : > { %3522 = shalt.err (!%p3519_p8)
}
  0x2f   : > { %s3523_s8 = sshra.s32 %s137_s6, 4  ;;  %s3654_s16 = smov [#allocation2]   ;;  %s3524_s8 = int_to_ptr.vmem [resolvable:$true] %s3523_s8 }
  0x30   : > { %s3530_s14 = scalar_lea.vmem %s3524_s8, %s3506_s24  ;;  %s3534_s27 = scalar_lea.vmem %s3654_s16, 3072 }
  0x31   : > { %p3531_p12 = scmp.ne.s32.totalorder %s3524_s8, %s3530_s14  ;;  %p3536_p11 = scmp.lt.s32.totalorder %s3534_s27, %s3530_s14 }
  0x33   : > { %p3532_p0 = pnand %p3531_p12, %p3744_p13 }
  0x35   : > { %p3533_p1 = pneg %p3532_p0 }
  0x37   : > { %p3538_p10 = pnand %p3536_p11, %p3533_p1 }
  0x39   : > { %3541 = shalt.err (!%p3538_p10)
}
  0x3a   : > { %s3655_s23 = smov 128   ;;  %s3656_s25 = smov 8  }
  0x3b   : > { %142 = dma.hbm_to_vmem [thread:$0]  (%p3744_p13), %s3756_s17, %s2928_s7, %s137_s6, %s3741_s30, %s3655_s23, %s3655_s23, %s3656_s25  }
  0x3c PF: > { %145 = sbr.rel (!%p3714_p5) target bundleno = 98 (0x62), region = 24  ;;  %s146_s24 = sand.u32 (%p3714_p5), 1, %s3648_s11  }
  0x3d   : > { %s151_s28 = smul.u32 (%p3714_p5), 192, %s3652_s12  ;;  %s3788_s14 = scalar_lea.sflag (%p3714_p5), [#allocation6], %s146_s24 }
  0x3e   : > { %s3457_s29 = smul.u32 (%p3714_p5), 1536, %s146_s24 }
  0x3f   : > { %s152_s3 = ssub.s32 (%p3714_p5), 353, %s151_s28 }
  0x40   : > { %p153_p10 = scmp.lt.s32.totalorder (%p3714_p5), %s152_s3, 192  ;;  %s150_s26 = scalar_lea.vmem (%p3714_p5), [#allocation5], %s3457_s29 }
  0x42   : > { %s4810_s3 = smov (!%p153_p10, %s152_s3), 192 }
  0x43   : > { %s2929_s5 = sshll.u32 %s4810_s3, 3 }
  0x44   : > { %s156_s8 = ssub.s32 1536, %s2929_s5 }
  0x45   : > { %s157_s4 = sshll.u32 %s156_s8, 4 }
  0x46   : > { %158 = vsyncadd %s3788_s14, %s157_s4  ;;  %p3791_p5 = scmp.ne.s32.totalorder %s2929_s5, 0  ;;  %s3455_s30 = smul.u32 1536, %s3652_s12 }
  0x47   : > { %s3796_s6 = sshll.u32 %s150_s26, 4  ;;  %s2933_s7 = sshll.u32 %s4810_s3, 7  ;;  %s166_s6 = int_to_ptr.vmem [resolvable:$true] %s3796_s6 }
  0x48   : > { %s161_s27 = scalar_lea.hbm %s4792_s1, %s3455_s30  ;;  %s3545_s24 = sshrl.u32 %s2933_s7, 4 }
  0x49   : > { %s163_s23 = sshll.u32 %s161_s27, 4  ;;  %s3554_s8 = scalar_lea.hbm %s4792_s1, 2824  ;;  %s3803_s23 = int_to_ptr.hbm [resolvable:$true] %s163_s23 }
  0x4a   : > { %s3543_s25 = sshra.s32 %s3803_s23, 4  ;;  %s3544_s25 = int_to_ptr.hbm [resolvable:$true] %s3543_s25 }
  0x4b   : > { %s3550_s28 = scalar_lea.hbm %s3544_s25, %s3545_s24  ;;  %p3555_p3 = scmp.lt.s32.totalorder %s3544_s25, %s4792_s1 }
  0x4c   : > { %p3551_p11 = scmp.ne.s32.totalorder %s3544_s25, %s3550_s28  ;;  %p3556_p4 = scmp.lt.s32.totalorder %s3554_s8, %s3550_s28 }
  0x4e   : > { %p3552_p13 = pnand %p3551_p11, %p3791_p5  ;;  %p3557_p7 = por %p3556_p4, %p3555_p3 }
  0x50   : > { %p3553_p2 = pneg %p3552_p13 }
  0x52   : > { %p3558_p8 = pnand %p3557_p7, %p3553_p2 }
  0x54   : > { %3561 = shalt.err (!%p3558_p8)
}
  0x55   : > { %s3562_s30 = sshra.s32 %s166_s6, 4  ;;  %s3657_s16 = smov [#allocation5]   ;;  %s3563_s30 = int_to_ptr.vmem [resolvable:$true] %s3562_s30 }
  0x56   : > { %s3569_s17 = scalar_lea.vmem %s3563_s30, %s3545_s24  ;;  %s3573_s27 = scalar_lea.vmem %s3657_s16, 3072 }
  0x57   : > { %p3570_p12 = scmp.ne.s32.totalorder %s3563_s30, %s3569_s17  ;;  %p3575_p10 = scmp.lt.s32.totalorder %s3573_s27, %s3569_s17 }
  0x59   : > { %p3571_p0 = pnand %p3570_p12, %p3791_p5 }
  0x5b   : > { %p3572_p1 = pneg %p3571_p0 }
  0x5d   : > { %p3577_p11 = pnand %p3575_p10, %p3572_p1 }
  0x5f   : > { %3580 = shalt.err (!%p3577_p11)
}
  0x60   : > { %s3658_s25 = smov 128   ;;  %s3659_s28 = smov 8  }
  0x61   : > { %171 = dma.hbm_to_vmem [thread:$0]  (%p3791_p5), %s3803_s23, %s2933_s7, %s166_s6, %s3788_s14, %s3658_s25, %s3658_s25, %s3659_s28  }
  0x62 PF: > { %p2934_p13 = scmp.ge.s32.totalorder %s3652_s12, 1  ;;  %p173_p2 = scmp.lt.s32.totalorder %s3652_s12, 3 }
  0x64   : > { %p174_p3 = pnand %p2934_p13, %p173_p2 }
  0x65   : > { %s3831_s24 = sand.u32 (!%p174_p3), 1, %s3644_s10  }
  0x66   : > { %177 = sbr.rel (%p174_p3) target bundleno = 465 (0x1d1), region = 28  ;;  %s180_s5 = scalar_lea.sflag (!%p174_p3), [#allocation3], %s3831_s24 }
  0x67   : > { %s3458_s29 = smul.u32 (!%p174_p3), 1536, %s3831_s24 }
  0x69   : > { %s3835_s19 = scalar_lea.vmem (!%p174_p3), [#allocation2], %s3458_s29 }
  0x6b   : > { %3627 = dma.done.wait (%p3718_p6), %s180_s5, 24576  }
  0x6c   : > { %3629 = vsyncadd (%p3718_p6), %s180_s5, 4294942720  ;;  %s190_s3 = scalar_lea.sflag [#allocation6], %s3831_s24  ;;  %s3842_s14 = scalar_lea.vmem [#allocation5], %s3458_s29 }
  0x6d   : > { %3631 = dma.done.wait (%p3718_p6), %s190_s3, 24576  }
  0x6e   : > { %3633 = vsyncadd (%p3718_p6), %s190_s3, 4294942720  ;;  %s2935_s6 = sshll.u32 %s3831_s24, 3  ;;  %p2936_p5 = scmp.ge.s32.totalorder %s3696_s13, 1 }
  0x6f   : > { %s3849_s7 = scalar_lea.vmem [#allocation7], %s2935_s6 }
  0x70   : > { %233 = sbr.rel (%p2936_p5) target bundleno = 296 (0x128), region = 40 }
  0x75   : > { %v234_v0 = vld [vmem:[%s3835_s19] sm:$0xff]  ;;  %v235_v1 = vld [vmem:[%s3835_s19 + $0x8] sm:$0xff]  ;;  %v236_v4 = vld [vmem:[%s3835_s19 + $0x10] sm:$0xff] }
  0x76   : > { %v298_v2 = vld [vmem:[%s3842_s14] sm:$0xff]  ;;  %v299_v3 = vld [vmem:[%s3842_s14 + $0x8] sm:$0xff]  ;;  %v300_v5 = vld [vmem:[%s3842_s14 + $0x10] sm:$0xff] }
  0x77   : > { %v362_v6 = vsub.f32 %v298_v2, %v234_v0  ;;  %v363_v7 = vsub.f32 %v299_v3, %v235_v1  ;;  %v237_v8 = vld [vmem:[%s3835_s19 + $0x18] sm:$0xff]  ;;  %v364_v10 = vsub.f32 %v300_v5, %v236_v4  ;;  %v238_v11 = vld [vmem:[%s3835_s19 + $0x20] sm:$0xff]  ;;  %v239_v16 = vld [vmem:[%s3835_s19 + $0x28] sm:$0xff] }
  0x78   : > { %v301_v9 = vld [vmem:[%s3842_s14 + $0x18] sm:$0xff]  ;;  %v302_v12 = vld [vmem:[%s3842_s14 + $0x20] sm:$0xff]  ;;  %v303_v17 = vld [vmem:[%s3842_s14 + $0x28] sm:$0xff] }
  0x79   : > { %v365_v13 = vsub.f32 %v301_v9, %v237_v8  ;;  %v426_v14 = vmul.f32 %v362_v6, %v362_v6  ;;  %v427_v15 = vmul.f32 %v363_v7, %v363_v7  ;;  %v366_v18 = vsub.f32 %v302_v12, %v238_v11  ;;  %v240_v20 = vld [vmem:[%s3835_s19 + $0x30] sm:$0xff]  ;;  %v241_v25 = vld [vmem:[%s3835_s19 + $0x38] sm:$0xff]  ;;  %v2937_v27 = vld [vmem:[%s3835_s19 + $0x200] sm:$0xff] }
  0x7a   : > { %v428_v19 = vmul.f32 %v364_v10, %v364_v10  ;;  %v304_v21 = vld [vmem:[%s3842_s14 + $0x30] sm:$0xff]  ;;  %v367_v22 = vsub.f32 %v303_v17, %v239_v16  ;;  %v305_v26 = vld [vmem:[%s3842_s14 + $0x38] sm:$0xff]  ;;  %v2938_v31 = vld [vmem:[%s3835_s19 + $0x208] sm:$0xff] }
  0x7b   : > { %v429_v23 = vmul.f32 %v365_v13, %v365_v13  ;;  %v490_v24 = vadd.f32 %v427_v15, %v426_v14  ;;  %v368_v28 = vsub.f32 %v304_v21, %v240_v20  ;;  %v430_v29 = vmul.f32 %v366_v18, %v366_v18  ;;  %v3001_v32 = vld [vmem:[%s3842_s14 + $0x200] sm:$0xff]  ;;  %v3002_v33 = vld [vmem:[%s3842_s14 + $0x208] sm:$0xff]  ;;  %v2939_v39 = vld [vmem:[%s3835_s19 + $0x210] sm:$0xff] }
  0x7c   : > { %v242_v34 = vld [vmem:[%s3835_s19 + $0x40] sm:$0xff]  ;;  %v369_v36 = vsub.f32 %v305_v26, %v241_v25  ;;  %v431_v37 = vmul.f32 %v367_v22, %v367_v22  ;;  %v3003_v40 = vld [vmem:[%s3842_s14 + $0x210] sm:$0xff]  ;;  %v243_v41 = vld [vmem:[%s3835_s19 + $0x48] sm:$0xff]  ;;  %v684_v43 = vsub.f32 %v3001_v32, %v2937_v27  ;;  %v685_v44 = vsub.f32 %v3002_v33, %v2938_v31 }
  0x7d   : > { %v491_v30 = vadd.f32 %v490_v24, %v428_v19  ;;  %v306_v35 = vld [vmem:[%s3842_s14 + $0x40] sm:$0xff]  ;;  %v307_v42 = vld [vmem:[%s3842_s14 + $0x48] sm:$0xff]  ;;  %v432_v46 = vmul.f32 %v368_v28, %v368_v28  ;;  %v2940_v48 = vld [vmem:[%s3835_s19 + $0x218] sm:$0xff]  ;;  %v686_v52 = vsub.f32 %v3003_v40, %v2939_v39 }
  0x7e   : > { %v370_v45 = vsub.f32 %v306_v35, %v242_v34  ;;  %v3004_v49 = vld [vmem:[%s3842_s14 + $0x218] sm:$0xff]  ;;  %v244_v50 = vld [vmem:[%s3835_s19 + $0x50] sm:$0xff]  ;;  %v371_v53 = vsub.f32 %v307_v42, %v243_v41  ;;  %v433_v54 = vmul.f32 %v369_v36, %v369_v36  ;;  %v2941_v56 = vld [vmem:[%s3835_s19 + $0x220] sm:$0xff]  ;;  %v748_v61 = vmul.f32 %v684_v43, %v684_v43 }
  0x7f   : > { %v492_v38 = vadd.f32 %v491_v30, %v429_v23  ;;  %v308_v51 = vld [vmem:[%s3842_s14 + $0x50] sm:$0xff]  ;;  %v3005_v57 = vld [vmem:[%s3842_s14 + $0x220] sm:$0xff]  ;;  %v245_v58 = vld [vmem:[%s3835_s19 + $0x58] sm:$0xff]  ;;  %v687_v60 = vsub.f32 %v3004_v49, %v2940_v48  ;;  %v749_v62 = vmul.f32 %v685_v44, %v685_v44  ;;  %v750_v7 = vmul.f32 %v686_v52, %v686_v52 }
  0x80   : > { %v309_v59 = vld [vmem:[%s3842_s14 + $0x58] sm:$0xff]  ;;  %v372_v63 = vsub.f32 %v308_v51, %v244_v50  ;;  %v434_v0 = vmul.f32 %v370_v45, %v370_v45  ;;  %v2942_v2 = vld [vmem:[%s3835_s19 + $0x228] sm:$0xff]  ;;  %v246_v4 = vld [vmem:[%s3835_s19 + $0x60] sm:$0xff]  ;;  %v688_v6 = vsub.f32 %v3005_v57, %v2941_v56  ;;  %v435_v9 = vmul.f32 %v371_v53, %v371_v53 }
  0x81   : > { %v493_v47 = vadd.f32 %v492_v38, %v430_v29  ;;  %v3006_v3 = vld [vmem:[%s3842_s14 + $0x228] sm:$0xff]  ;;  %v310_v5 = vld [vmem:[%s3842_s14 + $0x60] sm:$0xff]  ;;  %v373_v8 = vsub.f32 %v309_v59, %v245_v58  ;;  %v2943_v11 = vld [vmem:[%s3835_s19 + $0x230] sm:$0xff]  ;;  %v751_v16 = vmul.f32 %v687_v60, %v687_v60  ;;  %v812_v17 = vadd.f32 %v749_v62, %v748_v61 }
  0x82   : > { %v3007_v12 = vld [vmem:[%s3842_s14 + $0x230] sm:$0xff]  ;;  %v247_v13 = vld [vmem:[%s3835_s19 + $0x68] sm:$0xff]  ;;  %v689_v15 = vsub.f32 %v3006_v3, %v2942_v2  ;;  %v374_v18 = vsub.f32 %v310_v5, %v246_v4  ;;  %v436_v19 = vmul.f32 %v372_v63, %v372_v63  ;;  %v2944_v21 = vld [vmem:[%s3835_s19 + $0x238] sm:$0xff]  ;;  %v752_v26 = vmul.f32 %v688_v6, %v688_v6 }
  0x83   : > { %v494_v55 = vadd.f32 %v493_v47, %v431_v37  ;;  %v311_v14 = vld [vmem:[%s3842_s14 + $0x68] sm:$0xff]  ;;  %v3008_v22 = vld [vmem:[%s3842_s14 + $0x238] sm:$0xff]  ;;  %v248_v23 = vld [vmem:[%s3835_s19 + $0x70] sm:$0xff]  ;;  %v690_v25 = vsub.f32 %v3007_v12, %v2943_v11  ;;  %v813_v27 = vadd.f32 %v812_v17, %v750_v7  ;;  %v437_v30 = vmul.f32 %v373_v8, %v373_v8 }
  0x84   : > { %v312_v24 = vld [vmem:[%s3842_s14 + $0x70] sm:$0xff]  ;;  %v249_v28 = vld [vmem:[%s3835_s19 + $0x78] sm:$0xff]  ;;  %v375_v29 = vsub.f32 %v311_v14, %v247_v13  ;;  %v2945_v32 = vld [vmem:[%s3835_s19 + $0x240] sm:$0xff]  ;;  %v691_v37 = vsub.f32 %v3008_v22, %v2944_v21  ;;  %v753_v38 = vmul.f32 %v689_v15, %v689_v15  ;;  %v438_v42 = vmul.f32 %v374_v18, %v374_v18 }
  0x85   : > { %v495_v1 = vadd.f32 %v494_v55, %v432_v46  ;;  %v3009_v33 = vld [vmem:[%s3842_s14 + $0x240] sm:$0xff]  ;;  %v251_v35 = vld [vmem:[%s3835_s19 + $0x88] sm:$0xff]  ;;  %v313_v36 = vld [vmem:[%s3842_s14 + $0x78] sm:$0xff]  ;;  %v814_v39 = vadd.f32 %v813_v27, %v751_v16  ;;  %v376_v41 = vsub.f32 %v312_v24, %v248_v23  ;;  %v754_v51 = vmul.f32 %v690_v25, %v690_v25 }
  0x86   : > { %v250_v34 = vld [vmem:[%s3835_s19 + $0x80] sm:$0xff]  ;;  %v252_v40 = vld [vmem:[%s3835_s19 + $0x90] sm:$0xff]  ;;  %v2946_v44 = vld [vmem:[%s3835_s19 + $0x248] sm:$0xff]  ;;  %v692_v50 = vsub.f32 %v3009_v33, %v2945_v32  ;;  %v377_v55 = vsub.f32 %v313_v36, %v249_v28  ;;  %v439_v56 = vmul.f32 %v375_v29, %v375_v29 }
  0x87   : > { %v496_v10 = vadd.f32 %v495_v1, %v433_v54  ;;  %v3010_v45 = vld [vmem:[%s3842_s14 + $0x248] sm:$0xff]  ;;  %v253_v46 = vld [vmem:[%s3835_s19 + $0x98] sm:$0xff]  ;;  %v254_v47 = vld [vmem:[%s3835_s19 + $0xa0] sm:$0xff]  ;;  %v815_v52 = vadd.f32 %v814_v39, %v752_v26  ;;  %v755_v1 = vmul.f32 %v691_v37, %v691_v37  ;;  %v440_v7 = vmul.f32 %v376_v41, %v376_v41 }
  0x88   : > { %v314_v48 = vld [vmem:[%s3842_s14 + $0x80] sm:$0xff]  ;;  %v315_v49 = vld [vmem:[%s3842_s14 + $0x88] sm:$0xff]  ;;  %v316_v54 = vld [vmem:[%s3842_s14 + $0x90] sm:$0xff]  ;;  %v756_v17 = vmul.f32 %v692_v50, %v692_v50  ;;  %v441_v23 = vmul.f32 %v377_v55, %v377_v55 }
  0x89   : > { %v497_v20 = vadd.f32 %v496_v10, %v434_v0  ;;  %v255_v53 = vld [vmem:[%s3835_s19 + $0xa8] sm:$0xff]  ;;  %v2947_v58 = vld [vmem:[%s3835_s19 + $0x250] sm:$0xff]  ;;  %v257_v61 = vld [vmem:[%s3835_s19 + $0xb8] sm:$0xff]  ;;  %v693_v0 = vsub.f32 %v3010_v45, %v2946_v44  ;;  %v816_v2 = vadd.f32 %v815_v52, %v753_v38  ;;  %v378_v5 = vsub.f32 %v314_v48, %v250_v34 }
  0x8a   : > { %v3011_v59 = vld [vmem:[%s3842_s14 + $0x250] sm:$0xff]  ;;  %v317_v62 = vld [vmem:[%s3842_s14 + $0x98] sm:$0xff]  ;;  %v318_v63 = vld [vmem:[%s3842_s14 + $0xa0] sm:$0xff]  ;;  %v379_v6 = vsub.f32 %v315_v49, %v251_v35  ;;  %v380_v15 = vsub.f32 %v316_v54, %v252_v40 }
  0x8b   : > { %v498_v31 = vadd.f32 %v497_v20, %v435_v9  ;;  %v256_v60 = vld [vmem:[%s3835_s19 + $0xb0] sm:$0xff]  ;;  %v258_v3 = vld [vmem:[%s3835_s19 + $0xc0] sm:$0xff]  ;;  %v319_v4 = vld [vmem:[%s3842_s14 + $0xa8] sm:$0xff]  ;;  %v694_v16 = vsub.f32 %v3011_v59, %v2947_v58  ;;  %v817_v18 = vadd.f32 %v816_v2, %v754_v51  ;;  %v3929_v21 = vsub.f32 %v317_v62, %v253_v46 }
  0x8c   : > { %v2948_v9 = vld [vmem:[%s3835_s19 + $0x258] sm:$0xff]  ;;  %v259_v11 = vld [vmem:[%s3835_s19 + $0xc8] sm:$0xff]  ;;  %v260_v12 = vld [vmem:[%s3835_s19 + $0xd0] sm:$0xff]  ;;  %v3931_v22 = vsub.f32 %v318_v63, %v254_v47  ;;  %v757_v33 = vmul.f32 %v693_v0, %v693_v0  ;;  %v442_v39 = vmul.f32 %v378_v5, %v378_v5  ;;  %v443_v55 = vmul.f32 %v379_v6, %v379_v6 }
  0x8d   : > { %v499_v43 = vadd.f32 %v498_v31, %v436_v19  ;;  %v3012_v10 = vld [vmem:[%s3842_s14 + $0x258] sm:$0xff]  ;;  %v320_v13 = vld [vmem:[%s3842_s14 + $0xb0] sm:$0xff]  ;;  %v322_v20 = vld [vmem:[%s3842_s14 + $0xc0] sm:$0xff]  ;;  %v3939_v31 = vsub.f32 %v319_v4, %v255_v53  ;;  %v818_v34 = vadd.f32 %v817_v18, %v755_v1  ;;  %v758_v49 = vmul.f32 %v694_v16, %v694_v16 }
  0x8e   : > { %v321_v14 = vld [vmem:[%s3842_s14 + $0xb8] sm:$0xff]  ;;  %v2949_v25 = vld [vmem:[%s3835_s19 + $0x260] sm:$0xff]  ;;  %v263_v28 = vld [vmem:[%s3835_s19 + $0xe8] sm:$0xff]  ;;  %v695_v32 = vsub.f32 %v3012_v10, %v2948_v9  ;;  %v3943_v37 = vsub.f32 %v320_v13, %v256_v60  ;;  %v3953_v47 = vsub.f32 %v322_v20, %v258_v3 }
  0x8f   : > { %v500_v57 = vadd.f32 %v499_v43, %v437_v30  ;;  %v261_v19 = vld [vmem:[%s3835_s19 + $0xd8] sm:$0xff]  ;;  %v3013_v26 = vld [vmem:[%s3842_s14 + $0x260] sm:$0xff]  ;;  %v323_v29 = vld [vmem:[%s3842_s14 + $0xc8] sm:$0xff]  ;;  %v3945_v38 = vsub.f32 %v321_v14, %v257_v61  ;;  %v819_v50 = vadd.f32 %v818_v34, %v756_v17 }
  0x90   : > { %v262_v27 = vld [vmem:[%s3835_s19 + $0xe0] sm:$0xff]  ;;  %v324_v30 = vld [vmem:[%s3842_s14 + $0xd0] sm:$0xff]  ;;  %v325_v36 = vld [vmem:[%s3842_s14 + $0xd8] sm:$0xff]  ;;  %v696_v48 = vsub.f32 %v3013_v26, %v2949_v25  ;;  %v3957_v53 = vsub.f32 %v323_v29, %v259_v11  ;;  %v759_v1 = vmul.f32 %v695_v32, %v695_v32  ;;  %v445_v25 = vmul.f32 %v3929_v21, %v3929_v21 }
  0x91   : > { %v501_v8 = vadd.f32 %v500_v57, %v438_v42  ;;  %v264_v35 = vld [vmem:[%s3835_s19 + $0xf0] sm:$0xff]  ;;  %v2950_v41 = vld [vmem:[%s3835_s19 + $0x268] sm:$0xff]  ;;  %v265_v43 = vld [vmem:[%s3835_s19 + $0xf8] sm:$0xff]  ;;  %v3959_v54 = vsub.f32 %v324_v30, %v260_v12  ;;  %v3967_v63 = vsub.f32 %v325_v36, %v261_v19  ;;  %v820_v2 = vadd.f32 %v819_v50, %v757_v33 }
  0x92   : > { %v3014_v42 = vld [vmem:[%s3842_s14 + $0x268] sm:$0xff]  ;;  %v266_v44 = vld [vmem:[%s3835_s19 + $0x100] sm:$0xff]  ;;  %v328_v52 = vld [vmem:[%s3842_s14 + $0xf0] sm:$0xff]  ;;  %v760_v18 = vmul.f32 %v696_v48, %v696_v48 }
  0x93   : > { %v502_v24 = vadd.f32 %v501_v8, %v439_v56  ;;  %v326_v45 = vld [vmem:[%s3842_s14 + $0xe0] sm:$0xff]  ;;  %v327_v46 = vld [vmem:[%s3842_s14 + $0xe8] sm:$0xff]  ;;  %v2951_v57 = vld [vmem:[%s3835_s19 + $0x270] sm:$0xff]  ;;  %v697_v0 = vsub.f32 %v3014_v42, %v2950_v41  ;;  %v3981_v16 = vsub.f32 %v328_v52, %v264_v35  ;;  %v821_v19 = vadd.f32 %v820_v2, %v758_v49 }
  0x94   : > { %v267_v51 = vld [vmem:[%s3835_s19 + $0x108] sm:$0xff]  ;;  %v3015_v58 = vld [vmem:[%s3842_s14 + $0x270] sm:$0xff]  ;;  %v269_v60 = vld [vmem:[%s3835_s19 + $0x118] sm:$0xff]  ;;  %v3971_v5 = vsub.f32 %v326_v45, %v262_v27  ;;  %v3973_v6 = vsub.f32 %v327_v46, %v263_v28  ;;  %v446_v41 = vmul.f32 %v3931_v22, %v3931_v22 }
  0x95   : > { %v503_v40 = vadd.f32 %v502_v24, %v440_v7  ;;  %v268_v59 = vld [vmem:[%s3835_s19 + $0x110] sm:$0xff]  ;;  %v329_v61 = vld [vmem:[%s3842_s14 + $0xf8] sm:$0xff]  ;;  %v330_v62 = vld [vmem:[%s3842_s14 + $0x100] sm:$0xff]  ;;  %v444_v7 = vmul.f32 %v380_v15, %v380_v15  ;;  %v698_v17 = vsub.f32 %v3015_v58, %v2951_v57  ;;  %v761_v35 = vmul.f32 %v697_v0, %v697_v0 }
  0x96   : > { %v270_v3 = vld [vmem:[%s3835_s19 + $0x120] sm:$0xff]  ;;  %v331_v4 = vld [vmem:[%s3842_s14 + $0x108] sm:$0xff]  ;;  %v2952_v9 = vld [vmem:[%s3835_s19 + $0x278] sm:$0xff]  ;;  %v3987_v24 = vsub.f32 %v330_v62, %v266_v44  ;;  %v822_v36 = vadd.f32 %v821_v19, %v759_v1 }
  0x97   : > { %v504_v56 = vadd.f32 %v503_v40, %v441_v23  ;;  %v3016_v10 = vld [vmem:[%s3842_s14 + $0x278] sm:$0xff]  ;;  %v271_v11 = vld [vmem:[%s3835_s19 + $0x128] sm:$0xff]  ;;  %v272_v12 = vld [vmem:[%s3835_s19 + $0x130] sm:$0xff]  ;;  %v3985_v23 = vsub.f32 %v329_v61, %v265_v43  ;;  %v3996_v33 = vsub.f32 %v331_v4, %v267_v51  ;;  %v762_v50 = vmul.f32 %v698_v17, %v698_v17 }
  0x98   : > { %v332_v13 = vld [vmem:[%s3842_s14 + $0x110] sm:$0xff]  ;;  %v333_v14 = vld [vmem:[%s3842_s14 + $0x118] sm:$0xff]  ;;  %v334_v15 = vld [vmem:[%s3842_s14 + $0x120] sm:$0xff]  ;;  %v699_v34 = vsub.f32 %v3016_v10, %v2952_v9  ;;  %v823_v51 = vadd.f32 %v822_v36, %v760_v18  ;;  %v448_v9 = vmul.f32 %v3943_v37, %v3943_v37 }
  0x99   : > { %v505_v8 = vadd.f32 %v504_v56, %v442_v39  ;;  %v273_v20 = vld [vmem:[%s3835_s19 + $0x138] sm:$0xff]  ;;  %v2953_v27 = vld [vmem:[%s3835_s19 + $0x280] sm:$0xff]  ;;  %v335_v29 = vld [vmem:[%s3842_s14 + $0x128] sm:$0xff]  ;;  %v3999_v21 = vsub.f32 %v332_v13, %v268_v59  ;;  %v4001_v40 = vsub.f32 %v333_v14, %v269_v60  ;;  %v4009_v48 = vsub.f32 %v334_v15, %v270_v3 }
  0x9a   : > { %v3017_v28 = vld [vmem:[%s3842_s14 + $0x280] sm:$0xff]  ;;  %v336_v30 = vld [vmem:[%s3842_s14 + $0x130] sm:$0xff]  ;;  %v337_v32 = vld [vmem:[%s3842_s14 + $0x138] sm:$0xff]  ;;  %v4015_v22 = vsub.f32 %v335_v29, %v271_v11  ;;  %v447_v59 = vmul.f32 %v3939_v31, %v3939_v31  ;;  %v763_v3 = vmul.f32 %v699_v34, %v699_v34  ;;  %v824_v4 = vadd.f32 %v823_v51, %v761_v35 }
  0x9b   : > { %v506_v26 = vadd.f32 %v505_v8, %v443_v55  ;;  %v274_v39 = vld [vmem:[%s3835_s19 + $0x140] sm:$0xff]  ;;  %v2954_v43 = vld [vmem:[%s3835_s19 + $0x288] sm:$0xff]  ;;  %v700_v49 = vsub.f32 %v3017_v28, %v2953_v27  ;;  %v4017_v58 = vsub.f32 %v336_v30, %v272_v12  ;;  %v2955_v61 = vld [vmem:[%s3835_s19 + $0x290] sm:$0xff]  ;;  %v4024_v1 = vsub.f32 %v337_v32, %v273_v20 }
  0x9c   : > { %v3018_v44 = vld [vmem:[%s3842_s14 + $0x288] sm:$0xff]  ;;  %v3065_v45 = vld [vmem:[%s3835_s19 + $0x400] sm:$0xff]  ;;  %v3019_v62 = vld [vmem:[%s3842_s14 + $0x290] sm:$0xff]  ;;  %v825_v20 = vadd.f32 %v824_v4, %v762_v50  ;;  %v449_v27 = vmul.f32 %v3945_v38, %v3945_v38  ;;  %v450_v34 = vmul.f32 %v3953_v47, %v3953_v47 }
  0x9d   : > { %v507_v42 = vadd.f32 %v506_v26, %v444_v7  ;;  %v275_v46 = vld [vmem:[%s3835_s19 + $0x148] sm:$0xff]  ;;  %v3129_v55 = vld [vmem:[%s3842_s14 + $0x400] sm:$0xff]  ;;  %v701_v2 = vsub.f32 %v3018_v44, %v2954_v43  ;;  %v3067_v7 = vld [vmem:[%s3835_s19 + $0x410] sm:$0xff]  ;;  %v702_v18 = vsub.f32 %v3019_v62, %v2955_v61  ;;  %v764_v19 = vmul.f32 %v700_v49, %v700_v49 }
  0x9e   : > { %v3066_v52 = vld [vmem:[%s3835_s19 + $0x408] sm:$0xff]  ;;  %v338_v57 = vld [vmem:[%s3842_s14 + $0x140] sm:$0xff]  ;;  %v3131_v8 = vld [vmem:[%s3842_s14 + $0x410] sm:$0xff]  ;;  %v1006_v12 = vsub.f32 %v3129_v55, %v3065_v45 }
  0x9f   : > { %v3130_v56 = vld [vmem:[%s3842_s14 + $0x408] sm:$0xff]  ;;  %v508_v60 = vadd.f32 %v507_v42, %v445_v25  ;;  %v2956_v31 = vld [vmem:[%s3835_s19 + $0x298] sm:$0xff]  ;;  %v276_v14 = vld [vmem:[%s3835_s19 + $0x150] sm:$0xff]  ;;  %v4033_v17 = vsub.f32 %v338_v57, %v274_v39  ;;  %v1008_v32 = vsub.f32 %v3131_v8, %v3067_v7  ;;  %v765_v36 = vmul.f32 %v701_v2, %v701_v2 }
  0xa0   : > { %v339_v0 = vld [vmem:[%s3842_s14 + $0x148] sm:$0xff]  ;;  %v3020_v11 = vld [vmem:[%s3842_s14 + $0x298] sm:$0xff]  ;;  %v1007_v13 = vsub.f32 %v3130_v56, %v3066_v52  ;;  %v340_v37 = vld [vmem:[%s3842_s14 + $0x150] sm:$0xff]  ;;  %v826_v39 = vadd.f32 %v825_v20, %v763_v3  ;;  %v766_v47 = vmul.f32 %v702_v18, %v702_v18  ;;  %v451_v57 = vmul.f32 %v3957_v53, %v3957_v53 }
  0xa1   : > { %v509_v10 = vadd.f32 %v508_v60, %v446_v41  ;;  %v3068_v15 = vld [vmem:[%s3835_s19 + $0x418] sm:$0xff]  ;;  %v4038_v26 = vsub.f32 %v339_v0, %v275_v46  ;;  %v2957_v29 = vld [vmem:[%s3835_s19 + $0x2a0] sm:$0xff]  ;;  %v703_v35 = vsub.f32 %v3020_v11, %v2956_v31  ;;  %v2958_v44 = vld [vmem:[%s3835_s19 + $0x2a8] sm:$0xff]  ;;  %v1070_v46 = vmul.f32 %v1006_v12, %v1006_v12 }
  0xa2   : > { %v3132_v25 = vld [vmem:[%s3842_s14 + $0x418] sm:$0xff]  ;;  %v3021_v30 = vld [vmem:[%s3842_s14 + $0x2a0] sm:$0xff]  ;;  %v3022_v45 = vld [vmem:[%s3842_s14 + $0x2a8] sm:$0xff]  ;;  %v1071_v49 = vmul.f32 %v1007_v13, %v1007_v13  ;;  %v4050_v50 = vsub.f32 %v340_v37, %v276_v14  ;;  %v827_v52 = vadd.f32 %v826_v39, %v764_v19  ;;  %v1072_v0 = vmul.f32 %v1008_v32, %v1008_v32 }
  0xa3   : > { %v510_v28 = vadd.f32 %v509_v10, %v447_v59  ;;  %v3069_v41 = vld [vmem:[%s3835_s19 + $0x420] sm:$0xff]  ;;  %v1009_v38 = vsub.f32 %v3132_v25, %v3068_v15  ;;  %v704_v51 = vsub.f32 %v3021_v30, %v2957_v29  ;;  %v3070_v55 = vld [vmem:[%s3835_s19 + $0x428] sm:$0xff]  ;;  %v2959_v60 = vld [vmem:[%s3835_s19 + $0x2b0] sm:$0xff]  ;;  %v452_v2 = vmul.f32 %v3959_v54, %v3959_v54 }
  0xa4   : > { %v3133_v42 = vld [vmem:[%s3842_s14 + $0x420] sm:$0xff]  ;;  %v3134_v56 = vld [vmem:[%s3842_s14 + $0x428] sm:$0xff]  ;;  %v3023_v61 = vld [vmem:[%s3842_s14 + $0x2b0] sm:$0xff]  ;;  %v705_v3 = vsub.f32 %v3022_v45, %v2958_v44  ;;  %v767_v4 = vmul.f32 %v703_v35, %v703_v35  ;;  %v828_v7 = vadd.f32 %v827_v52, %v765_v36  ;;  %v1134_v13 = vadd.f32 %v1071_v49, %v1070_v46 }
  0xa5   : > { %v511_v43 = vadd.f32 %v510_v28, %v448_v9  ;;  %v1010_v62 = vsub.f32 %v3133_v42, %v3069_v41  ;;  %v3071_v8 = vld [vmem:[%s3835_s19 + $0x430] sm:$0xff]  ;;  %v2960_v31 = vld [vmem:[%s3835_s19 + $0x2b8] sm:$0xff]  ;;  %v1011_v11 = vsub.f32 %v3134_v56, %v3070_v55  ;;  %v1073_v12 = vmul.f32 %v1009_v38, %v1009_v38  ;;  %v2961_v37 = vld [vmem:[%s3835_s19 + $0x2c0] sm:$0xff] }
  0xa6   : > { %v3135_v9 = vld [vmem:[%s3842_s14 + $0x430] sm:$0xff]  ;;  %v3024_v53 = vld [vmem:[%s3842_s14 + $0x2b8] sm:$0xff]  ;;  %v453_v14 = vmul.f32 %v3967_v63, %v3967_v63  ;;  %v706_v54 = vsub.f32 %v3023_v61, %v2959_v60  ;;  %v768_v18 = vmul.f32 %v704_v51, %v704_v51  ;;  %v829_v19 = vadd.f32 %v828_v7, %v766_v47  ;;  %v3073_v36 = vld [vmem:[%s3835_s19 + $0x440] sm:$0xff] }
  0xa7   : > { %v512_v59 = vadd.f32 %v511_v43, %v449_v27  ;;  %v3072_v20 = vld [vmem:[%s3835_s19 + $0x438] sm:$0xff]  ;;  %v3025_v27 = vld [vmem:[%s3842_s14 + $0x2c0] sm:$0xff]  ;;  %v1012_v28 = vsub.f32 %v3135_v9, %v3071_v8  ;;  %v1074_v29 = vmul.f32 %v1010_v62, %v1010_v62  ;;  %v1135_v30 = vadd.f32 %v1134_v13, %v1072_v0  ;;  %v2962_v42 = vld [vmem:[%s3835_s19 + $0x2c8] sm:$0xff] }
  0xa8   : > { %v3136_v15 = vld [vmem:[%s3842_s14 + $0x438] sm:$0xff]  ;;  %v454_v32 = vmul.f32 %v3971_v5, %v3971_v5  ;;  %v707_v63 = vsub.f32 %v3024_v53, %v2960_v31  ;;  %v830_v35 = vadd.f32 %v829_v19, %v767_v4  ;;  %v3137_v39 = vld [vmem:[%s3842_s14 + $0x440] sm:$0xff]  ;;  %v3026_v43 = vld [vmem:[%s3842_s14 + $0x2c8] sm:$0xff]  ;;  %v1075_v45 = vmul.f32 %v1011_v11, %v1011_v11 }
  0xa9   : > { %v513_v10 = vadd.f32 %v512_v59, %v450_v34  ;;  %v769_v34 = vmul.f32 %v705_v3, %v705_v3  ;;  %v1013_v44 = vsub.f32 %v3136_v15, %v3072_v20  ;;  %v1136_v38 = vadd.f32 %v1135_v30, %v1073_v12  ;;  %v3074_v47 = vld [vmem:[%s3835_s19 + $0x448] sm:$0xff]  ;;  %v2963_v56 = vld [vmem:[%s3835_s19 + $0x2d0] sm:$0xff]  ;;  %v2964_v8 = vld [vmem:[%s3835_s19 + $0x2d8] sm:$0xff] }
  0xaa   : > { %v455_v46 = vmul.f32 %v3973_v6, %v3973_v6  ;;  %v708_v5 = vsub.f32 %v3025_v27, %v2961_v37  ;;  %v770_v49 = vmul.f32 %v706_v54, %v706_v54  ;;  %v831_v51 = vadd.f32 %v830_v35, %v768_v18  ;;  %v3138_v52 = vld [vmem:[%s3842_s14 + $0x448] sm:$0xff]  ;;  %v3075_v3 = vld [vmem:[%s3835_s19 + $0x450] sm:$0xff]  ;;  %v3028_v9 = vld [vmem:[%s3842_s14 + $0x2d8] sm:$0xff] }
  0xab   : > { %v514_v25 = vadd.f32 %v513_v10, %v451_v57  ;;  %v3027_v57 = vld [vmem:[%s3842_s14 + $0x2d0] sm:$0xff]  ;;  %v1014_v59 = vsub.f32 %v3137_v39, %v3073_v36  ;;  %v1076_v60 = vmul.f32 %v1012_v28, %v1012_v28  ;;  %v1137_v61 = vadd.f32 %v1136_v38, %v1074_v29  ;;  %v3140_v54 = vld [vmem:[%s3842_s14 + $0x458] sm:$0xff]  ;;  %v2965_v19 = vld [vmem:[%s3835_s19 + $0x2e0] sm:$0xff] }
  0xac   : > { %v456_v62 = vmul.f32 %v3981_v16, %v3981_v16  ;;  %v709_v6 = vsub.f32 %v3026_v43, %v2962_v42  ;;  %v771_v0 = vmul.f32 %v707_v63, %v707_v63  ;;  %v3139_v4 = vld [vmem:[%s3842_s14 + $0x450] sm:$0xff]  ;;  %v1015_v10 = vsub.f32 %v3138_v52, %v3074_v47  ;;  %v3029_v20 = vld [vmem:[%s3842_s14 + $0x2e0] sm:$0xff]  ;;  %v3030_v35 = vld [vmem:[%s3842_s14 + $0x2e8] sm:$0xff] }
  0xad   : > { %v515_v41 = vadd.f32 %v514_v25, %v452_v2  ;;  %v832_v2 = vadd.f32 %v831_v51, %v769_v34  ;;  %v1077_v31 = vmul.f32 %v1013_v44, %v1013_v44  ;;  %v1138_v53 = vadd.f32 %v1137_v61, %v1075_v45  ;;  %v3077_v30 = vld [vmem:[%s3835_s19 + $0x460] sm:$0xff]  ;;  %v2966_v34 = vld [vmem:[%s3835_s19 + $0x2e8] sm:$0xff] }
  0xae   : > { %v457_v11 = vmul.f32 %v3985_v23, %v3985_v23  ;;  %v710_v16 = vsub.f32 %v3027_v57, %v2963_v56  ;;  %v772_v12 = vmul.f32 %v708_v5, %v708_v5  ;;  %v1016_v15 = vsub.f32 %v3139_v4, %v3075_v3  ;;  %v3078_v45 = vld [vmem:[%s3835_s19 + $0x468] sm:$0xff]  ;;  %v2967_v5 = vld [vmem:[%s3835_s19 + $0x2f0] sm:$0xff] }
  0xaf   : > { %v516_v55 = vadd.f32 %v515_v41, %v453_v14  ;;  %v833_v13 = vadd.f32 %v832_v2, %v770_v49  ;;  %v3076_v14 = vld [vmem:[%s3835_s19 + $0x458] sm:$0xff]  ;;  %v1078_v25 = vmul.f32 %v1014_v59, %v1014_v59  ;;  %v1139_v37 = vadd.f32 %v1138_v53, %v1076_v60  ;;  %v3142_v38 = vld [vmem:[%s3842_s14 + $0x468] sm:$0xff]  ;;  %v3031_v49 = vld [vmem:[%s3842_s14 + $0x2f0] sm:$0xff] }
  0xb0   : > { %v458_v27 = vmul.f32 %v3987_v24, %v3987_v24  ;;  %v711_v23 = vsub.f32 %v3028_v9, %v2964_v8  ;;  %v773_v28 = vmul.f32 %v709_v6, %v709_v6  ;;  %v1017_v36 = vsub.f32 %v3140_v54, %v3076_v14  ;;  %v3079_v59 = vld [vmem:[%s3835_s19 + $0x470] sm:$0xff]  ;;  %v3032_v6 = vld [vmem:[%s3842_s14 + $0x2f8] sm:$0xff]  ;;  %v2969_v53 = vld [vmem:[%s3835_s19 + $0x300] sm:$0xff] }
  0xb1   : > { %v517_v7 = vadd.f32 %v516_v55, %v454_v32  ;;  %v834_v29 = vadd.f32 %v833_v13, %v771_v0  ;;  %v3141_v32 = vld [vmem:[%s3842_s14 + $0x460] sm:$0xff]  ;;  %v1079_v39 = vmul.f32 %v1015_v10, %v1015_v10  ;;  %v1140_v41 = vadd.f32 %v1139_v37, %v1077_v31  ;;  %v3143_v60 = vld [vmem:[%s3842_s14 + $0x470] sm:$0xff]  ;;  %v3080_v9 = vld [vmem:[%s3835_s19 + $0x478] sm:$0xff] }
  0xb2   : > { %v459_v42 = vmul.f32 %v3996_v33, %v3996_v33  ;;  %v712_v24 = vsub.f32 %v3029_v20, %v2965_v19  ;;  %v774_v43 = vmul.f32 %v710_v16, %v710_v16  ;;  %v1018_v51 = vsub.f32 %v3141_v32, %v3077_v30  ;;  %v3144_v10 = vld [vmem:[%s3842_s14 + $0x478] sm:$0xff]  ;;  %v3081_v19 = vld [vmem:[%s3835_s19 + $0x480] sm:$0xff]  ;;  %v3034_v37 = vld [vmem:[%s3842_s14 + $0x308] sm:$0xff] }
  0xb3   : > { %v518_v18 = vadd.f32 %v517_v7, %v455_v46  ;;  %v835_v44 = vadd.f32 %v834_v29, %v772_v12  ;;  %v1080_v47 = vmul.f32 %v1016_v15, %v1016_v15  ;;  %v1141_v52 = vadd.f32 %v1140_v41, %v1078_v25  ;;  %v3145_v20 = vld [vmem:[%s3842_s14 + $0x480] sm:$0xff]  ;;  %v2970_v25 = vld [vmem:[%s3835_s19 + $0x308] sm:$0xff] }
  0xb4   : > { %v460_v55 = vmul.f32 %v3999_v21, %v3999_v21  ;;  %v713_v33 = vsub.f32 %v3030_v35, %v2966_v34  ;;  %v775_v56 = vmul.f32 %v711_v23, %v711_v23  ;;  %v1019_v0 = vsub.f32 %v3142_v38, %v3078_v45  ;;  %v3146_v34 = vld [vmem:[%s3842_s14 + $0x488] sm:$0xff]  ;;  %v3083_v38 = vld [vmem:[%s3835_s19 + $0x490] sm:$0xff] }
  0xb5   : > { %v519_v63 = vadd.f32 %v518_v18, %v456_v62  ;;  %v836_v57 = vadd.f32 %v835_v44, %v773_v28  ;;  %v2968_v62 = vld [vmem:[%s3835_s19 + $0x2f8] sm:$0xff]  ;;  %v1081_v2 = vmul.f32 %v1017_v36, %v1017_v36  ;;  %v1142_v3 = vadd.f32 %v1141_v52, %v1079_v39  ;;  %v2971_v36 = vld [vmem:[%s3835_s19 + $0x310] sm:$0xff] }
  0xb6   : > { %v461_v4 = vmul.f32 %v4001_v40, %v4001_v40  ;;  %v714_v21 = vsub.f32 %v3031_v49, %v2967_v5  ;;  %v776_v7 = vmul.f32 %v712_v24, %v712_v24  ;;  %v1020_v16 = vsub.f32 %v3143_v60, %v3079_v59  ;;  %v3035_v39 = vld [vmem:[%s3842_s14 + $0x310] sm:$0xff]  ;;  %v2972_v49 = vld [vmem:[%s3835_s19 + $0x318] sm:$0xff] }
  0xb7   : > { %v520_v46 = vadd.f32 %v519_v63, %v457_v11  ;;  %v837_v8 = vadd.f32 %v836_v57, %v774_v43  ;;  %v3033_v11 = vld [vmem:[%s3842_s14 + $0x300] sm:$0xff]  ;;  %v1082_v12 = vmul.f32 %v1018_v51, %v1018_v51  ;;  %v1143_v13 = vadd.f32 %v1142_v3, %v1080_v47  ;;  %v3082_v63 = vld [vmem:[%s3835_s19 + $0x488] sm:$0xff]  ;;  %v3036_v51 = vld [vmem:[%s3842_s14 + $0x318] sm:$0xff] }
  0xb8   : > { %v462_v14 = vmul.f32 %v4009_v48, %v4009_v48  ;;  %v715_v40 = vsub.f32 %v3032_v6, %v2968_v62  ;;  %v777_v54 = vmul.f32 %v713_v33, %v713_v33  ;;  %v1083_v23 = vmul.f32 %v1019_v0, %v1019_v0  ;;  %v3084_v59 = vld [vmem:[%s3835_s19 + $0x498] sm:$0xff]  ;;  %v2973_v62 = vld [vmem:[%s3835_s19 + $0x320] sm:$0xff] }
  0xb9   : > { %v521_v61 = vadd.f32 %v520_v46, %v458_v27  ;;  %v838_v18 = vadd.f32 %v837_v8, %v775_v56  ;;  %v1021_v27 = vsub.f32 %v3144_v10, %v3080_v9  ;;  %v1144_v28 = vadd.f32 %v1143_v13, %v1081_v2  ;;  %v3147_v46 = vld [vmem:[%s3842_s14 + $0x490] sm:$0xff]  ;;  %v3148_v60 = vld [vmem:[%s3842_s14 + $0x498] sm:$0xff]  ;;  %v3037_v6 = vld [vmem:[%s3842_s14 + $0x320] sm:$0xff] }
  0xba   : > { %v463_v29 = vmul.f32 %v4015_v22, %v4015_v22  ;;  %v716_v48 = vsub.f32 %v3033_v11, %v2969_v53  ;;  %v778_v30 = vmul.f32 %v714_v21, %v714_v21  ;;  %v1022_v41 = vsub.f32 %v3145_v20, %v3081_v19  ;;  %v3085_v9 = vld [vmem:[%s3835_s19 + $0x4a0] sm:$0xff]  ;;  %v2974_v11 = vld [vmem:[%s3835_s19 + $0x328] sm:$0xff] }
  0xbb   : > { %v522_v31 = vadd.f32 %v521_v61, %v459_v42  ;;  %v839_v32 = vadd.f32 %v838_v18, %v776_v7  ;;  %v1084_v42 = vmul.f32 %v1020_v16, %v1020_v16  ;;  %v1145_v24 = vadd.f32 %v1144_v28, %v1082_v12  ;;  %v3149_v10 = vld [vmem:[%s3842_s14 + $0x4a0] sm:$0xff]  ;;  %v3038_v16 = vld [vmem:[%s3842_s14 + $0x328] sm:$0xff] }
  0xbc   : > { %v464_v43 = vmul.f32 %v4017_v58, %v4017_v58  ;;  %v717_v22 = vsub.f32 %v3034_v37, %v2970_v25  ;;  %v779_v44 = vmul.f32 %v715_v40, %v715_v40  ;;  %v1023_v47 = vsub.f32 %v3146_v34, %v3082_v63  ;;  %v3086_v19 = vld [vmem:[%s3835_s19 + $0x4a8] sm:$0xff]  ;;  %v2975_v25 = vld [vmem:[%s3835_s19 + $0x330] sm:$0xff] }
  0xbd   : > { %v523_v15 = vadd.f32 %v522_v31, %v460_v55  ;;  %v840_v45 = vadd.f32 %v839_v32, %v777_v54  ;;  %v1085_v52 = vmul.f32 %v1021_v27, %v1021_v27  ;;  %v1146_v55 = vadd.f32 %v1145_v24, %v1083_v23  ;;  %v341_v31 = vld [vmem:[%s3842_s14 + $0x158] sm:$0xff]  ;;  %v3150_v20 = vld [vmem:[%s3842_s14 + $0x4a8] sm:$0xff]  ;;  %v3039_v37 = vld [vmem:[%s3842_s14 + $0x330] sm:$0xff] }
  0xbe   : > { %v465_v33 = vmul.f32 %v4024_v1, %v4024_v1  ;;  %v718_v58 = vsub.f32 %v3035_v39, %v2971_v36  ;;  %v780_v56 = vmul.f32 %v716_v48, %v716_v48  ;;  %v1024_v0 = vsub.f32 %v3147_v46, %v3083_v38  ;;  %v3087_v63 = vld [vmem:[%s3835_s19 + $0x4b0] sm:$0xff]  ;;  %v2976_v39 = vld [vmem:[%s3835_s19 + $0x338] sm:$0xff] }
  0xbf   : > { %v524_v35 = vadd.f32 %v523_v15, %v461_v4  ;;  %v841_v57 = vadd.f32 %v840_v45, %v778_v30  ;;  %v1086_v2 = vmul.f32 %v1022_v41, %v1022_v41  ;;  %v1147_v3 = vadd.f32 %v1146_v55, %v1084_v42  ;;  %v277_v4 = vld [vmem:[%s3835_s19 + $0x158] sm:$0xff]  ;;  %v3151_v34 = vld [vmem:[%s3842_s14 + $0x4b0] sm:$0xff] }
  0xc0   : > { %v466_v1 = vmul.f32 %v4033_v17, %v4033_v17  ;;  %v719_v21 = vsub.f32 %v3036_v51, %v2972_v49  ;;  %v781_v7 = vmul.f32 %v717_v22, %v717_v22  ;;  %v1025_v12 = vsub.f32 %v3148_v60, %v3084_v59  ;;  %v3040_v41 = vld [vmem:[%s3842_s14 + $0x338] sm:$0xff]  ;;  %v2977_v51 = vld [vmem:[%s3835_s19 + $0x340] sm:$0xff]  ;;  %v343_v60 = vld [vmem:[%s3842_s14 + $0x168] sm:$0xff] }
  0xc1   : > { %v525_v5 = vadd.f32 %v524_v35, %v462_v14  ;;  %v842_v8 = vadd.f32 %v841_v57, %v779_v44  ;;  %v1087_v13 = vmul.f32 %v1023_v47, %v1023_v47  ;;  %v1148_v14 = vadd.f32 %v1147_v3, %v1085_v52  ;;  %v342_v35 = vld [vmem:[%s3842_s14 + $0x160] sm:$0xff]  ;;  %v3088_v46 = vld [vmem:[%s3835_s19 + $0x4b8] sm:$0xff] }
  0xc2   : > { %v467_v17 = vmul.f32 %v4038_v26, %v4038_v26  ;;  %v720_v40 = vsub.f32 %v3037_v6, %v2973_v62  ;;  %v782_v54 = vmul.f32 %v718_v58, %v718_v58  ;;  %v1026_v27 = vsub.f32 %v3149_v10, %v3085_v9  ;;  %v3041_v47 = vld [vmem:[%s3842_s14 + $0x340] sm:$0xff]  ;;  %v279_v58 = vld [vmem:[%s3835_s19 + $0x168] sm:$0xff]  ;;  %v280_v10 = vld [vmem:[%s3835_s19 + $0x170] sm:$0xff] }
  0xc3   : > { %v526_v61 = vadd.f32 %v525_v5, %v463_v29  ;;  %v843_v18 = vadd.f32 %v842_v8, %v780_v56  ;;  %v1088_v23 = vmul.f32 %v1024_v0, %v1024_v0  ;;  %v1149_v28 = vadd.f32 %v1148_v14, %v1086_v2  ;;  %v278_v29 = vld [vmem:[%s3835_s19 + $0x160] sm:$0xff]  ;;  %v3152_v5 = vld [vmem:[%s3842_s14 + $0x4b8] sm:$0xff]  ;;  %v2978_v62 = vld [vmem:[%s3835_s19 + $0x348] sm:$0xff] }
  0xc4   : > { %v405_v48 = vsub.f32 %v341_v31, %v277_v4  ;;  %v721_v30 = vsub.f32 %v3038_v16, %v2974_v11  ;;  %v783_v26 = vmul.f32 %v719_v21, %v719_v21  ;;  %v1027_v42 = vsub.f32 %v3150_v20, %v3086_v19  ;;  %v3042_v6 = vld [vmem:[%s3842_s14 + $0x348] sm:$0xff]  ;;  %v3089_v8 = vld [vmem:[%s3835_s19 + $0x4c0] sm:$0xff]  ;;  %v2979_v31 = vld [vmem:[%s3835_s19 + $0x350] sm:$0xff] }
  0xc5   : > { %v527_v53 = vadd.f32 %v526_v61, %v464_v43  ;;  %v844_v32 = vadd.f32 %v843_v18, %v781_v7  ;;  %v1089_v24 = vmul.f32 %v1025_v12, %v1025_v12  ;;  %v1150_v43 = vadd.f32 %v1149_v28, %v1087_v13  ;;  %v3153_v9 = vld [vmem:[%s3842_s14 + $0x4c0] sm:$0xff]  ;;  %v344_v12 = vld [vmem:[%s3842_s14 + $0x170] sm:$0xff]  ;;  %v2980_v20 = vld [vmem:[%s3835_s19 + $0x358] sm:$0xff] }
  0xc6   : > { %v468_v22 = vmul.f32 %v4050_v50, %v4050_v50  ;;  %v722_v44 = vsub.f32 %v3039_v37, %v2975_v25  ;;  %v784_v45 = vmul.f32 %v720_v40, %v720_v40  ;;  %v1028_v52 = vsub.f32 %v3151_v34, %v3087_v63  ;;  %v3091_v18 = vld [vmem:[%s3835_s19 + $0x4d0] sm:$0xff]  ;;  %v3154_v25 = vld [vmem:[%s3842_s14 + $0x4c8] sm:$0xff]  ;;  %v281_v34 = vld [vmem:[%s3835_s19 + $0x178] sm:$0xff] }
  0xc7   : > { %v528_v15 = vadd.f32 %v527_v53, %v465_v33  ;;  %v845_v38 = vadd.f32 %v844_v32, %v782_v54  ;;  %v1090_v55 = vmul.f32 %v1026_v27, %v1026_v27  ;;  %v1151_v33 = vadd.f32 %v1150_v43, %v1088_v23  ;;  %v3043_v53 = vld [vmem:[%s3842_s14 + $0x350] sm:$0xff]  ;;  %v3090_v54 = vld [vmem:[%s3835_s19 + $0x4c8] sm:$0xff]  ;;  %v3092_v43 = vld [vmem:[%s3835_s19 + $0x4d8] sm:$0xff] }
  0xc8   : > { %v406_v56 = vsub.f32 %v342_v35, %v278_v29  ;;  %v723_v57 = vsub.f32 %v3040_v41, %v2976_v39  ;;  %v785_v50 = vmul.f32 %v721_v30, %v721_v30  ;;  %v469_v61 = vmul.f32 %v405_v48, %v405_v48  ;;  %v2981_v29 = vld [vmem:[%s3835_s19 + $0x360] sm:$0xff]  ;;  %v3155_v63 = vld [vmem:[%s3842_s14 + $0x4d0] sm:$0xff]  ;;  %v345_v39 = vld [vmem:[%s3842_s14 + $0x178] sm:$0xff] }
  0xc9   : > { %v529_v36 = vadd.f32 %v528_v15, %v466_v1  ;;  %v846_v59 = vadd.f32 %v845_v38, %v783_v26  ;;  %v1029_v0 = vsub.f32 %v3152_v5, %v3088_v46  ;;  %v1091_v2 = vmul.f32 %v1027_v42, %v1027_v42  ;;  %v3044_v15 = vld [vmem:[%s3842_s14 + $0x358] sm:$0xff]  ;;  %v3045_v48 = vld [vmem:[%s3842_s14 + $0x360] sm:$0xff]  ;;  %v2982_v38 = vld [vmem:[%s3835_s19 + $0x368] sm:$0xff] }
  0xca   : > { %v1152_v3 = vadd.f32 %v1151_v33, %v1089_v24  ;;  %v724_v1 = vsub.f32 %v3041_v47, %v2977_v51  ;;  %v786_v21 = vmul.f32 %v722_v44, %v722_v44  ;;  %v1092_v11 = vmul.f32 %v1028_v52, %v1028_v52  ;;  %v3046_v46 = vld [vmem:[%s3842_s14 + $0x368] sm:$0xff]  ;;  %v3047_v33 = vld [vmem:[%s3842_s14 + $0x370] sm:$0xff] }
  0xcb   : > { %v530_v49 = vadd.f32 %v529_v36, %v467_v17  ;;  %v847_v7 = vadd.f32 %v846_v59, %v784_v45  ;;  %v407_v13 = vsub.f32 %v343_v60, %v279_v58  ;;  %v725_v14 = vsub.f32 %v3042_v6, %v2978_v62  ;;  %v282_v59 = vld [vmem:[%s3835_s19 + $0x180] sm:$0xff] }
  0xcc   : > { %v1153_v16 = vadd.f32 %v1152_v3, %v1090_v55  ;;  %v787_v17 = vmul.f32 %v723_v57, %v723_v57  ;;  %v470_v19 = vmul.f32 %v406_v56, %v406_v56  ;;  %v1030_v37 = vsub.f32 %v3153_v9, %v3089_v8  ;;  %v2983_v55 = vld [vmem:[%s3835_s19 + $0x370] sm:$0xff]  ;;  %v3157_v57 = vld [vmem:[%s3842_s14 + $0x4e0] sm:$0xff]  ;;  %v3094_v3 = vld [vmem:[%s3835_s19 + $0x4e8] sm:$0xff] }
  0xcd   : > { %v531_v4 = vadd.f32 %v530_v49, %v468_v22  ;;  %v848_v40 = vadd.f32 %v847_v7, %v785_v50  ;;  %v1093_v27 = vmul.f32 %v1029_v0, %v1029_v0  ;;  %v726_v30 = vsub.f32 %v3043_v53, %v2979_v31  ;;  %v3156_v22 = vld [vmem:[%s3842_s14 + $0x4d8] sm:$0xff]  ;;  %v3093_v49 = vld [vmem:[%s3835_s19 + $0x4e0] sm:$0xff] }
  0xce   : > { %v1154_v23 = vadd.f32 %v1153_v16, %v1091_v2  ;;  %v788_v26 = vmul.f32 %v724_v1, %v724_v1  ;;  %v408_v35 = vsub.f32 %v344_v12, %v280_v10  ;;  %v727_v41 = vsub.f32 %v3044_v15, %v2980_v20  ;;  %v346_v62 = vld [vmem:[%s3842_s14 + $0x180] sm:$0xff]  ;;  %v2984_v7 = vld [vmem:[%s3835_s19 + $0x378] sm:$0xff]  ;;  %v3095_v10 = vld [vmem:[%s3835_s19 + $0x4f0] sm:$0xff] }
  0xcf   : > { %v532_v28 = vadd.f32 %v531_v4, %v469_v61  ;;  %v849_v32 = vadd.f32 %v848_v40, %v786_v21  ;;  %v789_v42 = vmul.f32 %v725_v14, %v725_v14  ;;  %v1031_v44 = vsub.f32 %v3154_v25, %v3090_v54  ;;  %v3158_v4 = vld [vmem:[%s3842_s14 + $0x4e8] sm:$0xff]  ;;  %v3048_v8 = vld [vmem:[%s3842_s14 + $0x378] sm:$0xff]  ;;  %v2985_v16 = vld [vmem:[%s3835_s19 + $0x380] sm:$0xff] }
  0xd0   : > { %v1155_v36 = vadd.f32 %v1154_v23, %v1092_v11  ;;  %v471_v45 = vmul.f32 %v407_v13, %v407_v13  ;;  %v728_v5 = vsub.f32 %v3045_v48, %v2981_v29  ;;  %v1032_v51 = vsub.f32 %v3155_v63, %v3091_v18  ;;  %v3049_v12 = vld [vmem:[%s3842_s14 + $0x380] sm:$0xff]  ;;  %v283_v54 = vld [vmem:[%s3835_s19 + $0x188] sm:$0xff]  ;;  %v3096_v23 = vld [vmem:[%s3835_s19 + $0x4f8] sm:$0xff] }
  0xd1   : > { %v850_v24 = vadd.f32 %v849_v32, %v787_v17  ;;  %v1094_v47 = vmul.f32 %v1030_v37, %v1030_v37  ;;  %v533_v52 = vadd.f32 %v532_v28, %v470_v19  ;;  %v790_v58 = vmul.f32 %v726_v30, %v726_v30  ;;  %v3159_v17 = vld [vmem:[%s3842_s14 + $0x4f0] sm:$0xff]  ;;  %v347_v15 = vld [vmem:[%s3842_s14 + $0x188] sm:$0xff]  ;;  %v3160_v28 = vld [vmem:[%s3842_s14 + $0x4f8] sm:$0xff] }
  0xd2   : > { %v1156_v50 = vadd.f32 %v1155_v36, %v1093_v27  ;;  %v409_v60 = vsub.f32 %v345_v39, %v281_v34  ;;  %v1033_v61 = vsub.f32 %v3156_v22, %v3092_v43  ;;  %v729_v6 = vsub.f32 %v3046_v46, %v2982_v38  ;;  %v3050_v36 = vld [vmem:[%s3842_s14 + $0x388] sm:$0xff] }
  0xd3   : > { %v851_v56 = vadd.f32 %v850_v24, %v788_v26  ;;  %v791_v0 = vmul.f32 %v727_v41, %v727_v41  ;;  %v1095_v1 = vmul.f32 %v1031_v44, %v1031_v44  ;;  %v472_v21 = vmul.f32 %v408_v35, %v408_v35  ;;  %v3097_v26 = vld [vmem:[%s3835_s19 + $0x500] sm:$0xff]  ;;  %v2986_v35 = vld [vmem:[%s3835_s19 + $0x388] sm:$0xff]  ;;  %v284_v44 = vld [vmem:[%s3835_s19 + $0x190] sm:$0xff] }
  0xd4   : > { %v730_v9 = vsub.f32 %v3047_v33, %v2983_v55  ;;  %v1034_v31 = vsub.f32 %v3157_v57, %v3093_v49  ;;  %v1096_v53 = vmul.f32 %v1032_v51, %v1032_v51  ;;  %v534_v11 = vadd.f32 %v533_v52, %v471_v45  ;;  %v348_v45 = vld [vmem:[%s3842_s14 + $0x190] sm:$0xff]  ;;  %v3098_v52 = vld [vmem:[%s3835_s19 + $0x508] sm:$0xff] }
  0xd5   : > { %v852_v2 = vadd.f32 %v851_v56, %v789_v42  ;;  %v792_v13 = vmul.f32 %v728_v5, %v728_v5  ;;  %v1157_v40 = vadd.f32 %v1156_v50, %v1094_v47  ;;  %v410_v18 = vsub.f32 %v346_v62, %v282_v59  ;;  %v3161_v42 = vld [vmem:[%s3842_s14 + $0x500] sm:$0xff]  ;;  %v3099_v55 = vld [vmem:[%s3835_s19 + $0x510] sm:$0xff]  ;;  %v3162_v33 = vld [vmem:[%s3842_s14 + $0x508] sm:$0xff] }
  0xd6   : > { %v1035_v19 = vsub.f32 %v3158_v4, %v3094_v3  ;;  %v1097_v20 = vmul.f32 %v1033_v61, %v1033_v61  ;;  %v731_v25 = vsub.f32 %v3048_v8, %v2984_v7  ;;  %v793_v37 = vmul.f32 %v729_v6, %v729_v6  ;;  %v2987_v50 = vld [vmem:[%s3835_s19 + $0x390] sm:$0xff]  ;;  %v349_v3 = vld [vmem:[%s3842_s14 + $0x198] sm:$0xff] }
  0xd7   : > { %v853_v14 = vadd.f32 %v852_v2, %v790_v58  ;;  %v1158_v29 = vadd.f32 %v1157_v40, %v1095_v1  ;;  %v473_v48 = vmul.f32 %v409_v60, %v409_v60  ;;  %v732_v30 = vsub.f32 %v3049_v12, %v2985_v16  ;;  %v3051_v59 = vld [vmem:[%s3842_s14 + $0x390] sm:$0xff]  ;;  %v285_v2 = vld [vmem:[%s3835_s19 + $0x198] sm:$0xff] }
  0xd8   : > { %v1036_v32 = vsub.f32 %v3159_v17, %v3095_v10  ;;  %v1098_v63 = vmul.f32 %v1034_v31, %v1034_v31  ;;  %v535_v34 = vadd.f32 %v534_v11, %v472_v21  ;;  %v794_v39 = vmul.f32 %v730_v9, %v730_v9  ;;  %v3163_v62 = vld [vmem:[%s3842_s14 + $0x510] sm:$0xff]  ;;  %v3100_v10 = vld [vmem:[%s3835_s19 + $0x518] sm:$0xff]  ;;  %v3101_v31 = vld [vmem:[%s3835_s19 + $0x520] sm:$0xff] }
  0xd9   : > { %v854_v27 = vadd.f32 %v853_v14, %v791_v0  ;;  %v1159_v24 = vadd.f32 %v1158_v29, %v1096_v53  ;;  %v411_v43 = vsub.f32 %v347_v15, %v283_v54  ;;  %v1037_v22 = vsub.f32 %v3160_v28, %v3096_v23  ;;  %v3164_v53 = vld [vmem:[%s3842_s14 + $0x518] sm:$0xff]  ;;  %v3165_v54 = vld [vmem:[%s3842_s14 + $0x520] sm:$0xff]  ;;  %v3102_v29 = vld [vmem:[%s3835_s19 + $0x528] sm:$0xff] }
  0xda   : > { %v795_v38 = vmul.f32 %v731_v25, %v731_v25  ;;  %v1099_v5 = vmul.f32 %v1035_v19, %v1035_v19  ;;  %v474_v51 = vmul.f32 %v410_v18, %v410_v18  ;;  %v733_v47 = vsub.f32 %v3050_v36, %v2986_v35  ;;  %v3052_v14 = vld [vmem:[%s3842_s14 + $0x398] sm:$0xff]  ;;  %v286_v19 = vld [vmem:[%s3835_s19 + $0x1a0] sm:$0xff] }
  0xdb   : > { %v855_v41 = vadd.f32 %v854_v27, %v792_v13  ;;  %v1160_v49 = vadd.f32 %v1159_v24, %v1097_v20  ;;  %v1038_v58 = vsub.f32 %v3161_v42, %v3097_v26  ;;  %v1100_v56 = vmul.f32 %v1036_v32, %v1036_v32  ;;  %v2988_v13 = vld [vmem:[%s3835_s19 + $0x398] sm:$0xff]  ;;  %v350_v20 = vld [vmem:[%s3842_s14 + $0x1a0] sm:$0xff]  ;;  %v287_v24 = vld [vmem:[%s3835_s19 + $0x1a8] sm:$0xff] }
  0xdc   : > { %v536_v57 = vadd.f32 %v535_v34, %v473_v48  ;;  %v796_v60 = vmul.f32 %v732_v30, %v732_v30  ;;  %v412_v0 = vsub.f32 %v348_v45, %v284_v44  ;;  %v1039_v1 = vsub.f32 %v3162_v33, %v3098_v52  ;;  %v3103_v48 = vld [vmem:[%s3835_s19 + $0x530] sm:$0xff]  ;;  %v3166_v30 = vld [vmem:[%s3842_s14 + $0x528] sm:$0xff]  ;;  %v2989_v34 = vld [vmem:[%s3835_s19 + $0x3a0] sm:$0xff] }
  0xdd   : > { %v856_v46 = vadd.f32 %v855_v41, %v793_v37  ;;  %v1161_v6 = vadd.f32 %v1160_v49, %v1098_v63  ;;  %v1101_v21 = vmul.f32 %v1037_v22, %v1037_v22  ;;  %v475_v8 = vmul.f32 %v411_v43, %v411_v43  ;;  %v3053_v35 = vld [vmem:[%s3842_s14 + $0x3a0] sm:$0xff]  ;;  %v3167_v41 = vld [vmem:[%s3842_s14 + $0x530] sm:$0xff]  ;;  %v351_v43 = vld [vmem:[%s3842_s14 + $0x1a8] sm:$0xff] }
  0xde   : > { %v734_v9 = vsub.f32 %v3051_v59, %v2987_v50  ;;  %v1040_v11 = vsub.f32 %v3163_v62, %v3099_v55  ;;  %v1102_v16 = vmul.f32 %v1038_v58, %v1038_v58  ;;  %v537_v12 = vadd.f32 %v536_v57, %v474_v51  ;;  %v3104_v49 = vld [vmem:[%s3835_s19 + $0x538] sm:$0xff]  ;;  %v3105_v51 = vld [vmem:[%s3835_s19 + $0x540] sm:$0xff]  ;;  %v2990_v58 = vld [vmem:[%s3835_s19 + $0x3a8] sm:$0xff] }
  0xdf   : > { %v857_v61 = vadd.f32 %v856_v46, %v794_v39  ;;  %v1162_v7 = vadd.f32 %v1161_v6, %v1099_v5  ;;  %v797_v17 = vmul.f32 %v733_v47, %v733_v47  ;;  %v413_v15 = vsub.f32 %v349_v3, %v285_v2  ;;  %v3168_v47 = vld [vmem:[%s3842_s14 + $0x538] sm:$0xff]  ;;  %v3169_v59 = vld [vmem:[%s3842_s14 + $0x540] sm:$0xff]  ;;  %v352_v62 = vld [vmem:[%s3842_s14 + $0x1b0] sm:$0xff] }
  0xe0   : > { %v1041_v25 = vsub.f32 %v3164_v53, %v3100_v10  ;;  %v1103_v37 = vmul.f32 %v1039_v1, %v1039_v1  ;;  %v476_v23 = vmul.f32 %v412_v0, %v412_v0  ;;  %v735_v28 = vsub.f32 %v3052_v14, %v2988_v13  ;;  %v2991_v53 = vld [vmem:[%s3835_s19 + $0x3b0] sm:$0xff] }
  0xe1   : > { %v858_v4 = vadd.f32 %v857_v61, %v795_v38  ;;  %v1163_v18 = vadd.f32 %v1162_v7, %v1100_v56  ;;  %v1042_v26 = vsub.f32 %v3165_v54, %v3101_v31  ;;  %v1104_v32 = vmul.f32 %v1040_v11, %v1040_v11  ;;  %v3054_v56 = vld [vmem:[%s3842_s14 + $0x3a8] sm:$0xff]  ;;  %v288_v61 = vld [vmem:[%s3835_s19 + $0x1b0] sm:$0xff] }
  0xe2   : > { %v538_v63 = vadd.f32 %v537_v12, %v475_v8  ;;  %v798_v36 = vmul.f32 %v734_v9, %v734_v9  ;;  %v414_v22 = vsub.f32 %v350_v20, %v286_v19  ;;  %v1043_v44 = vsub.f32 %v3166_v30, %v3102_v29  ;;  %v3107_v7 = vld [vmem:[%s3835_s19 + $0x550] sm:$0xff]  ;;  %v3170_v8 = vld [vmem:[%s3842_s14 + $0x548] sm:$0xff]  ;;  %v2992_v30 = vld [vmem:[%s3835_s19 + $0x3b8] sm:$0xff] }
  0xe3   : > { %v859_v40 = vadd.f32 %v858_v4, %v796_v60  ;;  %v1164_v27 = vadd.f32 %v1163_v18, %v1101_v21  ;;  %v1105_v45 = vmul.f32 %v1041_v25, %v1041_v25  ;;  %v477_v46 = vmul.f32 %v413_v15, %v413_v15  ;;  %v3106_v21 = vld [vmem:[%s3835_s19 + $0x548] sm:$0xff]  ;;  %v3055_v11 = vld [vmem:[%s3842_s14 + $0x3b0] sm:$0xff] }
  0xe4   : > { %v736_v5 = vsub.f32 %v3053_v35, %v2989_v34  ;;  %v1044_v52 = vsub.f32 %v3167_v41, %v3103_v48  ;;  %v1106_v55 = vmul.f32 %v1042_v26, %v1042_v26  ;;  %v539_v33 = vadd.f32 %v538_v63, %v476_v23  ;;  %v3171_v13 = vld [vmem:[%s3842_s14 + $0x550] sm:$0xff]  ;;  %v3172_v23 = vld [vmem:[%s3842_s14 + $0x558] sm:$0xff]  ;;  %v3173_v34 = vld [vmem:[%s3842_s14 + $0x560] sm:$0xff] }
  0xe5   : > { %v860_v39 = vadd.f32 %v859_v40, %v797_v17  ;;  %v1165_v42 = vadd.f32 %v1164_v27, %v1102_v16  ;;  %v799_v57 = vmul.f32 %v735_v28, %v735_v28  ;;  %v415_v6 = vsub.f32 %v351_v43, %v287_v24  ;;  %v289_v17 = vld [vmem:[%s3835_s19 + $0x1b8] sm:$0xff]  ;;  %v3109_v27 = vld [vmem:[%s3835_s19 + $0x560] sm:$0xff] }
  0xe6   : > { %v1045_v0 = vsub.f32 %v3168_v47, %v3104_v49  ;;  %v1107_v2 = vmul.f32 %v1043_v44, %v1043_v44  ;;  %v478_v4 = vmul.f32 %v414_v22, %v414_v22  ;;  %v737_v1 = vsub.f32 %v3054_v56, %v2990_v58  ;;  %v353_v40 = vld [vmem:[%s3842_s14 + $0x1b8] sm:$0xff]  ;;  %v2993_v47 = vld [vmem:[%s3835_s19 + $0x3c0] sm:$0xff]  ;;  %v3175_v58 = vld [vmem:[%s3842_s14 + $0x570] sm:$0xff] }
  0xe7   : > { %v1166_v38 = vadd.f32 %v1165_v42, %v1103_v37  ;;  %v861_v50 = vadd.f32 %v860_v39, %v798_v36  ;;  %v1046_v9 = vsub.f32 %v3169_v59, %v3105_v51  ;;  %v1108_v10 = vmul.f32 %v1044_v52, %v1044_v52  ;;  %v3108_v37 = vld [vmem:[%s3835_s19 + $0x558] sm:$0xff]  ;;  %v290_v36 = vld [vmem:[%s3835_s19 + $0x1c0] sm:$0xff] }
  0xe8   : > { %v540_v31 = vadd.f32 %v539_v33, %v477_v46  ;;  %v800_v16 = vmul.f32 %v736_v5, %v736_v5  ;;  %v416_v54 = vsub.f32 %v352_v62, %v288_v61  ;;  %v1047_v18 = vsub.f32 %v3170_v8, %v3106_v21  ;;  %v3056_v26 = vld [vmem:[%s3842_s14 + $0x3b8] sm:$0xff]  ;;  %v354_v39 = vld [vmem:[%s3842_s14 + $0x1c0] sm:$0xff]  ;;  %v3174_v46 = vld [vmem:[%s3842_s14 + $0x568] sm:$0xff] }
  0xe9   : > { %v1167_v60 = vadd.f32 %v1166_v38, %v1104_v32  ;;  %v862_v12 = vadd.f32 %v861_v50, %v799_v57  ;;  %v1109_v19 = vmul.f32 %v1045_v0, %v1045_v0  ;;  %v479_v15 = vmul.f32 %v415_v6, %v415_v6  ;;  %v3111_v38 = vld [vmem:[%s3835_s19 + $0x570] sm:$0xff]  ;;  %v3057_v52 = vld [vmem:[%s3842_s14 + $0x3c0] sm:$0xff]  ;;  %v291_v57 = vld [vmem:[%s3835_s19 + $0x1c8] sm:$0xff] }
  0xea   : > { %v738_v25 = vsub.f32 %v3055_v11, %v2991_v53  ;;  %v1048_v28 = vsub.f32 %v3171_v13, %v3107_v7  ;;  %v1110_v29 = vmul.f32 %v1046_v9, %v1046_v9  ;;  %v541_v48 = vadd.f32 %v540_v31, %v478_v4  ;;  %v355_v50 = vld [vmem:[%s3842_s14 + $0x1c8] sm:$0xff]  ;;  %v3176_v4 = vld [vmem:[%s3842_s14 + $0x578] sm:$0xff]  ;;  %v3177_v53 = vld [vmem:[%s3842_s14 + $0x580] sm:$0xff] }
  0xeb   : > { %v1168_v3 = vadd.f32 %v1167_v60, %v1105_v45  ;;  %v801_v32 = vmul.f32 %v737_v1, %v737_v1  ;;  %v863_v63 = vadd.f32 %v862_v12, %v800_v16  ;;  %v417_v41 = vsub.f32 %v353_v40, %v289_v17  ;;  %v3110_v45 = vld [vmem:[%s3835_s19 + $0x568] sm:$0xff]  ;;  %v292_v16 = vld [vmem:[%s3835_s19 + $0x1d0] sm:$0xff] }
  0xec   : > { %v1049_v42 = vsub.f32 %v3172_v23, %v3108_v37  ;;  %v1111_v24 = vmul.f32 %v1047_v18, %v1047_v18  ;;  %v480_v22 = vmul.f32 %v416_v54, %v416_v54  ;;  %v739_v44 = vsub.f32 %v3056_v26, %v2992_v30  ;;  %v2994_v8 = vld [vmem:[%s3835_s19 + $0x3c8] sm:$0xff]  ;;  %v356_v12 = vld [vmem:[%s3842_s14 + $0x1d0] sm:$0xff] }
  0xed   : > { %v1169_v14 = vadd.f32 %v1168_v3, %v1106_v55  ;;  %v1050_v5 = vsub.f32 %v3173_v34, %v3109_v27  ;;  %v1112_v49 = vmul.f32 %v1048_v28, %v1048_v28  ;;  %v542_v51 = vadd.f32 %v541_v48, %v479_v15  ;;  %v3113_v3 = vld [vmem:[%s3835_s19 + $0x580] sm:$0xff]  ;;  %v3058_v9 = vld [vmem:[%s3842_s14 + $0x3c8] sm:$0xff]  ;;  %v2995_v23 = vld [vmem:[%s3835_s19 + $0x3d0] sm:$0xff] }
  0xee   : > { %v802_v55 = vmul.f32 %v738_v25, %v738_v25  ;;  %v864_v33 = vadd.f32 %v863_v63, %v801_v32  ;;  %v418_v59 = vsub.f32 %v354_v39, %v290_v36  ;;  %v1051_v60 = vsub.f32 %v3174_v46, %v3110_v45  ;;  %v3178_v15 = vld [vmem:[%s3842_s14 + $0x588] sm:$0xff]  ;;  %v3059_v28 = vld [vmem:[%s3842_s14 + $0x3d0] sm:$0xff]  ;;  %v293_v32 = vld [vmem:[%s3835_s19 + $0x1d8] sm:$0xff] }
  0xef   : > { %v1170_v20 = vadd.f32 %v1169_v14, %v1107_v2  ;;  %v1113_v61 = vmul.f32 %v1049_v42, %v1049_v42  ;;  %v481_v6 = vmul.f32 %v417_v41, %v417_v41  ;;  %v740_v0 = vsub.f32 %v3057_v52, %v2993_v47  ;;  %v3112_v2 = vld [vmem:[%s3835_s19 + $0x578] sm:$0xff]  ;;  %v3179_v30 = vld [vmem:[%s3842_s14 + $0x590] sm:$0xff]  ;;  %v3181_v47 = vld [vmem:[%s3842_s14 + $0x5a0] sm:$0xff] }
  0xf0   : > { %v1052_v1 = vsub.f32 %v3175_v58, %v3111_v38  ;;  %v1114_v21 = vmul.f32 %v1050_v5, %v1050_v5  ;;  %v543_v7 = vadd.f32 %v542_v51, %v480_v22  ;;  %v865_v31 = vadd.f32 %v864_v33, %v802_v55  ;;  %v357_v63 = vld [vmem:[%s3842_s14 + $0x1d8] sm:$0xff]  ;;  %v3117_v51 = vld [vmem:[%s3835_s19 + $0x5a0] sm:$0xff] }
  0xf1   : > { %v1171_v35 = vadd.f32 %v1170_v20, %v1108_v10  ;;  %v803_v10 = vmul.f32 %v739_v44, %v739_v44  ;;  %v419_v13 = vsub.f32 %v355_v50, %v291_v57  ;;  %v1053_v14 = vsub.f32 %v3176_v4, %v3112_v2  ;;  %v3115_v20 = vld [vmem:[%s3835_s19 + $0x590] sm:$0xff]  ;;  %v2996_v42 = vld [vmem:[%s3835_s19 + $0x3d8] sm:$0xff]  ;;  %v294_v55 = vld [vmem:[%s3835_s19 + $0x1e0] sm:$0xff] }
  0xf2   : > { %v1115_v17 = vmul.f32 %v1051_v60, %v1051_v60  ;;  %v482_v54 = vmul.f32 %v418_v59, %v418_v59  ;;  %v741_v18 = vsub.f32 %v3058_v9, %v2994_v8  ;;  %v1054_v25 = vsub.f32 %v3177_v53, %v3113_v3  ;;  %v3180_v22 = vld [vmem:[%s3842_s14 + $0x598] sm:$0xff]  ;;  %v358_v33 = vld [vmem:[%s3842_s14 + $0x1e0] sm:$0xff]  ;;  %v3183_v8 = vld [vmem:[%s3842_s14 + $0x5b0] sm:$0xff] }
  0xf3   : > { %v1172_v43 = vadd.f32 %v1171_v35, %v1109_v19  ;;  %v3114_v19 = vld [vmem:[%s3835_s19 + $0x588] sm:$0xff]  ;;  %v1116_v37 = vmul.f32 %v1052_v1, %v1052_v1  ;;  %v544_v27 = vadd.f32 %v543_v7, %v481_v6  ;;  %v866_v48 = vadd.f32 %v865_v31, %v803_v10  ;;  %v3060_v46 = vld [vmem:[%s3842_s14 + $0x3d8] sm:$0xff]  ;;  %v2997_v60 = vld [vmem:[%s3835_s19 + $0x3e0] sm:$0xff] }
  0xf4   : > { %v420_v34 = vsub.f32 %v356_v12, %v292_v16  ;;  %v1055_v35 = vsub.f32 %v3178_v15, %v3114_v19  ;;  %v1117_v36 = vmul.f32 %v1053_v14, %v1053_v14  ;;  %v483_v41 = vmul.f32 %v419_v13, %v419_v13  ;;  %v3182_v6 = vld [vmem:[%s3842_s14 + $0x5a8] sm:$0xff]  ;;  %v3061_v4 = vld [vmem:[%s3842_s14 + $0x3e0] sm:$0xff]  ;;  %v3119_v7 = vld [vmem:[%s3835_s19 + $0x5b0] sm:$0xff] }
  0xf5   : > { %v1173_v56 = vadd.f32 %v1172_v43, %v1110_v29  ;;  %v804_v29 = vmul.f32 %v740_v0, %v740_v0  ;;  %v3116_v43 = vld [vmem:[%s3835_s19 + $0x598] sm:$0xff]  ;;  %v1056_v44 = vsub.f32 %v3179_v30, %v3115_v20  ;;  %v1118_v45 = vmul.f32 %v1054_v25, %v1054_v25  ;;  %v295_v10 = vld [vmem:[%s3835_s19 + $0x1e8] sm:$0xff] }
  0xf6   : > { %v545_v38 = vadd.f32 %v544_v27, %v482_v54  ;;  %v805_v5 = vmul.f32 %v741_v18, %v741_v18  ;;  %v421_v58 = vsub.f32 %v357_v63, %v293_v32  ;;  %v1119_v57 = vmul.f32 %v1055_v35, %v1055_v35  ;;  %v359_v31 = vld [vmem:[%s3842_s14 + $0x1e8] sm:$0xff]  ;;  %v3184_v54 = vld [vmem:[%s3842_s14 + $0x5b8] sm:$0xff]  ;;  %v3121_v27 = vld [vmem:[%s3835_s19 + $0x5c0] sm:$0xff] }
  0xf7   : > { %v1174_v62 = vadd.f32 %v1173_v56, %v1111_v24  ;;  %v742_v24 = vsub.f32 %v3059_v28, %v2995_v23  ;;  %v1057_v56 = vsub.f32 %v3180_v22, %v3116_v43  ;;  %v484_v59 = vmul.f32 %v420_v34, %v420_v34  ;;  %v2998_v14 = vld [vmem:[%s3835_s19 + $0x3e8] sm:$0xff]  ;;  %v3185_v23 = vld [vmem:[%s3842_s14 + $0x5c0] sm:$0xff]  ;;  %v2999_v35 = vld [vmem:[%s3835_s19 + $0x3f0] sm:$0xff] }
  0xf8   : > { %v1058_v0 = vsub.f32 %v3181_v47, %v3117_v51  ;;  %v1120_v2 = vmul.f32 %v1056_v44, %v1056_v44  ;;  %v546_v3 = vadd.f32 %v545_v38, %v483_v41  ;;  %v422_v53 = vsub.f32 %v358_v33, %v294_v55  ;;  %v3062_v15 = vld [vmem:[%s3842_s14 + $0x3e8] sm:$0xff]  ;;  %v3063_v22 = vld [vmem:[%s3842_s14 + $0x3f0] sm:$0xff]  ;;  %v361_v51 = vld [vmem:[%s3842_s14 + $0x1f8] sm:$0xff] }
  0xf9   : > { %v1175_v11 = vadd.f32 %v1174_v62, %v1112_v49  ;;  %v867_v49 = vadd.f32 %v866_v48, %v804_v29  ;;  %v3118_v62 = vld [vmem:[%s3835_s19 + $0x5a8] sm:$0xff]  ;;  %v806_v1 = vmul.f32 %v742_v24, %v742_v24  ;;  %v1121_v16 = vmul.f32 %v1057_v56, %v1057_v56  ;;  %v296_v29 = vld [vmem:[%s3835_s19 + $0x1f0] sm:$0xff]  ;;  %v3000_v56 = vld [vmem:[%s3835_s19 + $0x3f8] sm:$0xff] }
  0xfa   : > { %v485_v13 = vmul.f32 %v421_v58, %v421_v58  ;;  %v1060_v18 = vsub.f32 %v3183_v8, %v3119_v7  ;;  %v1122_v19 = vmul.f32 %v1058_v0, %v1058_v0  ;;  %v547_v20 = vadd.f32 %v546_v3, %v484_v59  ;;  %v360_v48 = vld [vmem:[%s3842_s14 + $0x1f0] sm:$0xff]  ;;  %v3122_v41 = vld [vmem:[%s3835_s19 + $0x5c8] sm:$0xff]  ;;  %v3124_v59 = vld [vmem:[%s3835_s19 + $0x5d8] sm:$0xff] }
  0xfb   : > { %v1176_v40 = vadd.f32 %v1175_v11, %v1113_v61  ;;  %v743_v61 = vsub.f32 %v3060_v46, %v2996_v42  ;;  %v1059_v11 = vsub.f32 %v3182_v6, %v3118_v62  ;;  %v423_v30 = vsub.f32 %v359_v31, %v295_v10  ;;  %v3186_v42 = vld [vmem:[%s3842_s14 + $0x5c8] sm:$0xff]  ;;  %v3187_v38 = vld [vmem:[%s3842_s14 + $0x5d0] sm:$0xff]  ;;  %v3064_v6 = vld [vmem:[%s3842_s14 + $0x3f8] sm:$0xff] }
  0xfc   : > { %v486_v34 = vmul.f32 %v422_v53, %v422_v53  ;;  %v1062_v24 = vsub.f32 %v3185_v23, %v3121_v27  ;;  %v548_v43 = vadd.f32 %v547_v20, %v485_v13  ;;  %v1124_v46 = vmul.f32 %v1060_v18, %v1060_v18  ;;  %v3189_v3 = vld [vmem:[%s3842_s14 + $0x5e0] sm:$0xff]  ;;  %v3128_v27 = vld [vmem:[%s3835_s19 + $0x5f8] sm:$0xff] }
  0xfd   : > { %v1177_v26 = vadd.f32 %v1176_v40, %v1114_v21  ;;  %v868_v21 = vadd.f32 %v867_v49, %v805_v5  ;;  %v3120_v40 = vld [vmem:[%s3835_s19 + $0x5b8] sm:$0xff]  ;;  %v807_v25 = vmul.f32 %v743_v61, %v743_v61  ;;  %v1123_v32 = vmul.f32 %v1059_v11, %v1059_v11  ;;  %v3126_v11 = vld [vmem:[%s3835_s19 + $0x5e8] sm:$0xff] }
  0xfe   : > { %v297_v49 = vld [vmem:[%s3835_s19 + $0x1f8] sm:$0xff]  ;;  %v424_v47 = vsub.f32 %v360_v48, %v296_v29  ;;  %v487_v58 = vmul.f32 %v423_v30, %v423_v30  ;;  %v549_v62 = vadd.f32 %v548_v43, %v486_v34  ;;  %v747_v31 = vsub.f32 %v3064_v6, %v3000_v56 }
  0xff   : > { %v1178_v39 = vadd.f32 %v1177_v26, %v1115_v17  ;;  %v744_v17 = vsub.f32 %v3061_v4, %v2997_v60  ;;  %v1061_v26 = vsub.f32 %v3184_v54, %v3120_v40  ;;  %v3188_v60 = vld [vmem:[%s3842_s14 + $0x5d8] sm:$0xff]  ;;  %v1126_v4 = vmul.f32 %v1062_v24, %v1062_v24  ;;  %v3191_v40 = vld [vmem:[%s3842_s14 + $0x5f0] sm:$0xff] }
 0x100   : > { %v1065_v7 = vsub.f32 %v3188_v60, %v3124_v59  ;;  %v488_v10 = vmul.f32 %v424_v47, %v424_v47  ;;  %v550_v13 = vadd.f32 %v549_v62, %v487_v58  ;;  %v3192_v23 = vld [vmem:[%s3842_s14 + $0x5f8] sm:$0xff] }
 0x101   : > { %v1179_v52 = vadd.f32 %v1178_v39, %v1116_v37  ;;  %v869_v37 = vadd.f32 %v868_v21, %v806_v1  ;;  %v808_v39 = vmul.f32 %v744_v17, %v744_v17  ;;  %v1125_v55 = vmul.f32 %v1061_v26, %v1061_v26  ;;  %v3127_v17 = vld [vmem:[%s3835_s19 + $0x5f0] sm:$0xff] }
 0x102   : > { %v425_v21 = vsub.f32 %v361_v51, %v297_v49  ;;  %v1129_v20 = vmul.f32 %v1065_v7, %v1065_v7  ;;  %v551_v29 = vadd.f32 %v550_v13, %v488_v10 }
 0x103   : > { %v1180_v50 = vadd.f32 %v1179_v52, %v1117_v36  ;;  %v745_v36 = vsub.f32 %v3062_v15, %v2998_v14  ;;  %v870_v44 = vadd.f32 %v869_v37, %v807_v25  ;;  %v1063_v52 = vsub.f32 %v3186_v42, %v3122_v41 }
 0x104   : > { %v489_v25 = vmul.f32 %v425_v21, %v425_v21  ;;  %v811_v37 = vmul.f32 %v747_v31, %v747_v31 }
 0x105   : > { %v1181_v9 = vadd.f32 %v1180_v50, %v1118_v45  ;;  %v3123_v45 = vld [vmem:[%s3835_s19 + $0x5d0] sm:$0xff]  ;;  %v809_v50 = vmul.f32 %v745_v36, %v745_v36  ;;  %v871_v0 = vadd.f32 %v870_v44, %v808_v39  ;;  %v1127_v8 = vmul.f32 %v1063_v52, %v1063_v52 }
 0x106   : > { %v1064_v61 = vsub.f32 %v3187_v38, %v3123_v45 }
 0x107   : > { %v1182_v12 = vadd.f32 %v1181_v9, %v1119_v57  ;;  %v746_v57 = vsub.f32 %v3063_v22, %v2999_v35  ;;  %v872_v14 = vadd.f32 %v871_v0, %v809_v50  ;;  %v552_v35 = vadd.f32 %v551_v29, %v489_v25 }
 0x108   : > { %v1128_v54 = vmul.f32 %v1064_v61, %v1064_v61 }
 0x109   : > { %v1183_v28 = vadd.f32 %v1182_v12, %v1120_v2  ;;  %v3125_v2 = vld [vmem:[%s3835_s19 + $0x5e0] sm:$0xff]  ;;  %v810_v53 = vmul.f32 %v746_v57, %v746_v57 }
 0x10a   : > { %v1066_v12 = vsub.f32 %v3189_v3, %v3125_v2 }
 0x10b   : > { %v1184_v63 = vadd.f32 %v1183_v28, %v1121_v16  ;;  %v3190_v16 = vld [vmem:[%s3842_s14 + $0x5e8] sm:$0xff]  ;;  %v1068_v28 = vsub.f32 %v3191_v40, %v3127_v17  ;;  %v873_v48 = vadd.f32 %v872_v14, %v810_v53 }
 0x10c   : > { %v1130_v30 = vmul.f32 %v1066_v12, %v1066_v12 }
 0x10d   : > { %v1185_v5 = vadd.f32 %v1184_v63, %v1122_v19  ;;  %v1067_v19 = vsub.f32 %v3190_v16, %v3126_v11  ;;  %v874_v36 = vadd.f32 %v873_v48, %v811_v37  ;;  %v1132_v39 = vmul.f32 %v1068_v28, %v1068_v28 }
 0x10f   : > { %v1186_v33 = vadd.f32 %v1185_v5, %v1123_v32  ;;  %v1069_v32 = vsub.f32 %v3192_v23, %v3128_v27  ;;  %v1131_v63 = vmul.f32 %v1067_v19, %v1067_v19  ;;  %v875_v43 = vadd.f32 %v874_v36, %v552_v35 }
 0x111   : > { %v1187_v1 = vadd.f32 %v1186_v33, %v1124_v46  ;;  %v1133_v42 = vmul.f32 %v1069_v32, %v1069_v32 }
 0x113   : > { %v1188_v9 = vadd.f32 %v1187_v1, %v1125_v55 }
 0x115   : > { %v1189_v18 = vadd.f32 %v1188_v9, %v1126_v4 }
 0x117   : > { %v1190_v15 = vadd.f32 %v1189_v18, %v1127_v8 }
 0x119   : > { %v1191_v26 = vadd.f32 %v1190_v15, %v1128_v54 }
 0x11b   : > { %v1192_v34 = vadd.f32 %v1191_v26, %v1129_v20 }
 0x11d   : > { %v1193_v41 = vadd.f32 %v1192_v34, %v1130_v30 }
 0x11f   : > { %v1194_v24 = vadd.f32 %v1193_v41, %v1131_v63 }
 0x121   : > { %v1195_v22 = vadd.f32 %v1194_v24, %v1132_v39 }
 0x123   : > { %v1196_v44 = vadd.f32 %v1195_v22, %v1133_v42 }
 0x125   : > { %v1197_v45 = vadd.f32 %v1196_v44, %v875_v43 }
 0x127   : > { %1198 = vst [vmem:[%s3849_s7] sm:$0xff] %v1197_v45 }
 0x128 PF: > { %p3193_p6 = scmp.ne.s32.totalorder %s3696_s13, 1 }
 0x12a   : > { %1202 = sbr.rel (%p3193_p6) target bundleno = 450 (0x1c2), region = 44 }
 0x12f   : > { %v1203_v38 = vld [vmem:[%s3835_s19] sm:$0xff]  ;;  %v1204_v46 = vld [vmem:[%s3835_s19 + $0x8] sm:$0xff]  ;;  %v1205_v51 = vld [vmem:[%s3835_s19 + $0x10] sm:$0xff] }
 0x130   : > { %v1267_v5 = vld [vmem:[%s3842_s14] sm:$0xff]  ;;  %v1268_v49 = vld [vmem:[%s3842_s14 + $0x8] sm:$0xff]  ;;  %v1269_v47 = vld [vmem:[%s3842_s14 + $0x10] sm:$0xff] }
 0x131   : > { %v1331_v52 = vsub.f32 %v1267_v5, %v1203_v38  ;;  %v1332_v55 = vsub.f32 %v1268_v49, %v1204_v46  ;;  %v1206_v33 = vld [vmem:[%s3835_s19 + $0x18] sm:$0xff]  ;;  %v1333_v56 = vsub.f32 %v1269_v47, %v1205_v51  ;;  %v1207_v57 = vld [vmem:[%s3835_s19 + $0x20] sm:$0xff]  ;;  %v1208_v62 = vld [vmem:[%s3835_s19 + $0x28] sm:$0xff] }
 0x132   : > { %v1270_v58 = vld [vmem:[%s3842_s14 + $0x18] sm:$0xff]  ;;  %v1271_v50 = vld [vmem:[%s3842_s14 + $0x20] sm:$0xff]  ;;  %v1272_v6 = vld [vmem:[%s3842_s14 + $0x28] sm:$0xff] }
 0x133   : > { %v1334_v59 = vsub.f32 %v1270_v58, %v1206_v33  ;;  %v1395_v60 = vmul.f32 %v1331_v52, %v1331_v52  ;;  %v1396_v61 = vmul.f32 %v1332_v55, %v1332_v55  ;;  %v1335_v0 = vsub.f32 %v1271_v50, %v1207_v57  ;;  %v1209_v3 = vld [vmem:[%s3835_s19 + $0x30] sm:$0xff]  ;;  %v1210_v8 = vld [vmem:[%s3835_s19 + $0x38] sm:$0xff]  ;;  %v3194_v10 = vld [vmem:[%s3835_s19 + $0x200] sm:$0xff] }
 0x134   : > { %v1397_v2 = vmul.f32 %v1333_v56, %v1333_v56  ;;  %v1273_v4 = vld [vmem:[%s3842_s14 + $0x30] sm:$0xff]  ;;  %v1336_v1 = vsub.f32 %v1272_v6, %v1208_v62  ;;  %v1274_v9 = vld [vmem:[%s3842_s14 + $0x38] sm:$0xff]  ;;  %v3195_v16 = vld [vmem:[%s3835_s19 + $0x208] sm:$0xff] }
 0x135   : > { %v1398_v21 = vmul.f32 %v1334_v59, %v1334_v59  ;;  %v1717_v7 = vadd.f32 %v1396_v61, %v1395_v60  ;;  %v1337_v31 = vsub.f32 %v1273_v4, %v1209_v3  ;;  %v1399_v53 = vmul.f32 %v1335_v0, %v1335_v0  ;;  %v3258_v12 = vld [vmem:[%s3842_s14 + $0x200] sm:$0xff]  ;;  %v3259_v13 = vld [vmem:[%s3842_s14 + $0x208] sm:$0xff]  ;;  %v3196_v19 = vld [vmem:[%s3835_s19 + $0x210] sm:$0xff] }
 0x136   : > { %v1211_v14 = vld [vmem:[%s3835_s19 + $0x40] sm:$0xff]  ;;  %v1338_v40 = vsub.f32 %v1274_v9, %v1210_v8  ;;  %v1400_v54 = vmul.f32 %v1336_v1, %v1336_v1  ;;  %v3260_v20 = vld [vmem:[%s3842_s14 + $0x210] sm:$0xff]  ;;  %v1212_v15 = vld [vmem:[%s3835_s19 + $0x48] sm:$0xff]  ;;  %v1911_v37 = vsub.f32 %v3258_v12, %v3194_v10  ;;  %v1912_v27 = vsub.f32 %v3259_v13, %v3195_v16 }
 0x137   : > { %v1718_v11 = vadd.f32 %v1717_v7, %v1397_v2  ;;  %v1275_v17 = vld [vmem:[%s3842_s14 + $0x40] sm:$0xff]  ;;  %v1276_v25 = vld [vmem:[%s3842_s14 + $0x48] sm:$0xff]  ;;  %v1401_v28 = vmul.f32 %v1337_v31, %v1337_v31  ;;  %v3197_v48 = vld [vmem:[%s3835_s19 + $0x218] sm:$0xff]  ;;  %v1913_v63 = vsub.f32 %v3260_v20, %v3196_v19 }
 0x138   : > { %v1339_v23 = vsub.f32 %v1275_v17, %v1211_v14  ;;  %v3261_v30 = vld [vmem:[%s3842_s14 + $0x218] sm:$0xff]  ;;  %v1213_v26 = vld [vmem:[%s3835_s19 + $0x50] sm:$0xff]  ;;  %v1340_v34 = vsub.f32 %v1276_v25, %v1212_v15  ;;  %v1402_v35 = vmul.f32 %v1338_v40, %v1338_v40  ;;  %v3198_v39 = vld [vmem:[%s3835_s19 + $0x220] sm:$0xff]  ;;  %v1975_v22 = vmul.f32 %v1911_v37, %v1911_v37 }
 0x139   : > { %v1719_v18 = vadd.f32 %v1718_v11, %v1398_v21  ;;  %v1277_v32 = vld [vmem:[%s3842_s14 + $0x50] sm:$0xff]  ;;  %v3262_v41 = vld [vmem:[%s3842_s14 + $0x220] sm:$0xff]  ;;  %v1214_v42 = vld [vmem:[%s3835_s19 + $0x58] sm:$0xff]  ;;  %v1914_v43 = vsub.f32 %v3261_v30, %v3197_v48  ;;  %v1976_v44 = vmul.f32 %v1912_v27, %v1912_v27  ;;  %v1977_v55 = vmul.f32 %v1913_v63, %v1913_v63 }
 0x13a   : > { %v1278_v24 = vld [vmem:[%s3842_s14 + $0x58] sm:$0xff]  ;;  %v1341_v45 = vsub.f32 %v1277_v32, %v1213_v26  ;;  %v1403_v38 = vmul.f32 %v1339_v23, %v1339_v23  ;;  %v3199_v5 = vld [vmem:[%s3835_s19 + $0x228] sm:$0xff]  ;;  %v1215_v51 = vld [vmem:[%s3835_s19 + $0x60] sm:$0xff]  ;;  %v1915_v52 = vsub.f32 %v3262_v41, %v3198_v39  ;;  %v1404_v58 = vmul.f32 %v1340_v34, %v1340_v34 }
 0x13b   : > { %v1720_v29 = vadd.f32 %v1719_v18, %v1399_v53  ;;  %v3263_v49 = vld [vmem:[%s3842_s14 + $0x228] sm:$0xff]  ;;  %v1279_v47 = vld [vmem:[%s3842_s14 + $0x60] sm:$0xff]  ;;  %v1342_v33 = vsub.f32 %v1278_v24, %v1214_v42  ;;  %v3200_v57 = vld [vmem:[%s3835_s19 + $0x230] sm:$0xff]  ;;  %v1978_v62 = vmul.f32 %v1914_v43, %v1914_v43  ;;  %v2232_v6 = vadd.f32 %v1976_v44, %v1975_v22 }
 0x13c   : > { %v3264_v50 = vld [vmem:[%s3842_s14 + $0x230] sm:$0xff]  ;;  %v1216_v59 = vld [vmem:[%s3835_s19 + $0x68] sm:$0xff]  ;;  %v1916_v61 = vsub.f32 %v3263_v49, %v3199_v5  ;;  %v1343_v0 = vsub.f32 %v1279_v47, %v1215_v51  ;;  %v1405_v2 = vmul.f32 %v1341_v45, %v1341_v45  ;;  %v3201_v4 = vld [vmem:[%s3835_s19 + $0x238] sm:$0xff]  ;;  %v1979_v9 = vmul.f32 %v1915_v52, %v1915_v52 }
 0x13d   : > { %v1721_v36 = vadd.f32 %v1720_v29, %v1400_v54  ;;  %v1280_v60 = vld [vmem:[%s3842_s14 + $0x68] sm:$0xff]  ;;  %v3265_v1 = vld [vmem:[%s3842_s14 + $0x238] sm:$0xff]  ;;  %v1217_v21 = vld [vmem:[%s3835_s19 + $0x70] sm:$0xff]  ;;  %v1917_v8 = vsub.f32 %v3264_v50, %v3200_v57  ;;  %v2233_v10 = vadd.f32 %v2232_v6, %v1977_v55  ;;  %v1406_v53 = vmul.f32 %v1342_v33, %v1342_v33 }
 0x13e   : > { %v1281_v7 = vld [vmem:[%s3842_s14 + $0x70] sm:$0xff]  ;;  %v1344_v31 = vsub.f32 %v1280_v60, %v1216_v59  ;;  %v3202_v16 = vld [vmem:[%s3835_s19 + $0x240] sm:$0xff]  ;;  %v1218_v13 = vld [vmem:[%s3835_s19 + $0x78] sm:$0xff]  ;;  %v1918_v40 = vsub.f32 %v3265_v1, %v3201_v4  ;;  %v1980_v54 = vmul.f32 %v1916_v61, %v1916_v61  ;;  %v1407_v15 = vmul.f32 %v1343_v0, %v1343_v0 }
 0x13f   : > { %v1722_v46 = vadd.f32 %v1721_v36, %v1401_v28  ;;  %v3266_v12 = vld [vmem:[%s3842_s14 + $0x240] sm:$0xff]  ;;  %v1282_v17 = vld [vmem:[%s3842_s14 + $0x78] sm:$0xff]  ;;  %v2234_v18 = vadd.f32 %v2233_v10, %v1978_v62  ;;  %v1220_v19 = vld [vmem:[%s3835_s19 + $0x88] sm:$0xff]  ;;  %v1345_v20 = vsub.f32 %v1281_v7, %v1217_v21  ;;  %v1981_v30 = vmul.f32 %v1917_v8, %v1917_v8 }
 0x140   : > { %v1219_v14 = vld [vmem:[%s3835_s19 + $0x80] sm:$0xff]  ;;  %v3203_v37 = vld [vmem:[%s3835_s19 + $0x248] sm:$0xff]  ;;  %v1221_v23 = vld [vmem:[%s3835_s19 + $0x90] sm:$0xff]  ;;  %v1919_v48 = vsub.f32 %v3266_v12, %v3202_v16  ;;  %v1346_v34 = vsub.f32 %v1282_v17, %v1218_v13  ;;  %v1982_v45 = vmul.f32 %v1918_v40, %v1918_v40 }
 0x141   : > { %v1723_v56 = vadd.f32 %v1722_v46, %v1402_v35  ;;  %v3267_v27 = vld [vmem:[%s3842_s14 + $0x248] sm:$0xff]  ;;  %v1222_v28 = vld [vmem:[%s3835_s19 + $0x98] sm:$0xff]  ;;  %v1283_v29 = vld [vmem:[%s3842_s14 + $0x80] sm:$0xff]  ;;  %v2235_v26 = vadd.f32 %v2234_v18, %v1979_v9  ;;  %v1408_v35 = vmul.f32 %v1344_v31, %v1344_v31  ;;  %v1409_v51 = vmul.f32 %v1345_v20, %v1345_v20 }
 0x142   : > { %v1223_v32 = vld [vmem:[%s3835_s19 + $0xa0] sm:$0xff]  ;;  %v1284_v63 = vld [vmem:[%s3842_s14 + $0x88] sm:$0xff]  ;;  %v3204_v39 = vld [vmem:[%s3835_s19 + $0x250] sm:$0xff]  ;;  %v1920_v44 = vsub.f32 %v3267_v27, %v3203_v37  ;;  %v1347_v49 = vsub.f32 %v1283_v29, %v1219_v14  ;;  %v1983_v60 = vmul.f32 %v1919_v48, %v1919_v48 }
 0x143   : > { %v1724_v3 = vadd.f32 %v1723_v56, %v1403_v38  ;;  %v3268_v41 = vld [vmem:[%s3842_s14 + $0x250] sm:$0xff]  ;;  %v1224_v42 = vld [vmem:[%s3835_s19 + $0xa8] sm:$0xff]  ;;  %v1286_v22 = vld [vmem:[%s3842_s14 + $0x98] sm:$0xff]  ;;  %v2236_v38 = vadd.f32 %v2235_v26, %v1980_v54  ;;  %v1348_v50 = vsub.f32 %v1284_v63, %v1220_v19 }
 0x144   : > { %v1225_v24 = vld [vmem:[%s3835_s19 + $0xb0] sm:$0xff]  ;;  %v1226_v46 = vld [vmem:[%s3835_s19 + $0xb8] sm:$0xff]  ;;  %v1287_v5 = vld [vmem:[%s3842_s14 + $0xa0] sm:$0xff]  ;;  %v1921_v59 = vsub.f32 %v3268_v41, %v3204_v39  ;;  %v1411_v40 = vmul.f32 %v1347_v49, %v1347_v49 }
 0x145   : > { %v1725_v11 = vadd.f32 %v1724_v3, %v1404_v58  ;;  %v1285_v43 = vld [vmem:[%s3842_s14 + $0x90] sm:$0xff]  ;;  %v3205_v52 = vld [vmem:[%s3835_s19 + $0x258] sm:$0xff]  ;;  %v1227_v33 = vld [vmem:[%s3835_s19 + $0xc0] sm:$0xff]  ;;  %v2237_v61 = vadd.f32 %v2236_v38, %v1981_v30  ;;  %v1410_v3 = vmul.f32 %v1346_v34, %v1346_v34  ;;  %v4417_v31 = vsub.f32 %v1287_v5, %v1223_v32 }
 0x146   : > { %v3269_v55 = vld [vmem:[%s3842_s14 + $0x258] sm:$0xff]  ;;  %v1228_v58 = vld [vmem:[%s3835_s19 + $0xc8] sm:$0xff]  ;;  %v1289_v57 = vld [vmem:[%s3842_s14 + $0xb0] sm:$0xff]  ;;  %v1349_v0 = vsub.f32 %v1285_v43, %v1221_v23  ;;  %v1412_v63 = vmul.f32 %v1348_v50, %v1348_v50 }
 0x147   : > { %v1726_v25 = vadd.f32 %v1725_v11, %v1405_v2  ;;  %v1288_v56 = vld [vmem:[%s3842_s14 + $0xa8] sm:$0xff]  ;;  %v1229_v62 = vld [vmem:[%s3835_s19 + $0xd0] sm:$0xff]  ;;  %v1290_v6 = vld [vmem:[%s3842_s14 + $0xb8] sm:$0xff]  ;;  %v4409_v2 = vsub.f32 %v1286_v22, %v1222_v28  ;;  %v1984_v11 = vmul.f32 %v1920_v44, %v1920_v44  ;;  %v2238_v16 = vadd.f32 %v2237_v61, %v1982_v45 }
 0x148   : > { %v3206_v1 = vld [vmem:[%s3835_s19 + $0x260] sm:$0xff]  ;;  %v1230_v7 = vld [vmem:[%s3835_s19 + $0xd8] sm:$0xff]  ;;  %v1292_v10 = vld [vmem:[%s3842_s14 + $0xc8] sm:$0xff]  ;;  %v4421_v14 = vsub.f32 %v1288_v56, %v1224_v42  ;;  %v4423_v17 = vsub.f32 %v1289_v57, %v1225_v24  ;;  %v4431_v27 = vsub.f32 %v1290_v6, %v1226_v46  ;;  %v1985_v28 = vmul.f32 %v1921_v59, %v1921_v59 }
 0x149   : > { %v1727_v36 = vadd.f32 %v1726_v25, %v1406_v53  ;;  %v3270_v21 = vld [vmem:[%s3842_s14 + $0x260] sm:$0xff]  ;;  %v1922_v53 = vsub.f32 %v3269_v55, %v3205_v52  ;;  %v1232_v12 = vld [vmem:[%s3835_s19 + $0xe8] sm:$0xff]  ;;  %v1293_v13 = vld [vmem:[%s3842_s14 + $0xd0] sm:$0xff]  ;;  %v2239_v29 = vadd.f32 %v2238_v16, %v1983_v60  ;;  %v4437_v32 = vsub.f32 %v1292_v10, %v1228_v58 }
 0x14a   : > { %v1231_v8 = vld [vmem:[%s3835_s19 + $0xe0] sm:$0xff]  ;;  %v3207_v18 = vld [vmem:[%s3835_s19 + $0x268] sm:$0xff]  ;;  %v1233_v20 = vld [vmem:[%s3835_s19 + $0xf0] sm:$0xff]  ;;  %v1923_v23 = vsub.f32 %v3270_v21, %v3206_v1  ;;  %v4445_v43 = vsub.f32 %v1293_v13, %v1229_v62 }
 0x14b   : > { %v1728_v47 = vadd.f32 %v1727_v36, %v1407_v15  ;;  %v1291_v9 = vld [vmem:[%s3842_s14 + $0xc0] sm:$0xff]  ;;  %v3271_v19 = vld [vmem:[%s3842_s14 + $0x268] sm:$0xff]  ;;  %v1234_v15 = vld [vmem:[%s3835_s19 + $0xf8] sm:$0xff]  ;;  %v1986_v44 = vmul.f32 %v1922_v53, %v1922_v53  ;;  %v2240_v45 = vadd.f32 %v2239_v29, %v1984_v11 }
 0x14c   : > { %v1294_v25 = vld [vmem:[%s3842_s14 + $0xd8] sm:$0xff]  ;;  %v1295_v37 = vld [vmem:[%s3842_s14 + $0xe0] sm:$0xff]  ;;  %v1296_v30 = vld [vmem:[%s3842_s14 + $0xe8] sm:$0xff]  ;;  %v4435_v26 = vsub.f32 %v1291_v9, %v1227_v33  ;;  %v1924_v22 = vsub.f32 %v3271_v19, %v3207_v18  ;;  %v1987_v60 = vmul.f32 %v1923_v23, %v1923_v23  ;;  %v1415_v19 = vmul.f32 %v4417_v31, %v4417_v31 }
 0x14d   : > { %v1729_v4 = vadd.f32 %v1728_v47, %v1408_v35  ;;  %v1235_v48 = vld [vmem:[%s3835_s19 + $0x100] sm:$0xff]  ;;  %v3208_v35 = vld [vmem:[%s3835_s19 + $0x270] sm:$0xff]  ;;  %v1236_v39 = vld [vmem:[%s3835_s19 + $0x108] sm:$0xff]  ;;  %v4449_v5 = vsub.f32 %v1294_v25, %v1230_v7  ;;  %v4451_v49 = vsub.f32 %v1295_v37, %v1231_v8  ;;  %v4459_v50 = vsub.f32 %v1296_v30, %v1232_v12 }
 0x14e   : > { %v3272_v36 = vld [vmem:[%s3842_s14 + $0x270] sm:$0xff]  ;;  %v1298_v24 = vld [vmem:[%s3842_s14 + $0xf8] sm:$0xff]  ;;  %v1299_v46 = vld [vmem:[%s3842_s14 + $0x100] sm:$0xff]  ;;  %v2241_v61 = vadd.f32 %v2240_v45, %v1985_v28  ;;  %v1988_v12 = vmul.f32 %v1924_v22, %v1924_v22 }
 0x14f   : > { %v1730_v54 = vadd.f32 %v1729_v4, %v1409_v51  ;;  %v1237_v41 = vld [vmem:[%s3835_s19 + $0x110] sm:$0xff]  ;;  %v1238_v38 = vld [vmem:[%s3835_s19 + $0x118] sm:$0xff]  ;;  %v1413_v51 = vmul.f32 %v1349_v0, %v1349_v0  ;;  %v1239_v33 = vld [vmem:[%s3835_s19 + $0x120] sm:$0xff]  ;;  %v1925_v59 = vsub.f32 %v3272_v36, %v3208_v35  ;;  %v1414_v4 = vmul.f32 %v4409_v2, %v4409_v2 }
 0x150   : > { %v1297_v42 = vld [vmem:[%s3842_s14 + $0xf0] sm:$0xff]  ;;  %v3209_v52 = vld [vmem:[%s3835_s19 + $0x278] sm:$0xff]  ;;  %v1240_v58 = vld [vmem:[%s3835_s19 + $0x128] sm:$0xff]  ;;  %v4475_v11 = vsub.f32 %v1299_v46, %v1235_v48  ;;  %v2242_v13 = vadd.f32 %v2241_v61, %v1986_v44  ;;  %v1416_v36 = vmul.f32 %v4421_v14, %v4421_v14  ;;  %v1417_v14 = vmul.f32 %v4423_v17, %v4423_v17 }
 0x151   : > { %v1731_v34 = vadd.f32 %v1730_v54, %v1410_v3  ;;  %v3273_v55 = vld [vmem:[%s3842_s14 + $0x278] sm:$0xff]  ;;  %v1300_v56 = vld [vmem:[%s3842_s14 + $0x108] sm:$0xff]  ;;  %v1301_v57 = vld [vmem:[%s3842_s14 + $0x110] sm:$0xff]  ;;  %v4463_v0 = vsub.f32 %v1297_v42, %v1233_v20  ;;  %v4465_v3 = vsub.f32 %v1298_v24, %v1234_v15  ;;  %v1989_v30 = vmul.f32 %v1925_v59, %v1925_v59 }
 0x152   : > { %v1241_v62 = vld [vmem:[%s3835_s19 + $0x130] sm:$0xff]  ;;  %v1302_v6 = vld [vmem:[%s3842_s14 + $0x118] sm:$0xff]  ;;  %v3210_v21 = vld [vmem:[%s3835_s19 + $0x280] sm:$0xff]  ;;  %v1926_v16 = vsub.f32 %v3273_v55, %v3209_v52  ;;  %v4479_v54 = vsub.f32 %v1300_v56, %v1236_v39  ;;  %v4481_v18 = vsub.f32 %v1301_v57, %v1237_v41  ;;  %v1418_v17 = vmul.f32 %v4431_v27, %v4431_v27 }
 0x153   : > { %v1732_v47 = vadd.f32 %v1731_v34, %v1411_v40  ;;  %v3274_v7 = vld [vmem:[%s3842_s14 + $0x280] sm:$0xff]  ;;  %v1242_v8 = vld [vmem:[%s3835_s19 + $0x138] sm:$0xff]  ;;  %v1304_v53 = vld [vmem:[%s3842_s14 + $0x128] sm:$0xff]  ;;  %v4490_v29 = vsub.f32 %v1302_v6, %v1238_v38 }
 0x154   : > { %v1243_v9 = vld [vmem:[%s3835_s19 + $0x140] sm:$0xff]  ;;  %v1244_v40 = vld [vmem:[%s3835_s19 + $0x148] sm:$0xff]  ;;  %v1305_v2 = vld [vmem:[%s3842_s14 + $0x130] sm:$0xff]  ;;  %v1927_v48 = vsub.f32 %v3274_v7, %v3210_v21  ;;  %v4495_v31 = vsub.f32 %v1304_v53, %v1240_v58  ;;  %v1990_v46 = vmul.f32 %v1926_v16, %v1926_v16 }
 0x155   : > { %v1733_v1 = vadd.f32 %v1732_v47, %v1412_v63  ;;  %v1303_v10 = vld [vmem:[%s3842_s14 + $0x120] sm:$0xff]  ;;  %v3211_v15 = vld [vmem:[%s3835_s19 + $0x288] sm:$0xff]  ;;  %v1245_v37 = vld [vmem:[%s3835_s19 + $0x150] sm:$0xff]  ;;  %v2243_v63 = vadd.f32 %v2242_v13, %v1987_v60  ;;  %v4504_v45 = vsub.f32 %v1305_v2, %v1241_v62  ;;  %v1419_v2 = vmul.f32 %v4435_v26, %v4435_v26 }
 0x156   : > { %v3275_v25 = vld [vmem:[%s3842_s14 + $0x288] sm:$0xff]  ;;  %v1306_v23 = vld [vmem:[%s3842_s14 + $0x138] sm:$0xff]  ;;  %v1307_v28 = vld [vmem:[%s3842_s14 + $0x140] sm:$0xff]  ;;  %v4493_v35 = vsub.f32 %v1303_v10, %v1239_v33  ;;  %v1991_v61 = vmul.f32 %v1927_v48, %v1927_v48 }
 0x157   : > { %v1734_v20 = vadd.f32 %v1733_v1, %v1413_v51  ;;  %v1308_v34 = vld [vmem:[%s3842_s14 + $0x148] sm:$0xff]  ;;  %v3212_v41 = vld [vmem:[%s3835_s19 + $0x290] sm:$0xff]  ;;  %v1246_v24 = vld [vmem:[%s3835_s19 + $0x158] sm:$0xff]  ;;  %v1928_v38 = vsub.f32 %v3275_v25, %v3211_v15  ;;  %v2244_v51 = vadd.f32 %v2243_v63, %v1988_v12  ;;  %v4506_v47 = vsub.f32 %v1306_v23, %v1242_v8 }
 0x158   : > { %v3276_v42 = vld [vmem:[%s3842_s14 + $0x290] sm:$0xff]  ;;  %v1310_v44 = vld [vmem:[%s3842_s14 + $0x158] sm:$0xff]  ;;  %v4508_v52 = vsub.f32 %v1307_v28, %v1243_v9  ;;  %v4514_v56 = vsub.f32 %v1308_v34, %v1244_v40  ;;  %v3214_v57 = vld [vmem:[%s3835_s19 + $0x2a0] sm:$0xff]  ;;  %v1420_v34 = vmul.f32 %v4437_v32, %v4437_v32 }
 0x159   : > { %v1735_v39 = vadd.f32 %v1734_v20, %v1414_v4  ;;  %v1309_v22 = vld [vmem:[%s3842_s14 + $0x150] sm:$0xff]  ;;  %v3213_v33 = vld [vmem:[%s3835_s19 + $0x298] sm:$0xff]  ;;  %v3278_v59 = vld [vmem:[%s3842_s14 + $0x2a0] sm:$0xff]  ;;  %v1929_v60 = vsub.f32 %v3276_v42, %v3212_v41  ;;  %v2245_v62 = vadd.f32 %v2244_v51, %v1989_v30  ;;  %v4520_v4 = vsub.f32 %v1310_v44, %v1246_v24 }
 0x15a   : > { %v3277_v58 = vld [vmem:[%s3842_s14 + $0x298] sm:$0xff]  ;;  %v4518_v6 = vsub.f32 %v1309_v22, %v1245_v37  ;;  %v3322_v21 = vld [vmem:[%s3835_s19 + $0x400] sm:$0xff]  ;;  %v3323_v7 = vld [vmem:[%s3835_s19 + $0x408] sm:$0xff]  ;;  %v1992_v16 = vmul.f32 %v1928_v38, %v1928_v38 }
 0x15b   : > { %v1736_v55 = vadd.f32 %v1735_v39, %v1415_v19  ;;  %v3386_v8 = vld [vmem:[%s3842_s14 + $0x400] sm:$0xff]  ;;  %v3215_v9 = vld [vmem:[%s3835_s19 + $0x2a8] sm:$0xff]  ;;  %v1930_v53 = vsub.f32 %v3277_v58, %v3213_v33  ;;  %v2246_v12 = vadd.f32 %v2245_v62, %v1990_v46  ;;  %v1931_v19 = vsub.f32 %v3278_v59, %v3214_v57  ;;  %v3324_v20 = vld [vmem:[%s3835_s19 + $0x410] sm:$0xff] }
 0x15c   : > { %v3279_v10 = vld [vmem:[%s3842_s14 + $0x2a8] sm:$0xff]  ;;  %v2426_v40 = vsub.f32 %v3386_v8, %v3322_v21  ;;  %v3388_v15 = vld [vmem:[%s3842_s14 + $0x410] sm:$0xff]  ;;  %v1993_v28 = vmul.f32 %v1929_v60, %v1929_v60  ;;  %v3325_v39 = vld [vmem:[%s3835_s19 + $0x418] sm:$0xff]  ;;  %v1422_v21 = vmul.f32 %v4449_v5, %v4449_v5 }
 0x15d   : > { %v1737_v1 = vadd.f32 %v1736_v55, %v1416_v36  ;;  %v3387_v13 = vld [vmem:[%s3842_s14 + $0x408] sm:$0xff]  ;;  %v3216_v37 = vld [vmem:[%s3835_s19 + $0x2b0] sm:$0xff]  ;;  %v2247_v48 = vadd.f32 %v2246_v12, %v1991_v61  ;;  %v2428_v30 = vsub.f32 %v3388_v15, %v3324_v20  ;;  %v1932_v36 = vsub.f32 %v3279_v10, %v3215_v9  ;;  %v3389_v41 = vld [vmem:[%s3842_s14 + $0x418] sm:$0xff] }
 0x15e   : > { %v2427_v25 = vsub.f32 %v3387_v13, %v3323_v7  ;;  %v3280_v23 = vld [vmem:[%s3842_s14 + $0x2b0] sm:$0xff]  ;;  %v2490_v63 = vmul.f32 %v2426_v40, %v2426_v40  ;;  %v3217_v24 = vld [vmem:[%s3835_s19 + $0x2b8] sm:$0xff]  ;;  %v1994_v44 = vmul.f32 %v1930_v53, %v1930_v53  ;;  %v2429_v46 = vsub.f32 %v3389_v41, %v3325_v39  ;;  %v3326_v33 = vld [vmem:[%s3835_s19 + $0x420] sm:$0xff] }
 0x15f   : > { %v1738_v27 = vadd.f32 %v1737_v1, %v1417_v14  ;;  %v3281_v22 = vld [vmem:[%s3842_s14 + $0x2b8] sm:$0xff]  ;;  %v2248_v38 = vadd.f32 %v2247_v48, %v1992_v16  ;;  %v2492_v51 = vmul.f32 %v2428_v30, %v2428_v30  ;;  %v1421_v14 = vmul.f32 %v4445_v43, %v4445_v43  ;;  %v3390_v58 = vld [vmem:[%s3842_s14 + $0x420] sm:$0xff]  ;;  %v3327_v8 = vld [vmem:[%s3835_s19 + $0x428] sm:$0xff] }
 0x160   : > { %v2491_v42 = vmul.f32 %v2427_v25, %v2427_v25  ;;  %v1933_v55 = vsub.f32 %v3280_v23, %v3216_v37  ;;  %v3218_v59 = vld [vmem:[%s3835_s19 + $0x2c0] sm:$0xff]  ;;  %v1995_v61 = vmul.f32 %v1931_v19, %v1931_v19  ;;  %v2493_v1 = vmul.f32 %v2429_v46, %v2429_v46  ;;  %v3391_v9 = vld [vmem:[%s3842_s14 + $0x428] sm:$0xff]  ;;  %v3328_v20 = vld [vmem:[%s3835_s19 + $0x430] sm:$0xff] }
 0x161   : > { %v1739_v26 = vadd.f32 %v1738_v27, %v1418_v17  ;;  %v3282_v60 = vld [vmem:[%s3842_s14 + $0x2c0] sm:$0xff]  ;;  %v2249_v62 = vadd.f32 %v2248_v38, %v1993_v28  ;;  %v2430_v17 = vsub.f32 %v3390_v58, %v3326_v33  ;;  %v1934_v7 = vsub.f32 %v3281_v22, %v3217_v24  ;;  %v3219_v53 = vld [vmem:[%s3835_s19 + $0x2c8] sm:$0xff]  ;;  %v3392_v15 = vld [vmem:[%s3842_s14 + $0x430] sm:$0xff] }
 0x162   : > { %v2747_v57 = vadd.f32 %v2491_v42, %v2490_v63  ;;  %v3283_v16 = vld [vmem:[%s3842_s14 + $0x2c8] sm:$0xff]  ;;  %v1996_v12 = vmul.f32 %v1932_v36, %v1932_v36  ;;  %v2431_v40 = vsub.f32 %v3391_v9, %v3327_v8  ;;  %v1423_v27 = vmul.f32 %v4451_v49, %v4451_v49  ;;  %v3220_v37 = vld [vmem:[%s3835_s19 + $0x2d0] sm:$0xff]  ;;  %v3329_v36 = vld [vmem:[%s3835_s19 + $0x438] sm:$0xff] }
 0x163   : > { %v1740_v32 = vadd.f32 %v1739_v26, %v1419_v2  ;;  %v2250_v13 = vadd.f32 %v2249_v62, %v1994_v44  ;;  %v2494_v2 = vmul.f32 %v2430_v17, %v2430_v17  ;;  %v1935_v19 = vsub.f32 %v3282_v60, %v3218_v59  ;;  %v3284_v23 = vld [vmem:[%s3842_s14 + $0x2d0] sm:$0xff]  ;;  %v3393_v39 = vld [vmem:[%s3842_s14 + $0x438] sm:$0xff]  ;;  %v3222_v58 = vld [vmem:[%s3835_s19 + $0x2e0] sm:$0xff] }
 0x164   : > { %v2748_v10 = vadd.f32 %v2747_v57, %v2492_v51  ;;  %v1997_v28 = vmul.f32 %v1933_v55, %v1933_v55  ;;  %v2432_v30 = vsub.f32 %v3392_v15, %v3328_v20  ;;  %v2495_v63 = vmul.f32 %v2431_v40, %v2431_v40  ;;  %v3221_v42 = vld [vmem:[%s3835_s19 + $0x2d8] sm:$0xff]  ;;  %v3394_v55 = vld [vmem:[%s3842_s14 + $0x440] sm:$0xff]  ;;  %v3223_v8 = vld [vmem:[%s3835_s19 + $0x2e8] sm:$0xff] }
 0x165   : > { %v1741_v43 = vadd.f32 %v1740_v32, %v1420_v34  ;;  %v2251_v48 = vadd.f32 %v2250_v13, %v1995_v61  ;;  %v1424_v34 = vmul.f32 %v4459_v50, %v4459_v50  ;;  %v1936_v26 = vsub.f32 %v3283_v16, %v3219_v53  ;;  %v3285_v24 = vld [vmem:[%s3842_s14 + $0x2d8] sm:$0xff]  ;;  %v3330_v32 = vld [vmem:[%s3835_s19 + $0x440] sm:$0xff]  ;;  %v3287_v9 = vld [vmem:[%s3842_s14 + $0x2e8] sm:$0xff] }
 0x166   : > { %v2749_v25 = vadd.f32 %v2748_v10, %v2493_v1  ;;  %v1998_v22 = vmul.f32 %v1934_v7, %v1934_v7  ;;  %v2433_v38 = vsub.f32 %v3393_v39, %v3329_v36  ;;  %v2496_v46 = vmul.f32 %v2432_v30, %v2432_v30  ;;  %v3286_v57 = vld [vmem:[%s3842_s14 + $0x2e0] sm:$0xff]  ;;  %v3288_v20 = vld [vmem:[%s3842_s14 + $0x2f0] sm:$0xff]  ;;  %v3333_v30 = vld [vmem:[%s3835_s19 + $0x458] sm:$0xff] }
 0x167   : > { %v1742_v5 = vadd.f32 %v1741_v43, %v1421_v14  ;;  %v2252_v44 = vadd.f32 %v2251_v48, %v1996_v12  ;;  %v1425_v51 = vmul.f32 %v4463_v0, %v4463_v0  ;;  %v1937_v14 = vsub.f32 %v3284_v23, %v3220_v37  ;;  %v3395_v43 = vld [vmem:[%s3842_s14 + $0x448] sm:$0xff] }
 0x168   : > { %v2750_v41 = vadd.f32 %v2749_v25, %v2494_v2  ;;  %v1999_v59 = vmul.f32 %v1935_v19, %v1935_v19  ;;  %v2434_v61 = vsub.f32 %v3394_v55, %v3330_v32  ;;  %v2497_v62 = vmul.f32 %v2433_v38, %v2433_v38  ;;  %v3332_v2 = vld [vmem:[%s3835_s19 + $0x450] sm:$0xff]  ;;  %v3398_v38 = vld [vmem:[%s3842_s14 + $0x460] sm:$0xff] }
 0x169   : > { %v1743_v49 = vadd.f32 %v1742_v5, %v1422_v21  ;;  %v2253_v60 = vadd.f32 %v2252_v44, %v1997_v28  ;;  %v1426_v17 = vmul.f32 %v4465_v3, %v4465_v3  ;;  %v1938_v1 = vsub.f32 %v3285_v24, %v3221_v42  ;;  %v3331_v21 = vld [vmem:[%s3835_s19 + $0x448] sm:$0xff]  ;;  %v3224_v19 = vld [vmem:[%s3835_s19 + $0x2f0] sm:$0xff]  ;;  %v3334_v44 = vld [vmem:[%s3835_s19 + $0x460] sm:$0xff] }
 0x16a   : > { %v2751_v33 = vadd.f32 %v2750_v41, %v2495_v63  ;;  %v2000_v10 = vmul.f32 %v1936_v26, %v1936_v26  ;;  %v2435_v16 = vsub.f32 %v3395_v43, %v3331_v21  ;;  %v2498_v12 = vmul.f32 %v2434_v61, %v2434_v61  ;;  %v3397_v63 = vld [vmem:[%s3842_s14 + $0x458] sm:$0xff] }
 0x16b   : > { %v1744_v50 = vadd.f32 %v1743_v49, %v1423_v27  ;;  %v2254_v53 = vadd.f32 %v2253_v60, %v1998_v22  ;;  %v1427_v13 = vmul.f32 %v4475_v11, %v4475_v11  ;;  %v1939_v40 = vsub.f32 %v3286_v57, %v3222_v58  ;;  %v3396_v27 = vld [vmem:[%s3842_s14 + $0x450] sm:$0xff]  ;;  %v3225_v49 = vld [vmem:[%s3835_s19 + $0x2f8] sm:$0xff]  ;;  %v3399_v60 = vld [vmem:[%s3842_s14 + $0x468] sm:$0xff] }
 0x16c   : > { %v2752_v7 = vadd.f32 %v2751_v33, %v2496_v46  ;;  %v2001_v15 = vmul.f32 %v1937_v14, %v1937_v14  ;;  %v2436_v37 = vsub.f32 %v3396_v27, %v3332_v2  ;;  %v2499_v23 = vmul.f32 %v2435_v16, %v2435_v16  ;;  %v3289_v26 = vld [vmem:[%s3842_s14 + $0x2f8] sm:$0xff]  ;;  %v3228_v16 = vld [vmem:[%s3835_s19 + $0x310] sm:$0xff] }
 0x16d   : > { %v1745_v0 = vadd.f32 %v1744_v50, %v1424_v34  ;;  %v2255_v25 = vadd.f32 %v2254_v53, %v1999_v59  ;;  %v1428_v28 = vmul.f32 %v4479_v54, %v4479_v54  ;;  %v1940_v48 = vsub.f32 %v3287_v9, %v3223_v8  ;;  %v3290_v50 = vld [vmem:[%s3842_s14 + $0x300] sm:$0xff]  ;;  %v3335_v59 = vld [vmem:[%s3835_s19 + $0x468] sm:$0xff]  ;;  %v3336_v9 = vld [vmem:[%s3835_s19 + $0x470] sm:$0xff] }
 0x16e   : > { %v2753_v5 = vadd.f32 %v2752_v7, %v2497_v62  ;;  %v2002_v36 = vmul.f32 %v1938_v1, %v1938_v1  ;;  %v2437_v41 = vsub.f32 %v3397_v63, %v3333_v30  ;;  %v2500_v42 = vmul.f32 %v2436_v37, %v2436_v37  ;;  %v3227_v62 = vld [vmem:[%s3835_s19 + $0x308] sm:$0xff]  ;;  %v3293_v37 = vld [vmem:[%s3842_s14 + $0x318] sm:$0xff] }
 0x16f   : > { %v1746_v3 = vadd.f32 %v1745_v0, %v1425_v51  ;;  %v2256_v39 = vadd.f32 %v2255_v25, %v2000_v10  ;;  %v1429_v24 = vmul.f32 %v4481_v18, %v4481_v18  ;;  %v1941_v22 = vsub.f32 %v3288_v20, %v3224_v19  ;;  %v3226_v51 = vld [vmem:[%s3835_s19 + $0x300] sm:$0xff]  ;;  %v3400_v10 = vld [vmem:[%s3842_s14 + $0x470] sm:$0xff]  ;;  %v3337_v19 = vld [vmem:[%s3835_s19 + $0x478] sm:$0xff] }
 0x170   : > { %v2754_v34 = vadd.f32 %v2753_v5, %v2498_v12  ;;  %v2003_v14 = vmul.f32 %v1939_v40, %v1939_v40  ;;  %v2438_v55 = vsub.f32 %v3398_v38, %v3334_v44  ;;  %v2501_v33 = vmul.f32 %v2437_v41, %v2437_v41  ;;  %v3292_v12 = vld [vmem:[%s3842_s14 + $0x310] sm:$0xff]  ;;  %v3401_v20 = vld [vmem:[%s3842_s14 + $0x478] sm:$0xff]  ;;  %v3339_v38 = vld [vmem:[%s3835_s19 + $0x488] sm:$0xff] }
 0x171   : > { %v1747_v11 = vadd.f32 %v1746_v3, %v1426_v17  ;;  %v2257_v32 = vadd.f32 %v2256_v39, %v2001_v15  ;;  %v1430_v58 = vmul.f32 %v4490_v29, %v4490_v29  ;;  %v1942_v57 = vsub.f32 %v3289_v26, %v3225_v49  ;;  %v3291_v17 = vld [vmem:[%s3842_s14 + $0x308] sm:$0xff]  ;;  %v3229_v25 = vld [vmem:[%s3835_s19 + $0x318] sm:$0xff]  ;;  %v3402_v49 = vld [vmem:[%s3842_s14 + $0x480] sm:$0xff] }
 0x172   : > { %v2755_v46 = vadd.f32 %v2754_v34, %v2499_v23  ;;  %v2004_v0 = vmul.f32 %v1940_v48, %v1940_v48  ;;  %v2439_v21 = vsub.f32 %v3399_v60, %v3335_v59  ;;  %v2502_v43 = vmul.f32 %v2438_v55, %v2438_v55  ;;  %v3338_v34 = vld [vmem:[%s3835_s19 + $0x480] sm:$0xff] }
 0x173   : > { %v1748_v54 = vadd.f32 %v1747_v11, %v1427_v13  ;;  %v2258_v1 = vadd.f32 %v2257_v32, %v2002_v36  ;;  %v1431_v7 = vmul.f32 %v4493_v35, %v4493_v35  ;;  %v1943_v8 = vsub.f32 %v3290_v50, %v3226_v51  ;;  %v3230_v36 = vld [vmem:[%s3835_s19 + $0x320] sm:$0xff]  ;;  %v3295_v32 = vld [vmem:[%s3842_s14 + $0x328] sm:$0xff] }
 0x174   : > { %v2756_v61 = vadd.f32 %v2755_v46, %v2500_v42  ;;  %v2005_v13 = vmul.f32 %v1941_v22, %v1941_v22  ;;  %v2440_v40 = vsub.f32 %v3400_v10, %v3336_v9  ;;  %v2503_v2 = vmul.f32 %v2439_v21, %v2439_v21  ;;  %v3294_v39 = vld [vmem:[%s3842_s14 + $0x320] sm:$0xff]  ;;  %v3403_v46 = vld [vmem:[%s3842_s14 + $0x488] sm:$0xff]  ;;  %v3232_v21 = vld [vmem:[%s3835_s19 + $0x330] sm:$0xff] }
 0x175   : > { %v1749_v18 = vadd.f32 %v1748_v54, %v1428_v28  ;;  %v2259_v3 = vadd.f32 %v2258_v1, %v2003_v14  ;;  %v1432_v27 = vmul.f32 %v4495_v31, %v4495_v31  ;;  %v1944_v5 = vsub.f32 %v3291_v17, %v3227_v62  ;;  %v1247_v50 = vld [vmem:[%s3835_s19 + $0x160] sm:$0xff]  ;;  %v3231_v14 = vld [vmem:[%s3835_s19 + $0x328] sm:$0xff]  ;;  %v3404_v62 = vld [vmem:[%s3842_s14 + $0x490] sm:$0xff] }
 0x176   : > { %v2757_v53 = vadd.f32 %v2756_v61, %v2501_v33  ;;  %v2006_v23 = vmul.f32 %v1942_v57, %v1942_v57  ;;  %v2441_v11 = vsub.f32 %v3401_v20, %v3337_v19  ;;  %v2504_v48 = vmul.f32 %v2440_v40, %v2440_v40  ;;  %v1248_v57 = vld [vmem:[%s3835_s19 + $0x168] sm:$0xff]  ;;  %v3340_v61 = vld [vmem:[%s3835_s19 + $0x490] sm:$0xff]  ;;  %v3297_v40 = vld [vmem:[%s3842_s14 + $0x338] sm:$0xff] }
 0x177   : > { %v1750_v29 = vadd.f32 %v1749_v18, %v1429_v24  ;;  %v2260_v28 = vadd.f32 %v2259_v3, %v2004_v0  ;;  %v1433_v30 = vmul.f32 %v4504_v45, %v4504_v45  ;;  %v1945_v63 = vsub.f32 %v3292_v12, %v3228_v16  ;;  %v1311_v0 = vld [vmem:[%s3842_s14 + $0x160] sm:$0xff]  ;;  %v1312_v1 = vld [vmem:[%s3842_s14 + $0x168] sm:$0xff]  ;;  %v3296_v10 = vld [vmem:[%s3842_s14 + $0x330] sm:$0xff] }
 0x178   : > { %v2758_v15 = vadd.f32 %v2757_v53, %v2502_v43  ;;  %v2007_v41 = vmul.f32 %v1943_v8, %v1943_v8  ;;  %v2442_v24 = vsub.f32 %v3402_v49, %v3338_v34  ;;  %v2505_v54 = vmul.f32 %v2441_v11, %v2441_v11  ;;  %v3341_v16 = vld [vmem:[%s3835_s19 + $0x498] sm:$0xff]  ;;  %v1313_v11 = vld [vmem:[%s3842_s14 + $0x170] sm:$0xff] }
 0x179   : > { %v1751_v35 = vadd.f32 %v1750_v29, %v1430_v58  ;;  %v2261_v42 = vadd.f32 %v2260_v28, %v2005_v13  ;;  %v1434_v22 = vmul.f32 %v4506_v47, %v4506_v47  ;;  %v1946_v44 = vsub.f32 %v3293_v37, %v3229_v25  ;;  %v3405_v12 = vld [vmem:[%s3842_s14 + $0x498] sm:$0xff]  ;;  %v3406_v25 = vld [vmem:[%s3842_s14 + $0x4a0] sm:$0xff] }
 0x17a   : > { %v2759_v26 = vadd.f32 %v2758_v15, %v2503_v2  ;;  %v2008_v55 = vmul.f32 %v1944_v5, %v1944_v5  ;;  %v2443_v58 = vsub.f32 %v3403_v46, %v3339_v38  ;;  %v2506_v18 = vmul.f32 %v2442_v24, %v2442_v24  ;;  %v3233_v3 = vld [vmem:[%s3835_s19 + $0x338] sm:$0xff]  ;;  %v3342_v15 = vld [vmem:[%s3835_s19 + $0x4a0] sm:$0xff]  ;;  %v3299_v24 = vld [vmem:[%s3842_s14 + $0x348] sm:$0xff] }
 0x17b   : > { %v1752_v31 = vadd.f32 %v1751_v35, %v1431_v7  ;;  %v2262_v33 = vadd.f32 %v2261_v42, %v2006_v23  ;;  %v1435_v47 = vmul.f32 %v4508_v52, %v4508_v52  ;;  %v1947_v60 = vsub.f32 %v3294_v39, %v3230_v36  ;;  %v1249_v23 = vld [vmem:[%s3835_s19 + $0x170] sm:$0xff]  ;;  %v1250_v28 = vld [vmem:[%s3835_s19 + $0x178] sm:$0xff]  ;;  %v3298_v36 = vld [vmem:[%s3842_s14 + $0x340] sm:$0xff] }
 0x17c   : > { %v2760_v51 = vadd.f32 %v2759_v26, %v2504_v48  ;;  %v2009_v43 = vmul.f32 %v1945_v63, %v1945_v63  ;;  %v2444_v29 = vsub.f32 %v3404_v62, %v3340_v61  ;;  %v2507_v8 = vmul.f32 %v2443_v58, %v2443_v58  ;;  %v1314_v34 = vld [vmem:[%s3842_s14 + $0x178] sm:$0xff]  ;;  %v3234_v26 = vld [vmem:[%s3835_s19 + $0x340] sm:$0xff]  ;;  %v3235_v42 = vld [vmem:[%s3835_s19 + $0x348] sm:$0xff] }
 0x17d   : > { %v1753_v45 = vadd.f32 %v1752_v31, %v1432_v27  ;;  %v2263_v7 = vadd.f32 %v2262_v33, %v2007_v41  ;;  %v1436_v9 = vmul.f32 %v4514_v56, %v4514_v56  ;;  %v1948_v53 = vsub.f32 %v3295_v32, %v3231_v14  ;;  %v1251_v14 = vld [vmem:[%s3835_s19 + $0x180] sm:$0xff]  ;;  %v1252_v32 = vld [vmem:[%s3835_s19 + $0x188] sm:$0xff]  ;;  %v3236_v61 = vld [vmem:[%s3835_s19 + $0x350] sm:$0xff] }
 0x17e   : > { %v2761_v17 = vadd.f32 %v2760_v51, %v2505_v54  ;;  %v2010_v2 = vmul.f32 %v1946_v44, %v1946_v44  ;;  %v2445_v35 = vsub.f32 %v3405_v12, %v3341_v16  ;;  %v2508_v5 = vmul.f32 %v2444_v29, %v2444_v29  ;;  %v3343_v51 = vld [vmem:[%s3835_s19 + $0x4a8] sm:$0xff]  ;;  %v3300_v62 = vld [vmem:[%s3842_s14 + $0x350] sm:$0xff] }
 0x17f   : > { %v1754_v59 = vadd.f32 %v1753_v45, %v1433_v30  ;;  %v2264_v27 = vadd.f32 %v2263_v7, %v2008_v55  ;;  %v1375_v19 = vsub.f32 %v1311_v0, %v1247_v50  ;;  %v1437_v56 = vmul.f32 %v4518_v6, %v4518_v6  ;;  %v3407_v50 = vld [vmem:[%s3842_s14 + $0x4a8] sm:$0xff]  ;;  %v1315_v55 = vld [vmem:[%s3842_s14 + $0x180] sm:$0xff]  ;;  %v3408_v16 = vld [vmem:[%s3842_s14 + $0x4b0] sm:$0xff] }
 0x180   : > { %v2762_v13 = vadd.f32 %v2761_v17, %v2506_v18  ;;  %v1376_v48 = vsub.f32 %v1312_v1, %v1248_v57  ;;  %v1949_v30 = vsub.f32 %v3296_v10, %v3232_v21  ;;  %v2011_v31 = vmul.f32 %v1947_v60, %v1947_v60  ;;  %v3237_v1 = vld [vmem:[%s3835_s19 + $0x358] sm:$0xff]  ;;  %v1253_v12 = vld [vmem:[%s3835_s19 + $0x190] sm:$0xff] }
 0x181   : > { %v1755_v52 = vadd.f32 %v1754_v59, %v1434_v22  ;;  %v2265_v63 = vadd.f32 %v2264_v27, %v2009_v43  ;;  %v1438_v49 = vmul.f32 %v4520_v4, %v4520_v4  ;;  %v1950_v39 = vsub.f32 %v3297_v40, %v3233_v3  ;;  %v3301_v21 = vld [vmem:[%s3842_s14 + $0x358] sm:$0xff]  ;;  %v1317_v3 = vld [vmem:[%s3842_s14 + $0x190] sm:$0xff] }
 0x182   : > { %v2763_v37 = vadd.f32 %v2762_v13, %v2507_v8  ;;  %v2012_v41 = vmul.f32 %v1948_v53, %v1948_v53  ;;  %v2446_v22 = vsub.f32 %v3406_v25, %v3342_v15  ;;  %v2509_v45 = vmul.f32 %v2445_v35, %v2445_v35  ;;  %v3344_v53 = vld [vmem:[%s3835_s19 + $0x4b0] sm:$0xff]  ;;  %v1254_v13 = vld [vmem:[%s3835_s19 + $0x198] sm:$0xff]  ;;  %v3302_v15 = vld [vmem:[%s3842_s14 + $0x360] sm:$0xff] }
 0x183   : > { %v1756_v20 = vadd.f32 %v1755_v52, %v1435_v47  ;;  %v2266_v54 = vadd.f32 %v2265_v63, %v2010_v2  ;;  %v1377_v38 = vsub.f32 %v1313_v11, %v1249_v23  ;;  %v1439_v4 = vmul.f32 %v1375_v19, %v1375_v19  ;;  %v1316_v47 = vld [vmem:[%s3842_s14 + $0x188] sm:$0xff] }
 0x184   : > { %v2764_v44 = vadd.f32 %v2763_v37, %v2508_v5  ;;  %v1378_v33 = vsub.f32 %v1314_v34, %v1250_v28  ;;  %v1951_v58 = vsub.f32 %v3298_v36, %v3234_v26  ;;  %v2013_v18 = vmul.f32 %v1949_v30, %v1949_v30  ;;  %v1318_v5 = vld [vmem:[%s3842_s14 + $0x198] sm:$0xff]  ;;  %v3239_v23 = vld [vmem:[%s3835_s19 + $0x368] sm:$0xff]  ;;  %v1255_v36 = vld [vmem:[%s3835_s19 + $0x1a0] sm:$0xff] }
 0x185   : > { %v1757_v6 = vadd.f32 %v1756_v20, %v1436_v9  ;;  %v2267_v57 = vadd.f32 %v2266_v54, %v2011_v31  ;;  %v1440_v59 = vmul.f32 %v1376_v48, %v1376_v48  ;;  %v1952_v17 = vsub.f32 %v3299_v24, %v3235_v42  ;;  %v3238_v20 = vld [vmem:[%s3835_s19 + $0x360] sm:$0xff]  ;;  %v3303_v28 = vld [vmem:[%s3842_s14 + $0x368] sm:$0xff]  ;;  %v3409_v26 = vld [vmem:[%s3842_s14 + $0x4b8] sm:$0xff] }
 0x186   : > { %v2014_v0 = vmul.f32 %v1950_v39, %v1950_v39  ;;  %v2447_v7 = vsub.f32 %v3407_v50, %v3343_v51  ;;  %v2510_v29 = vmul.f32 %v2446_v22, %v2446_v22  ;;  %v2765_v8 = vadd.f32 %v2764_v44, %v2509_v45  ;;  %v1256_v39 = vld [vmem:[%s3835_s19 + $0x1a8] sm:$0xff] }
 0x187   : > { %v1758_v46 = vadd.f32 %v1757_v6, %v1437_v56  ;;  %v2268_v43 = vadd.f32 %v2267_v57, %v2012_v41  ;;  %v1379_v9 = vsub.f32 %v1315_v55, %v1251_v14  ;;  %v1441_v52 = vmul.f32 %v1377_v38, %v1377_v38  ;;  %v3345_v6 = vld [vmem:[%s3835_s19 + $0x4b8] sm:$0xff]  ;;  %v1319_v41 = vld [vmem:[%s3842_s14 + $0x1a0] sm:$0xff]  ;;  %v1320_v45 = vld [vmem:[%s3842_s14 + $0x1a8] sm:$0xff] }
 0x188   : > { %v1380_v40 = vsub.f32 %v1316_v47, %v1252_v32  ;;  %v1953_v2 = vsub.f32 %v3300_v62, %v3236_v61  ;;  %v2015_v27 = vmul.f32 %v1951_v58, %v1951_v58  ;;  %v1442_v19 = vmul.f32 %v1378_v33, %v1378_v33  ;;  %v3241_v14 = vld [vmem:[%s3835_s19 + $0x378] sm:$0xff]  ;;  %v3410_v61 = vld [vmem:[%s3842_s14 + $0x4c0] sm:$0xff]  ;;  %v1257_v62 = vld [vmem:[%s3835_s19 + $0x1b0] sm:$0xff] }
 0x189   : > { %v1759_v60 = vadd.f32 %v1758_v46, %v1438_v49  ;;  %v2269_v35 = vadd.f32 %v2268_v43, %v2013_v18  ;;  %v1954_v25 = vsub.f32 %v3301_v21, %v3237_v1  ;;  %v2016_v37 = vmul.f32 %v1952_v17, %v1952_v17  ;;  %v3304_v46 = vld [vmem:[%s3842_s14 + $0x370] sm:$0xff]  ;;  %v3305_v32 = vld [vmem:[%s3842_s14 + $0x378] sm:$0xff] }
 0x18a   : > { %v2448_v48 = vsub.f32 %v3408_v16, %v3344_v53  ;;  %v2511_v30 = vmul.f32 %v2447_v7, %v2447_v7  ;;  %v2766_v31 = vadd.f32 %v2765_v8, %v2510_v29  ;;  %v1381_v63 = vsub.f32 %v1317_v3, %v1253_v12  ;;  %v1258_v17 = vld [vmem:[%s3835_s19 + $0x1b8] sm:$0xff]  ;;  %v3243_v12 = vld [vmem:[%s3835_s19 + $0x388] sm:$0xff] }
 0x18b   : > { %v1760_v10 = vadd.f32 %v1759_v60, %v1439_v4  ;;  %v2270_v11 = vadd.f32 %v2269_v35, %v2014_v0  ;;  %v1443_v34 = vmul.f32 %v1379_v9, %v1379_v9  ;;  %v1382_v42 = vsub.f32 %v1318_v5, %v1254_v13  ;;  %v3240_v4 = vld [vmem:[%s3835_s19 + $0x370] sm:$0xff]  ;;  %v3346_v60 = vld [vmem:[%s3835_s19 + $0x4c0] sm:$0xff]  ;;  %v1322_v29 = vld [vmem:[%s3842_s14 + $0x1b8] sm:$0xff] }
 0x18c   : > { %v1955_v24 = vsub.f32 %v3302_v15, %v3238_v20  ;;  %v2017_v54 = vmul.f32 %v1953_v2, %v1953_v2  ;;  %v1444_v44 = vmul.f32 %v1380_v40, %v1380_v40  ;;  %v1956_v51 = vsub.f32 %v3303_v28, %v3239_v23  ;;  %v1321_v0 = vld [vmem:[%s3842_s14 + $0x1b0] sm:$0xff]  ;;  %v3307_v13 = vld [vmem:[%s3842_s14 + $0x388] sm:$0xff]  ;;  %v1259_v15 = vld [vmem:[%s3835_s19 + $0x1c0] sm:$0xff] }
 0x18d   : > { %v1761_v56 = vadd.f32 %v1760_v10, %v1440_v59  ;;  %v2271_v22 = vadd.f32 %v2270_v11, %v2015_v27  ;;  %v2018_v50 = vmul.f32 %v1954_v25, %v1954_v25  ;;  %v2449_v33 = vsub.f32 %v3409_v26, %v3345_v6  ;;  %v3306_v10 = vld [vmem:[%s3842_s14 + $0x380] sm:$0xff]  ;;  %v3411_v20 = vld [vmem:[%s3842_s14 + $0x4c8] sm:$0xff] }
 0x18e   : > { %v2512_v58 = vmul.f32 %v2448_v48, %v2448_v48  ;;  %v2767_v18 = vadd.f32 %v2766_v31, %v2511_v30  ;;  %v1383_v57 = vsub.f32 %v1319_v41, %v1255_v36  ;;  %v1445_v47 = vmul.f32 %v1381_v63, %v1381_v63  ;;  %v1260_v25 = vld [vmem:[%s3835_s19 + $0x1c8] sm:$0xff]  ;;  %v3245_v36 = vld [vmem:[%s3835_s19 + $0x398] sm:$0xff] }
 0x18f   : > { %v1762_v49 = vadd.f32 %v1761_v56, %v1441_v52  ;;  %v2272_v55 = vadd.f32 %v2271_v22, %v2016_v37  ;;  %v1384_v1 = vsub.f32 %v1320_v45, %v1256_v39  ;;  %v1957_v21 = vsub.f32 %v3304_v46, %v3240_v4  ;;  %v3242_v52 = vld [vmem:[%s3835_s19 + $0x380] sm:$0xff]  ;;  %v3347_v56 = vld [vmem:[%s3835_s19 + $0x4c8] sm:$0xff]  ;;  %v3309_v39 = vld [vmem:[%s3842_s14 + $0x398] sm:$0xff] }
 0x190   : > { %v2019_v43 = vmul.f32 %v1955_v24, %v1955_v24  ;;  %v1446_v8 = vmul.f32 %v1382_v42, %v1382_v42  ;;  %v1958_v53 = vsub.f32 %v3305_v32, %v3241_v14  ;;  %v2020_v16 = vmul.f32 %v1956_v51, %v1956_v51  ;;  %v1323_v37 = vld [vmem:[%s3842_s14 + $0x1c0] sm:$0xff]  ;;  %v1324_v30 = vld [vmem:[%s3842_s14 + $0x1c8] sm:$0xff]  ;;  %v3412_v4 = vld [vmem:[%s3842_s14 + $0x4d0] sm:$0xff] }
 0x191   : > { %v1763_v38 = vadd.f32 %v1762_v49, %v1442_v19  ;;  %v2273_v7 = vadd.f32 %v2272_v55, %v2017_v54  ;;  %v2450_v40 = vsub.f32 %v3410_v61, %v3346_v60  ;;  %v2513_v2 = vmul.f32 %v2449_v33, %v2449_v33  ;;  %v3308_v49 = vld [vmem:[%s3842_s14 + $0x390] sm:$0xff]  ;;  %v3247_v60 = vld [vmem:[%s3835_s19 + $0x3a8] sm:$0xff] }
 0x192   : > { %v2768_v27 = vadd.f32 %v2767_v18, %v2512_v58  ;;  %v1385_v35 = vsub.f32 %v1321_v0, %v1257_v62  ;;  %v1447_v5 = vmul.f32 %v1383_v57, %v1383_v57  ;;  %v1386_v23 = vsub.f32 %v1322_v29, %v1258_v17  ;;  %v1261_v46 = vld [vmem:[%s3835_s19 + $0x1d0] sm:$0xff]  ;;  %v3246_v18 = vld [vmem:[%s3835_s19 + $0x3a0] sm:$0xff]  ;;  %v3311_v61 = vld [vmem:[%s3842_s14 + $0x3a8] sm:$0xff] }
 0x193   : > { %v1764_v59 = vadd.f32 %v1763_v38, %v1443_v34  ;;  %v2274_v3 = vadd.f32 %v2273_v7, %v2018_v50  ;;  %v1959_v28 = vsub.f32 %v3306_v10, %v3242_v52  ;;  %v2021_v11 = vmul.f32 %v1957_v21, %v1957_v21  ;;  %v3244_v34 = vld [vmem:[%s3835_s19 + $0x390] sm:$0xff]  ;;  %v3310_v57 = vld [vmem:[%s3842_s14 + $0x3a0] sm:$0xff]  ;;  %v3349_v7 = vld [vmem:[%s3835_s19 + $0x4d8] sm:$0xff] }
 0x194   : > { %v1448_v31 = vmul.f32 %v1384_v1, %v1384_v1  ;;  %v1960_v6 = vsub.f32 %v3307_v13, %v3243_v12  ;;  %v2022_v26 = vmul.f32 %v1958_v53, %v1958_v53  ;;  %v2451_v42 = vsub.f32 %v3411_v20, %v3347_v56  ;;  %v3348_v38 = vld [vmem:[%s3835_s19 + $0x4d0] sm:$0xff]  ;;  %v3413_v29 = vld [vmem:[%s3842_s14 + $0x4d8] sm:$0xff] }
 0x195   : > { %v1765_v9 = vadd.f32 %v1764_v59, %v1444_v44  ;;  %v2275_v48 = vadd.f32 %v2274_v3, %v2019_v43  ;;  %v2514_v24 = vmul.f32 %v2450_v40, %v2450_v40  ;;  %v2769_v54 = vadd.f32 %v2768_v27, %v2513_v2  ;;  %v1325_v55 = vld [vmem:[%s3842_s14 + $0x1d0] sm:$0xff] }
 0x196   : > { %v1387_v22 = vsub.f32 %v1323_v37, %v1259_v15  ;;  %v1449_v45 = vmul.f32 %v1385_v35, %v1385_v35  ;;  %v1388_v51 = vsub.f32 %v1324_v30, %v1260_v25  ;;  %v1961_v50 = vsub.f32 %v3308_v49, %v3244_v34  ;;  %v3248_v3 = vld [vmem:[%s3835_s19 + $0x3b0] sm:$0xff]  ;;  %v3249_v35 = vld [vmem:[%s3835_s19 + $0x3b8] sm:$0xff] }
 0x197   : > { %v1766_v19 = vadd.f32 %v1765_v9, %v1445_v47  ;;  %v2276_v41 = vadd.f32 %v2275_v48, %v2020_v16  ;;  %v2023_v14 = vmul.f32 %v1959_v28, %v1959_v28  ;;  %v1450_v33 = vmul.f32 %v1386_v23, %v1386_v23  ;;  %v1326_v9 = vld [vmem:[%s3842_s14 + $0x1d8] sm:$0xff]  ;;  %v3312_v40 = vld [vmem:[%s3842_s14 + $0x3b0] sm:$0xff]  ;;  %v3350_v23 = vld [vmem:[%s3835_s19 + $0x4e0] sm:$0xff] }
 0x198   : > { %v1962_v47 = vsub.f32 %v3309_v39, %v3245_v36  ;;  %v2024_v59 = vmul.f32 %v1960_v6, %v1960_v6  ;;  %v2452_v17 = vsub.f32 %v3412_v4, %v3348_v38  ;;  %v2515_v0 = vmul.f32 %v2451_v42, %v2451_v42  ;;  %v3414_v28 = vld [vmem:[%s3842_s14 + $0x4e0] sm:$0xff]  ;;  %v3315_v42 = vld [vmem:[%s3842_s14 + $0x3c8] sm:$0xff] }
 0x199   : > { %v1767_v63 = vadd.f32 %v1766_v19, %v1446_v8  ;;  %v2277_v32 = vadd.f32 %v2276_v41, %v2021_v11  ;;  %v2770_v1 = vadd.f32 %v2769_v54, %v2514_v24  ;;  %v1451_v21 = vmul.f32 %v1387_v22, %v1387_v22  ;;  %v1262_v8 = vld [vmem:[%s3835_s19 + $0x1d8] sm:$0xff]  ;;  %v1263_v11 = vld [vmem:[%s3835_s19 + $0x1e0] sm:$0xff]  ;;  %v3251_v41 = vld [vmem:[%s3835_s19 + $0x3c8] sm:$0xff] }
 0x19a   : > { %v1389_v52 = vsub.f32 %v1325_v55, %v1261_v46  ;;  %v1963_v10 = vsub.f32 %v3310_v57, %v3246_v18  ;;  %v2025_v53 = vmul.f32 %v1961_v50, %v1961_v50  ;;  %v1452_v12 = vmul.f32 %v1388_v51, %v1388_v51  ;;  %v1327_v48 = vld [vmem:[%s3842_s14 + $0x1e0] sm:$0xff]  ;;  %v3351_v46 = vld [vmem:[%s3835_s19 + $0x4e8] sm:$0xff]  ;;  %v3252_v18 = vld [vmem:[%s3835_s19 + $0x3d0] sm:$0xff] }
 0x19b   : > { %v1768_v44 = vadd.f32 %v1767_v63, %v1447_v5  ;;  %v2278_v62 = vadd.f32 %v2277_v32, %v2022_v26  ;;  %v1964_v2 = vsub.f32 %v3311_v61, %v3247_v60  ;;  %v2026_v27 = vmul.f32 %v1962_v47, %v1962_v47  ;;  %v3313_v5 = vld [vmem:[%s3842_s14 + $0x3b8] sm:$0xff]  ;;  %v3250_v6 = vld [vmem:[%s3835_s19 + $0x3c0] sm:$0xff]  ;;  %v3415_v51 = vld [vmem:[%s3842_s14 + $0x4e8] sm:$0xff] }
 0x19c   : > { %v2453_v56 = vsub.f32 %v3413_v29, %v3349_v7  ;;  %v2516_v20 = vmul.f32 %v2452_v17, %v2452_v17  ;;  %v2771_v15 = vadd.f32 %v2770_v1, %v2515_v0  ;;  %v1390_v25 = vsub.f32 %v1326_v9, %v1262_v8  ;;  %v3314_v26 = vld [vmem:[%s3842_s14 + $0x3c0] sm:$0xff]  ;;  %v1264_v50 = vld [vmem:[%s3835_s19 + $0x1e8] sm:$0xff]  ;;  %v3316_v57 = vld [vmem:[%s3842_s14 + $0x3d0] sm:$0xff] }
 0x19d   : > { %v1769_v58 = vadd.f32 %v1768_v44, %v1448_v31  ;;  %v2279_v16 = vadd.f32 %v2278_v62, %v2023_v14  ;;  %v1453_v30 = vmul.f32 %v1389_v52, %v1389_v52  ;;  %v1965_v31 = vsub.f32 %v3312_v40, %v3248_v3  ;;  %v1328_v14 = vld [vmem:[%s3842_s14 + $0x1e8] sm:$0xff]  ;;  %v3253_v60 = vld [vmem:[%s3835_s19 + $0x3d8] sm:$0xff]  ;;  %v3352_v29 = vld [vmem:[%s3835_s19 + $0x4f0] sm:$0xff] }
 0x19e   : > { %v2027_v63 = vmul.f32 %v1963_v10, %v1963_v10  ;;  %v1966_v36 = vsub.f32 %v3313_v5, %v3249_v35  ;;  %v2028_v39 = vmul.f32 %v1964_v2, %v1964_v2  ;;  %v2454_v54 = vsub.f32 %v3414_v28, %v3350_v23  ;;  %v3317_v61 = vld [vmem:[%s3842_s14 + $0x3d8] sm:$0xff]  ;;  %v3416_v8 = vld [vmem:[%s3842_s14 + $0x4f0] sm:$0xff]  ;;  %v3318_v3 = vld [vmem:[%s3842_s14 + $0x3e0] sm:$0xff] }
 0x19f   : > { %v1770_v43 = vadd.f32 %v1769_v58, %v1449_v45  ;;  %v2280_v19 = vadd.f32 %v2279_v16, %v2024_v59  ;;  %v2517_v22 = vmul.f32 %v2453_v56, %v2453_v56  ;;  %v2772_v45 = vadd.f32 %v2771_v15, %v2516_v20  ;;  %v1265_v9 = vld [vmem:[%s3835_s19 + $0x1f0] sm:$0xff]  ;;  %v1330_v35 = vld [vmem:[%s3842_s14 + $0x1f8] sm:$0xff]  ;;  %v3255_v5 = vld [vmem:[%s3835_s19 + $0x3e8] sm:$0xff] }
 0x1a0   : > { %v1391_v44 = vsub.f32 %v1327_v48, %v1263_v11  ;;  %v1454_v38 = vmul.f32 %v1390_v25, %v1390_v25  ;;  %v1459_v4 = vlaneseq  ;;  %v1967_v55 = vsub.f32 %v3314_v26, %v3250_v6  ;;  %v1329_v52 = vld [vmem:[%s3842_s14 + $0x1f0] sm:$0xff]  ;;  %v3353_v48 = vld [vmem:[%s3835_s19 + $0x4f8] sm:$0xff]  ;;  %v3354_v26 = vld [vmem:[%s3835_s19 + $0x500] sm:$0xff] }
 0x1a1   : > { %v1771_v13 = vadd.f32 %v1770_v43, %v1450_v33  ;;  %v2281_v34 = vadd.f32 %v2280_v19, %v2025_v53  ;;  %v2029_v33 = vmul.f32 %v1965_v31, %v1965_v31  ;;  %v1968_v47 = vsub.f32 %v3315_v42, %v3251_v41  ;;  %v3319_v19 = vld [vmem:[%s3842_s14 + $0x3e8] sm:$0xff]  ;;  %v3256_v11 = vld [vmem:[%s3835_s19 + $0x3f0] sm:$0xff]  ;;  %v3257_v42 = vld [vmem:[%s3835_s19 + $0x3f8] sm:$0xff] }
 0x1a2   : > { %v2030_v59 = vmul.f32 %v1966_v36, %v1966_v36  ;;  %v2455_v17 = vsub.f32 %v3415_v51, %v3351_v46  ;;  %v2518_v0 = vmul.f32 %v2454_v54, %v2454_v54  ;;  %v2773_v1 = vadd.f32 %v2772_v45, %v2517_v22  ;;  %v3418_v36 = vld [vmem:[%s3842_s14 + $0x500] sm:$0xff] }
 0x1a3   : > { %v1772_v37 = vadd.f32 %v1771_v13, %v1451_v21  ;;  %v2282_v24 = vadd.f32 %v2281_v34, %v2026_v27  ;;  %v1392_v21 = vsub.f32 %v1328_v14, %v1264_v50  ;;  %v1455_v43 = vmul.f32 %v1391_v44, %v1391_v44  ;;  %v3254_v13 = vld [vmem:[%s3835_s19 + $0x3e0] sm:$0xff]  ;;  %v1266_v27 = vld [vmem:[%s3835_s19 + $0x1f8] sm:$0xff] }
 0x1a4   : > { %v1460_v7 = vshrl.u32 %v1459_v4, 7  ;;  %v1969_v53 = vsub.f32 %v3316_v57, %v3252_v18  ;;  %v2031_v16 = vmul.f32 %v1967_v55, %v1967_v55  ;;  %v1970_v40 = vsub.f32 %v3317_v61, %v3253_v60 }
 0x1a5   : > { %v1773_v49 = vadd.f32 %v1772_v37, %v1452_v12  ;;  %v2283_v58 = vadd.f32 %v2282_v24, %v2027_v63  ;;  %v2032_v2 = vmul.f32 %v1968_v47, %v1968_v47  ;;  %v2456_v20 = vsub.f32 %v3416_v8, %v3352_v29  ;;  %v3320_v63 = vld [vmem:[%s3842_s14 + $0x3f0] sm:$0xff]  ;;  %v3321_v24 = vld [vmem:[%s3842_s14 + $0x3f8] sm:$0xff] }
 0x1a6   : > { %v2519_v15 = vmul.f32 %v2455_v17, %v2455_v17  ;;  %v2774_v25 = vadd.f32 %v2773_v1, %v2518_v0  ;;  %v1393_v37 = vsub.f32 %v1329_v52, %v1265_v9  ;;  %v1456_v23 = vmul.f32 %v1392_v21, %v1392_v21 }
 0x1a7   : > { %v1774_v32 = vadd.f32 %v1773_v49, %v1453_v30  ;;  %v2284_v62 = vadd.f32 %v2283_v58, %v2028_v39  ;;  %v1492_v28 = vadd.s32 256, %v1460_v7  ;;  %v3417_v30 = vld [vmem:[%s3842_s14 + $0x4f8] sm:$0xff]  ;;  %v1971_v34 = vsub.f32 %v3318_v3, %v3254_v13 }
 0x1a8   : > { %v2033_v49 = vmul.f32 %v1969_v53, %v1969_v53  ;;  %v1972_v39 = vsub.f32 %v3319_v19, %v3255_v5  ;;  %v2034_v41 = vmul.f32 %v1970_v40, %v1970_v40  ;;  %v2457_v22 = vsub.f32 %v3417_v30, %v3353_v48 }
 0x1a9   : > { %v1775_v10 = vadd.f32 %v1774_v32, %v1454_v38  ;;  %v2285_v12 = vadd.f32 %v2284_v62, %v2029_v33  ;;  %v2520_v45 = vmul.f32 %v2456_v20, %v2456_v20  ;;  %v2775_v44 = vadd.f32 %v2774_v25, %v2519_v15 }
 0x1aa   : > { %v1394_v38 = vsub.f32 %v1330_v35, %v1266_v27  ;;  %v1457_v4 = vmul.f32 %v1393_v37, %v1393_v37  ;;  %v1973_v46 = vsub.f32 %v3320_v63, %v3256_v11  ;;  %v2458_v51 = vsub.f32 %v3418_v36, %v3354_v26 }
 0x1ab   : > { %v2286_v56 = vadd.f32 %v2285_v12, %v2030_v59  ;;  %v1776_v31 = vadd.f32 %v1775_v10, %v1455_v43  ;;  %v2035_v14 = vmul.f32 %v1971_v34, %v1971_v34  ;;  %v2587_v55 = vadd.s32 1024, %v1492_v28 }
 0x1ac   : > { %v1974_v33 = vsub.f32 %v3321_v24, %v3257_v42  ;;  %v2036_v58 = vmul.f32 %v1972_v39, %v1972_v39  ;;  %v2521_v57 = vmul.f32 %v2457_v22, %v2457_v22  ;;  %v2776_v47 = vadd.f32 %v2775_v44, %v2520_v45 }
 0x1ad   : > { %v2287_v6 = vadd.f32 %v2286_v56, %v2031_v16  ;;  %v1777_v50 = vadd.f32 %v1776_v31, %v1456_v23  ;;  %v1458_v59 = vmul.f32 %v1394_v38, %v1394_v38  ;;  %v2522_v60 = vmul.f32 %v2458_v51, %v2458_v51 }
 0x1ae   : > { %v2037_v62 = vmul.f32 %v1973_v46, %v1973_v46  ;;  %vm2651_vm0 = vcmp.lt.s32.totalorder %v2587_v55, 1285  ;;  %v2038_v0 = vmul.f32 %v1974_v33, %v1974_v33  ;;  %v2777_v21 = vadd.f32 %v2776_v47, %v2521_v57 }
 0x1af   : > { %v2288_v54 = vadd.f32 %v2287_v6, %v2032_v2  ;;  %v1778_v61 = vadd.f32 %v1777_v50, %v1457_v4  ;;  %v2715_v43 = vsel %vm2651_vm0, %v2522_v60, 0.0 }
 0x1b0   : > { %v2778_v9 = vadd.f32 %v2777_v21, %v2715_v43 }
 0x1b1   : > { %v2289_v32 = vadd.f32 %v2288_v54, %v2033_v49  ;;  %v1779_v7 = vadd.f32 %v1778_v61, %v1458_v59 }
 0x1b3   : > { %v2290_v18 = vadd.f32 %v2289_v32, %v2034_v41 }
 0x1b5   : > { %v2291_v17 = vadd.f32 %v2290_v18, %v2035_v14 }
 0x1b7   : > { %v2292_v1 = vadd.f32 %v2291_v17, %v2036_v58 }
 0x1b9   : > { %v2293_v29 = vadd.f32 %v2292_v1, %v2037_v62 }
 0x1bb   : > { %v2294_v8 = vadd.f32 %v2293_v29, %v2038_v0 }
 0x1bd   : > { %v2295_v52 = vadd.f32 %v2294_v8, %v1779_v7 }
 0x1bf   : > { %v2810_v10 = vadd.f32 %v2778_v9, %v2295_v52 }
 0x1c1   : > { %2811 = vst [vmem:[%s3849_s7] sm:$0xff] %v2810_v10 }
 0x1c2 PF: > { %s3451_s20 = sshll.u32 %s3696_s13, 3  ;;  %s2825_s26 = sshll.u32 %s3849_s7, 4  ;;  %s2826_s26 = int_to_ptr.vmem [resolvable:$true] %s2825_s26 }
 0x1c3   : > { %s2823_s4 = scalar_lea.hbm %s4793_s2, %s3451_s20  ;;  %s2813_s17 = scalar_lea.sflag [#allocation4], %s3831_s24 }
 0x1c4   : > { %s2827_s30 = sshll.u32 %s2823_s4, 4  ;;  %s3602_s13 = scalar_lea.hbm %s4793_s2, 16  ;;  %s2828_s30 = int_to_ptr.hbm [resolvable:$true] %s2827_s30 }
 0x1c5   : > { %s3596_s16 = sshra.s32 %s2828_s30, 4  ;;  %s3597_s16 = int_to_ptr.hbm [resolvable:$true] %s3596_s16 }
 0x1c6   : > { %s3598_s27 = scalar_lea.hbm %s3597_s16, 8  ;;  %p3603_p12 = scmp.lt.s32.totalorder %s3597_s16, %s4793_s2 }
 0x1c7   : > { %p3599_p4 = scmp.ne.s32.totalorder %s3597_s16, %s3598_s27  ;;  %p3604_p0 = scmp.lt.s32.totalorder %s3602_s13, %s3598_s27 }
 0x1c9   : > { %p3600_p7 = pnand %p3599_p4, %p3723_p9  ;;  %p3605_p1 = por %p3604_p0, %p3603_p12 }
 0x1cb   : > { %p3601_p8 = pneg %p3600_p7 }
 0x1cd   : > { %p3606_p10 = pnand %p3605_p1, %p3601_p8 }
 0x1cf   : > { %3609 = shalt.err (!%p3606_p10)
}
 0x1d0   : > { %3461 = dma.vmem_to_hbm [thread:$0]  (%p3723_p9), %s2826_s26, 128, %s2828_s30, %s2813_s17  }
 0x1d1 PF: > { %s2839_s24 = sand.u32 1, %s3640_s9   ;;  %p4801_p11 = scmp.ne.s32.totalorder %s4798_s22, 0 }
 0x1d2   : > { %p4802_p13 = scmp.ge.s32.totalorder %s3652_s12, 2  ;;  %s2840_s19 = scalar_lea.sflag [#allocation4], %s2839_s24 }
 0x1d4   : > { %p3464_p2 = pnand %p4802_p13, %p4801_p11 }
 0x1d6   : > { %p3465_p3 = pneg %p3464_p2 }
 0x1d8   : > { %3635 = dma.done.wait (%p3465_p3), %s2840_s19, 128  }
 0x1d9   : > { %3637 = vsyncadd (%p3465_p3), %s2840_s19, 4294967168  ;;  %p18_p5 = scmp.ge.s32.totalorder %s3700_s15, 4   ;;  %s4803_s9 = smov %s3644_s10 }
 0x1da   : > { %s4804_s10 = smov %s3648_s11  ;;  %s4805_s11 = smov %s3712_s18 }
 0x1db   : > { %s4806_s12 = smov %s3700_s15  ;;  %20 = sbr.rel (!%p18_p5) target bundleno = 7 (0x7), region = 102 }
 0x1e0   :  { %2846 = vsyncpa [#allocation3], 1 }
 0x1e1   :  { %2848 = vsyncpa [#allocation3 + $0x1], 1 }
 0x1e2   :  { %2849 = vsyncpa [#allocation6], 1 }
 0x1e3   :  { %2851 = vsyncpa [#allocation6 + $0x1], 1 }
 0x1e4   :  { %2852 = vsyncpa [#allocation4], 1 }
 0x1e5   :  { %2854 = vsyncpa [#allocation4 + $0x1], 1 }

</bundles_post_ra>
